<compile_context>
chip_gen: v6e
topology: v6e:2x2x1
jax: 0.10.0
libtpu: 0.0.40
codegen_flags: <defaults>
</compile_context>

<pallas_src>
import functools
import math

import jax
import jax.numpy as jnp
from jax.experimental import pallas as pl
from jax.experimental.pallas import tpu as pltpu

_LANE = 128


def _round_up(n, m=_LANE):
    return ((n + m - 1) // m) * m


# ------------------------------ fused kernel ------------------------------

def _make_kernel(*, T, Tc, Hp, halo_pad, T_ext, T_in, num_layer,
                 CAp, CCp, Rp, Gp, Sp, CHp):
    f32, bf16 = jnp.float32, jnp.bfloat16
    sqrt_half = math.sqrt(0.5)

    def kernel(in_a_hbm, c_hbm, in_b_ref,
               front_w_ref, front_b_ref, fused_w_ref, fg_b_ref,
               rs_w_ref, rs_b_ref, f1_w_ref, f1_b_ref, head_w_ref, head_b_ref,
               out_b_ref, ld_ref,
               ina_buf, c_buf, sem, hpad_ref, stg_ref, skip_ref):
        b = pl.program_id(0)
        ci = pl.program_id(1)
        t0 = ci * Tc                                   # window start in padded HBM coords

        # Overlapping haloed windows -> manual DMA (overlap is inexpressible as blocks).
        cp_a = pltpu.make_async_copy(in_a_hbm.at[b, pl.ds(t0, T_in), :], ina_buf, sem.at[0])
        cp_c = pltpu.make_async_copy(c_hbm.at[b, pl.ds(t0, T_ext), :], c_buf, sem.at[1])
        cp_a.start()
        cp_c.start()

        # Row validity over the extended window (global time = t0 - Hp + row).  Rows
        # outside [0, T) must act like the reference's per-layer zero padding.
        row = jax.lax.broadcasted_iota(jnp.int32, (T_ext, 1), 0)
        g = t0 - Hp + row
        mask_ext = ((g >= 0) & (g < T)).astype(f32)                  # (T_ext, 1)
        mask_c = mask_ext[Hp:Hp + Tc, :]                             # centre rows

        # Zero ONLY the conv-halo rows of the haloed scratch (centre is refreshed each
        # layer); init the skip accumulator.  This overlaps with the in-flight DMAs.
        hpad_ref[pl.ds(0, halo_pad), :] = jnp.zeros((halo_pad, Rp), f32)
        hpad_ref[pl.ds(halo_pad + T_ext, halo_pad), :] = jnp.zeros((halo_pad, Rp), f32)
        skip_ref[...] = jnp.zeros((Tc, Sp), f32)

        cp_c.wait()
        stg_ref[:, pl.ds(3 * Rp, CCp)] = c_buf[...]                  # cond written once

        cp_a.wait()
        # ---- front conv (k=3, SAME) as one wide-K matmul: (T_ext,3*CAp)@(3*CAp,Rp) ----
        for k in range(3):
            stg_ref[:, pl.ds(k * CAp, CAp)] = ina_buf[pl.ds(k, T_ext), :].astype(bf16)
        h = jnp.dot(stg_ref[:, pl.ds(0, 3 * CAp)], front_w_ref[...],
                    preferred_element_type=f32) + front_b_ref[...]
        h = h * mask_ext                                             # (T_ext, Rp) f32

        # ---- dilated gated residual blocks (static unroll -> static slice offsets) ----
        for n in range(num_layer):
            d = 1 << n
            hpad_ref[pl.ds(halo_pad, T_ext), :] = h                  # refresh centre
            # wide-K staging: [h(t-d) | h(t) | h(t+d) | cond]  -> one K=3*Rp+CCp matmul
            stg_ref[:, pl.ds(0, Rp)] = hpad_ref[pl.ds(halo_pad - d, T_ext), :].astype(bf16)
            stg_ref[:, pl.ds(Rp, Rp)] = h.astype(bf16)
            stg_ref[:, pl.ds(2 * Rp, Rp)] = hpad_ref[pl.ds(halo_pad + d, T_ext), :].astype(bf16)
            pre = jnp.dot(stg_ref[...], fused_w_ref[n],
                          preferred_element_type=f32) + fg_b_ref[n]  # (T_ext, 2*Gp)
            z = jnp.tanh(pre[:, :Gp]) * jax.nn.sigmoid(pre[:, Gp:])
            rs = jnp.dot(z.astype(bf16), rs_w_ref[n],
                         preferred_element_type=f32) + rs_b_ref[n]   # (T_ext, Rp+Sp)
            h = (h + rs[:, :Rp]) * f32(sqrt_half)
            h = h * mask_ext
            skip_ref[...] += rs[Hp:Hp + Tc, Rp:Rp + Sp]              # centre rows only

        # ---- head: ReLU -> 1x1 -> ReLU -> 1x1 ([log_s | t] fused along N) ----
        s1 = jnp.dot(jnp.maximum(skip_ref[...], 0.0).astype(bf16), f1_w_ref[...],
                     preferred_element_type=f32) + f1_b_ref[...]
        s1 = jnp.maximum(s1, 0.0).astype(bf16)
        head = jnp.dot(s1, head_w_ref[...], preferred_element_type=f32) + head_b_ref[...]
        log_s = head[:, :CHp]
        t_shift = head[:, CHp:]

        # affine coupling (padded lanes of in_b / t / log_s are exactly 0)
        out_b_ref[0] = (in_b_ref[0] - t_shift) * jnp.exp(-log_s)
        ld_ref[...] = jnp.full(ld_ref.shape, -jnp.sum(log_s * mask_c), f32)

    return kernel


# ------------------------------ parameters ------------------------------

def init_params(key, in_channel, cin_channel, filter_size, num_layer, w_scale=0.05):
    """Random parameters for Wavenet(in_channel//2 -> in_channel) + coupling head.

    Real-size weights are drawn first, zero-padded to 128-lane-aligned channel axes
    (padded columns stay exactly zero all the way through, including log_s, so the
    logdet sum is unaffected), and pre-stacked along K/N for the fused matmuls.
    Matmul weights are bf16 (MXU), biases f32.
    """
    ch = in_channel // 2
    cc = cin_channel // 2
    R = G = S = filter_size
    CAp, CCp, CHp = _round_up(ch), _round_up(cc), _round_up(ch)
    Rp, Gp, Sp = _round_up(R), _round_up(G), _round_up(S)

    keys = iter(jax.random.split(key, 10 * num_layer + 8))
    f32, bf16 = jnp.float32, jnp.bfloat16

    def w(*shape):
        return w_scale * jax.random.normal(next(keys), shape, f32)

    def pad2(a, r, c_):
        return jnp.pad(a, ((0, r - a.shape[0]), (0, c_ - a.shape[1])))

    # front conv (k=3): K-stacked as [x(t-1); x(t); x(t+1)]
    front_w = jnp.concatenate([pad2(w(ch, R), CAp, Rp) for _ in range(3)],
                              axis=0).astype(bf16)                     # (3*CAp, Rp)
    front_b = jnp.zeros((1, Rp), f32)

    fused_w, fg_b, rs_w, rs_b = [], [], [], []
    for _ in range(num_layer):
        # K-stacked [h(t-d); h(t); h(t+d); cond], N-stacked [filter | gate]
        taps = [jnp.concatenate([pad2(w(R, G), Rp, Gp), pad2(w(R, G), Rp, Gp)], axis=1)
                for _ in range(3)]
        cond = jnp.concatenate([pad2(w(cc, G), CCp, Gp), pad2(w(cc, G), CCp, Gp)], axis=1)
        fused_w.append(jnp.concatenate(taps + [cond], axis=0))         # (3*Rp+CCp, 2*Gp)
        fg_b.append(jnp.zeros((1, 2 * Gp), f32))
        # 1x1 residual conv and 1x1 skip conv fused along N
        rs_w.append(jnp.concatenate([pad2(w(G, R), Gp, Rp), pad2(w(G, S), Gp, Sp)], axis=1))
        rs_b.append(jnp.zeros((1, Rp + Sp), f32))

    return {
        "front_w": front_w, "front_b": front_b,
        "fused_w": jnp.stack(fused_w).astype(bf16),     # (L, 3*Rp+CCp, 2*Gp)
        "fg_b": jnp.stack(fg_b),                        # (L, 1, 2*Gp)
        "rs_w": jnp.stack(rs_w).astype(bf16),           # (L, Gp, Rp+Sp)
        "rs_b": jnp.stack(rs_b),                        # (L, 1, Rp+Sp)
        "f1_w": pad2(w(S, S), Sp, Sp).astype(bf16),
        "f1_b": jnp.zeros((1, Sp), f32),
        # final 1x1 producing [log_s | t]; padded columns are exactly zero
        "head_w": jnp.concatenate([pad2(w(S, ch), Sp, CHp), pad2(w(S, ch), Sp, CHp)],
                                  axis=1).astype(bf16), # (Sp, 2*CHp)
        "head_b": jnp.zeros((1, 2 * CHp), f32),
    }


# ------------------------------ forward wrapper ------------------------------

def affine_coupling_forward(params, x_ncw, c_ncw, *, time_chunk=256):
    """Matches AffineCoupling.forward (affine=True, causal=False); NCW in / out."""
    B, Cin, T = x_ncw.shape
    ch = Cin // 2
    cc = c_ncw.shape[1] // 2

    # static dims recovered from the packed weights
    CAp = params["front_w"].shape[0] // 3
    Rp = params["front_w"].shape[1]
    L = params["fused_w"].shape[0]
    CCp = params["fused_w"].shape[1] - 3 * Rp
    Gp = params["fused_w"].shape[2] // 2
    Sp = params["f1_w"].shape[0]
    CHp = params["head_w"].shape[1] // 2
    assert CAp <= Rp, "front staging reuses the first 3*Rp lanes of the layer staging buffer"

    # Per-chunk recompute halo: sum of dilations (2^L - 1) + 1 for the k=3 front conv.
    Hp = _round_up(1 << L, 8)
    halo_pad = _round_up(1 << (L - 1), 8)        # in-scratch conv read halo (max dilation)
    Tc = max(8, min(_round_up(time_chunk, 8), _round_up(T, 8)))
    n_chunks = -(-T // Tc)
    Ttot = n_chunks * Tc
    T_ext = Tc + 2 * Hp
    T_in = T_ext + 2

    x = jnp.transpose(x_ncw, (0, 2, 1))          # (B, T, Cin)
    c = jnp.transpose(c_ncw, (0, 2, 1))          # (B, T, Ccond)
    in_a, in_b = x[..., :ch], x[..., ch:]
    c_a = c[..., :cc]

    # HBM-side padding: lanes up to 128-aligned widths; time by the chunk halo.
    # c is streamed as bf16 (it only feeds bf16 matmuls); in_a stays f32 (see TODO).
    in_a_p = jnp.pad(in_a, ((0, 0), (Hp + 1, Hp + 1 + Ttot - T), (0, CAp - ch)))
    c_a_p = jnp.pad(c_a, ((0, 0), (Hp, Hp + Ttot - T), (0, CCp - cc))).astype(jnp.bfloat16)
    in_b_p = jnp.pad(in_b, ((0, 0), (0, Ttot - T), (0, CHp - ch)))

    weight_args = (params["front_w"], params["front_b"], params["fused_w"], params["fg_b"],
                   params["rs_w"], params["rs_b"], params["f1_w"], params["f1_b"],
                   params["head_w"], params["head_b"])

    def const_spec(a):
        return pl.BlockSpec(a.shape, lambda b, ci, _nd=a.ndim: (0,) * _nd)

    # Explicit VMEM budget (weights + blocked I/O double-buffered + manual scratch),
    # with headroom; capped below physical VMEM.
    weight_bytes = sum(int(a.size) * a.dtype.itemsize for a in weight_args)
    io_block_bytes = (Tc * CHp * 4) * 2                       # in_b block + out_b block
    scratch_bytes = (T_in * CAp * 4 + T_ext * CCp * 2
                     + (T_ext + 2 * halo_pad) * Rp * 4
                     + T_ext * (3 * Rp + CCp) * 2 + Tc * Sp * 4)
    vmem_limit = int(min(2 * weight_bytes + 2 * io_block_bytes + scratch_bytes + (16 << 20),
                         112 << 20))

    kernel = _make_kernel(T=T, Tc=Tc, Hp=Hp, halo_pad=halo_pad, T_ext=T_ext, T_in=T_in,
                          num_layer=L, CAp=CAp, CCp=CCp, Rp=Rp, Gp=Gp, Sp=Sp, CHp=CHp)

    out_b_p, ld = pl.pallas_call(
        kernel,
        out_shape=(jax.ShapeDtypeStruct((B, Ttot, CHp), jnp.float32),
                   jax.ShapeDtypeStruct((B, n_chunks, 1, 1), jnp.float32)),
        grid=(B, n_chunks),
        in_specs=[pl.BlockSpec(memory_space=pl.ANY),          # in_a  (haloed window, DMA)
                  pl.BlockSpec(memory_space=pl.ANY),          # cond  (haloed window, DMA)
                  pl.BlockSpec((1, Tc, CHp), lambda b, ci: (b, ci, 0))]
                 + [const_spec(a) for a in weight_args],
        out_specs=(pl.BlockSpec((1, Tc, CHp), lambda b, ci: (b, ci, 0)),
                   pl.BlockSpec((1, 1, 1, 1), lambda b, ci: (b, ci, 0, 0))),
        scratch_shapes=[pltpu.VMEM((T_in, CAp), jnp.float32),          # in_a window
                        pltpu.VMEM((T_ext, CCp), jnp.bfloat16),        # cond window
                        pltpu.SemaphoreType.DMA((2,)),
                        pltpu.VMEM((T_ext + 2 * halo_pad, Rp), jnp.float32),  # haloed h
                        pltpu.VMEM((T_ext, 3 * Rp + CCp), jnp.bfloat16),      # wide-K staging
                        pltpu.VMEM((Tc, Sp), jnp.float32)],            # skip accumulator
        compiler_params=pltpu.CompilerParams(
            dimension_semantics=("parallel", "parallel"),  # B x chunks -> both TCs on v7x
            vmem_limit_bytes=vmem_limit),
    )(in_a_p, c_a_p, in_b_p, *weight_args)

    out_b = out_b_p[:, :T, :ch]
    out = jnp.concatenate([in_a, out_b], axis=-1)                       # (B, T, Cin)
    # spec: logdet = torch.mean(-log_s) / 2  (mean over B * ch * T elements)
    logdet = jnp.sum(ld) / jnp.float32(2 * B * T * ch)
    return jnp.transpose(out, (0, 2, 1)), logdet                        # NCW, scalar


# ------------------------------ demo ------------------------------

if __name__ == "__main__":
    key = jax.random.PRNGKey(0)
    B, in_channel, cin_channel, T = 2, 4, 8, 64
    filter_size, num_layer = 32, 3

    kx, kc, kp = jax.random.split(key, 3)
    x = jax.random.normal(kx, (B, in_channel, T), jnp.float32)
    c = jax.random.normal(kc, (B, cin_channel, T), jnp.float32)
    params = init_params(kp, in_channel, cin_channel, filter_size, num_layer)

    # time_chunk=32 -> 2 time chunks per batch element (exercises the chunked path)
    fwd = jax.jit(functools.partial(affine_coupling_forward, time_chunk=32))
    out, logdet = fwd(params, x, c)
    jax.block_until_ready((out, logdet))

    assert out.shape == (B, in_channel, T) and out.dtype == jnp.float32
    assert logdet.shape == ()
    # in_a passes through unchanged
    assert bool(jnp.allclose(out[:, : in_channel // 2], x[:, : in_channel // 2]))
    assert bool(jnp.all(jnp.isfinite(out))) and bool(jnp.isfinite(logdet))
    print("KERNEL_OK")
</pallas_src>

<mosaic_0001>
module attributes {stable_mosaic.version = 11 : i64} {
  func.func @kernel(%arg0: i32, %arg1: i32, %arg2: memref<2x82x128xf32, #tpu.memory_space<any>>, %arg3: memref<2x80x128xbf16, #tpu.memory_space<any>>, %arg4: memref<1x32x128xf32, #tpu.memory_space<vmem>>, %arg5: memref<384x128xbf16, #tpu.memory_space<vmem>>, %arg6: memref<1x128xf32, #tpu.memory_space<vmem>>, %arg7: memref<3x512x256xbf16, #tpu.memory_space<vmem>>, %arg8: memref<3x1x256xf32, #tpu.memory_space<vmem>>, %arg9: memref<3x128x256xbf16, #tpu.memory_space<vmem>>, %arg10: memref<3x1x256xf32, #tpu.memory_space<vmem>>, %arg11: memref<128x128xbf16, #tpu.memory_space<vmem>>, %arg12: memref<1x128xf32, #tpu.memory_space<vmem>>, %arg13: memref<128x256xbf16, #tpu.memory_space<vmem>>, %arg14: memref<1x256xf32, #tpu.memory_space<vmem>>, %arg15: memref<1x32x128xf32, #tpu.memory_space<vmem>>, %arg16: memref<1x1x1x1xf32, #tpu.memory_space<vmem>>, %arg17: memref<50x128xf32, #tpu.memory_space<vmem>>, %arg18: memref<48x128xbf16, #tpu.memory_space<vmem>>, %arg19: memref<2x!tpu.dma_semaphore, #tpu.memory_space<semaphore_mem>>, %arg20: memref<64x128xf32, #tpu.memory_space<vmem>>, %arg21: memref<48x512xbf16, #tpu.memory_space<vmem>>, %arg22: memref<32x128xf32, #tpu.memory_space<vmem>>) attributes {dimension_semantics = [#tpu.dimension_semantics<parallel>, #tpu.dimension_semantics<parallel>], iteration_bounds = array<i64: 2, 2>, scalar_prefetch = 0 : i64, scratch_operands = 6 : i64, tpu.core_type = #tpu.core_type<tc>, window_params = [{}, {}, {transform_indices = @transform_2, window_bounds = array<i64: 1, 32, 128>}, {pipeline_mode = #tpu.pipeline_mode<synchronous>, transform_indices = @transform_3, window_bounds = array<i64: 384, 128>}, {pipeline_mode = #tpu.pipeline_mode<synchronous>, transform_indices = @transform_4, window_bounds = array<i64: 1, 128>}, {pipeline_mode = #tpu.pipeline_mode<synchronous>, transform_indices = @transform_5, window_bounds = array<i64: 3, 512, 256>}, {pipeline_mode = #tpu.pipeline_mode<synchronous>, transform_indices = @transform_6, window_bounds = array<i64: 3, 1, 256>}, {pipeline_mode = #tpu.pipeline_mode<synchronous>, transform_indices = @transform_7, window_bounds = array<i64: 3, 128, 256>}, {pipeline_mode = #tpu.pipeline_mode<synchronous>, transform_indices = @transform_8, window_bounds = array<i64: 3, 1, 256>}, {pipeline_mode = #tpu.pipeline_mode<synchronous>, transform_indices = @transform_9, window_bounds = array<i64: 128, 128>}, {pipeline_mode = #tpu.pipeline_mode<synchronous>, transform_indices = @transform_10, window_bounds = array<i64: 1, 128>}, {pipeline_mode = #tpu.pipeline_mode<synchronous>, transform_indices = @transform_11, window_bounds = array<i64: 128, 256>}, {pipeline_mode = #tpu.pipeline_mode<synchronous>, transform_indices = @transform_12, window_bounds = array<i64: 1, 256>}, {transform_indices = @transform_13, window_bounds = array<i64: 1, 32, 128>}, {transform_indices = @transform_14, window_bounds = array<i64: 1, 1, 1, 1>}]} {
    %c32_i32 = arith.constant 32 : i32
    %0 = arith.muli %arg1, %c32_i32 : i32
    %c0_i32 = arith.constant 0 : i32
    %c0_i32_0 = arith.constant 0 : i32
    %1 = tpu.memref_slice %arg2[%arg0, %0, %c0_i32_0] : memref<2x82x128xf32, #tpu.memory_space<any>> -> memref<1x50x128xf32, #tpu.memory_space<any>>
    %2 = tpu.memref_squeeze %1 : memref<1x50x128xf32, #tpu.memory_space<any>> -> memref<50x128xf32, #tpu.memory_space<any>>
    %3 = tpu.memref_slice %arg19[%c0_i32] : memref<2x!tpu.dma_semaphore, #tpu.memory_space<semaphore_mem>> -> memref<1x!tpu.dma_semaphore, #tpu.memory_space<semaphore_mem>>
    %4 = tpu.memref_squeeze %3 : memref<1x!tpu.dma_semaphore, #tpu.memory_space<semaphore_mem>> -> memref<!tpu.dma_semaphore, #tpu.memory_space<semaphore_mem>>
    tpu.enqueue_dma source(%2 : memref<50x128xf32, #tpu.memory_space<any>>) target(%arg17 : memref<50x128xf32, #tpu.memory_space<vmem>>) target_semaphore(%4 : memref<!tpu.dma_semaphore, #tpu.memory_space<semaphore_mem>>)
    %c1_i32 = arith.constant 1 : i32
    %c0_i32_1 = arith.constant 0 : i32
    %5 = tpu.memref_slice %arg3[%arg0, %0, %c0_i32_1] : memref<2x80x128xbf16, #tpu.memory_space<any>> -> memref<1x48x128xbf16, #tpu.memory_space<any>>
    %6 = tpu.memref_squeeze %5 : memref<1x48x128xbf16, #tpu.memory_space<any>> -> memref<48x128xbf16, #tpu.memory_space<any>>
    %7 = tpu.memref_slice %arg19[%c1_i32] : memref<2x!tpu.dma_semaphore, #tpu.memory_space<semaphore_mem>> -> memref<1x!tpu.dma_semaphore, #tpu.memory_space<semaphore_mem>>
    %8 = tpu.memref_squeeze %7 : memref<1x!tpu.dma_semaphore, #tpu.memory_space<semaphore_mem>> -> memref<!tpu.dma_semaphore, #tpu.memory_space<semaphore_mem>>
    tpu.enqueue_dma source(%6 : memref<48x128xbf16, #tpu.memory_space<any>>) target(%arg18 : memref<48x128xbf16, #tpu.memory_space<vmem>>) target_semaphore(%8 : memref<!tpu.dma_semaphore, #tpu.memory_space<semaphore_mem>>)
    %9 = tpu.iota {dimensions = array<i32: 0>} : vector<48x1xi32>
    %c8_i32 = arith.constant 8 : i32
    %10 = arith.subi %0, %c8_i32 : i32
    %11 = vector.broadcast %10 : i32 to vector<48x1xi32>
    %12 = arith.addi %11, %9 : vector<48x1xi32>
    %c0_i32_2 = arith.constant 0 : i32
    %13 = vector.broadcast %c0_i32_2 : i32 to vector<48x1xi32>
    %14 = arith.cmpi sge, %12, %13 : vector<48x1xi32>
    %c64_i32 = arith.constant 64 : i32
    %15 = vector.broadcast %c64_i32 : i32 to vector<48x1xi32>
    %16 = arith.cmpi slt, %12, %15 : vector<48x1xi32>
    %17 = arith.andi %14, %16 : vector<48x1xi1>
    %18 = arith.extui %17 : vector<48x1xi1> to vector<48x1xi32>
    %19 = arith.sitofp %18 : vector<48x1xi32> to vector<48x1xf32>
    %20 = vector.extract_strided_slice %19 {offsets = [8, 0], sizes = [32, 1], strides = [1, 1]} : vector<48x1xf32> to vector<32x1xf32>
    %cst = arith.constant 0.000000e+00 : f32
    %21 = vector.broadcast %cst : f32 to vector<8x128xf32>
    %c0 = arith.constant 0 : index
    %c0_3 = arith.constant 0 : index
    %22 = vector.load %arg20[%c0, %c0_3] : memref<64x128xf32, #tpu.memory_space<vmem>>, vector<8x128xf32>
    tpu.vector_store %arg20[%c0, %c0_3], %21 {strides = array<i32>} : memref<64x128xf32, #tpu.memory_space<vmem>>, vector<8x128xf32>,
    %cst_4 = arith.constant 0.000000e+00 : f32
    %23 = vector.broadcast %cst_4 : f32 to vector<8x128xf32>
    %c56 = arith.constant 56 : index
    %c0_5 = arith.constant 0 : index
    %24 = vector.load %arg20[%c56, %c0_5] : memref<64x128xf32, #tpu.memory_space<vmem>>, vector<8x128xf32>
    tpu.vector_store %arg20[%c56, %c0_5], %23 {strides = array<i32>} : memref<64x128xf32, #tpu.memory_space<vmem>>, vector<8x128xf32>,
    %cst_6 = arith.constant 0.000000e+00 : f32
    %25 = vector.broadcast %cst_6 : f32 to vector<32x128xf32>
    %c0_7 = arith.constant 0 : index
    %c0_8 = arith.constant 0 : index
    %26 = vector.load %arg22[%c0_7, %c0_8] : memref<32x128xf32, #tpu.memory_space<vmem>>, vector<32x128xf32>
    tpu.vector_store %arg22[%c0_7, %c0_8], %25 {strides = array<i32>} : memref<32x128xf32, #tpu.memory_space<vmem>>, vector<32x128xf32>,
    %c1_i32_9 = arith.constant 1 : i32
    %c0_i32_10 = arith.constant 0 : i32
    %27 = tpu.memref_slice %arg3[%arg0, %0, %c0_i32_10] : memref<2x80x128xbf16, #tpu.memory_space<any>> -> memref<1x48x128xbf16, #tpu.memory_space<any>>
    %28 = tpu.memref_squeeze %27 : memref<1x48x128xbf16, #tpu.memory_space<any>> -> memref<48x128xbf16, #tpu.memory_space<any>>
    %29 = tpu.memref_slice %arg19[%c1_i32_9] : memref<2x!tpu.dma_semaphore, #tpu.memory_space<semaphore_mem>> -> memref<1x!tpu.dma_semaphore, #tpu.memory_space<semaphore_mem>>
    %30 = tpu.memref_squeeze %29 : memref<1x!tpu.dma_semaphore, #tpu.memory_space<semaphore_mem>> -> memref<!tpu.dma_semaphore, #tpu.memory_space<semaphore_mem>>
    tpu.wait_dma2 semaphore(%30 : memref<!tpu.dma_semaphore, #tpu.memory_space<semaphore_mem>>) src(%28 : memref<48x128xbf16, #tpu.memory_space<any>>) dst(%arg18 : memref<48x128xbf16, #tpu.memory_space<vmem>>)
    %c0_11 = arith.constant 0 : index
    %c0_12 = arith.constant 0 : index
    %31 = vector.load %arg18[%c0_11, %c0_12] : memref<48x128xbf16, #tpu.memory_space<vmem>>, vector<48x128xbf16>
    %c0_13 = arith.constant 0 : index
    %c384 = arith.constant 384 : index
    %32 = vector.load %arg21[%c0_13, %c384] : memref<48x512xbf16, #tpu.memory_space<vmem>>, vector<48x128xbf16>
    tpu.vector_store %arg21[%c0_13, %c384], %31 {strides = array<i32>} : memref<48x512xbf16, #tpu.memory_space<vmem>>, vector<48x128xbf16>,
    %c0_i32_14 = arith.constant 0 : i32
    %c0_i32_15 = arith.constant 0 : i32
    %33 = tpu.memref_slice %arg2[%arg0, %0, %c0_i32_15] : memref<2x82x128xf32, #tpu.memory_space<any>> -> memref<1x50x128xf32, #tpu.memory_space<any>>
    %34 = tpu.memref_squeeze %33 : memref<1x50x128xf32, #tpu.memory_space<any>> -> memref<50x128xf32, #tpu.memory_space<any>>
    %35 = tpu.memref_slice %arg19[%c0_i32_14] : memref<2x!tpu.dma_semaphore, #tpu.memory_space<semaphore_mem>> -> memref<1x!tpu.dma_semaphore, #tpu.memory_space<semaphore_mem>>
    %36 = tpu.memref_squeeze %35 : memref<1x!tpu.dma_semaphore, #tpu.memory_space<semaphore_mem>> -> memref<!tpu.dma_semaphore, #tpu.memory_space<semaphore_mem>>
    tpu.wait_dma2 semaphore(%36 : memref<!tpu.dma_semaphore, #tpu.memory_space<semaphore_mem>>) src(%34 : memref<50x128xf32, #tpu.memory_space<any>>) dst(%arg17 : memref<50x128xf32, #tpu.memory_space<vmem>>)
    %c0_16 = arith.constant 0 : index
    %c0_17 = arith.constant 0 : index
    %37 = vector.load %arg17[%c0_16, %c0_17] : memref<50x128xf32, #tpu.memory_space<vmem>>, vector<48x128xf32>
    %38 = arith.truncf %37 : vector<48x128xf32> to vector<48x128xbf16>
    %c0_18 = arith.constant 0 : index
    %c0_19 = arith.constant 0 : index
    %39 = vector.load %arg21[%c0_18, %c0_19] : memref<48x512xbf16, #tpu.memory_space<vmem>>, vector<48x128xbf16>
    tpu.vector_store %arg21[%c0_18, %c0_19], %38 {strides = array<i32>} : memref<48x512xbf16, #tpu.memory_space<vmem>>, vector<48x128xbf16>,
    %c1 = arith.constant 1 : index
    %c0_20 = arith.constant 0 : index
    %40 = vector.load %arg17[%c1, %c0_20] : memref<50x128xf32, #tpu.memory_space<vmem>>, vector<48x128xf32>
    %41 = arith.truncf %40 : vector<48x128xf32> to vector<48x128xbf16>
    %c0_21 = arith.constant 0 : index
    %c128 = arith.constant 128 : index
    %42 = vector.load %arg21[%c0_21, %c128] : memref<48x512xbf16, #tpu.memory_space<vmem>>, vector<48x128xbf16>
    tpu.vector_store %arg21[%c0_21, %c128], %41 {strides = array<i32>} : memref<48x512xbf16, #tpu.memory_space<vmem>>, vector<48x128xbf16>,
    %c2 = arith.constant 2 : index
    %c0_22 = arith.constant 0 : index
    %43 = vector.load %arg17[%c2, %c0_22] : memref<50x128xf32, #tpu.memory_space<vmem>>, vector<48x128xf32>
    %44 = arith.truncf %43 : vector<48x128xf32> to vector<48x128xbf16>
    %c0_23 = arith.constant 0 : index
    %c256 = arith.constant 256 : index
    %45 = vector.load %arg21[%c0_23, %c256] : memref<48x512xbf16, #tpu.memory_space<vmem>>, vector<48x128xbf16>
    tpu.vector_store %arg21[%c0_23, %c256], %44 {strides = array<i32>} : memref<48x512xbf16, #tpu.memory_space<vmem>>, vector<48x128xbf16>,
    %c0_24 = arith.constant 0 : index
    %c0_25 = arith.constant 0 : index
    %46 = vector.load %arg21[%c0_24, %c0_25] : memref<48x512xbf16, #tpu.memory_space<vmem>>, vector<48x384xbf16>
    %c0_26 = arith.constant 0 : index
    %c0_27 = arith.constant 0 : index
    %47 = vector.load %arg5[%c0_26, %c0_27] : memref<384x128xbf16, #tpu.memory_space<vmem>>, vector<384x128xbf16>
    %cst_28 = arith.constant dense<0.000000e+00> : vector<48x128xf32>
    %48 = tpu.matmul %46, %47, %cst_28 {dimension_numbers = #tpu.dot_dimension_numbers<[1], [0], [0], [1], [0, 0, 1, 1], [], []>} : vector<48x384xbf16>, vector<384x128xbf16>, vector<48x128xf32> -> vector<48x128xf32>
    %c0_29 = arith.constant 0 : index
    %c0_30 = arith.constant 0 : index
    %49 = vector.load %arg6[%c0_29, %c0_30] : memref<1x128xf32, #tpu.memory_space<vmem>>, vector<1x128xf32>
    %50 = vector.broadcast %49 : vector<1x128xf32> to vector<48x128xf32>
    %51 = arith.addf %48, %50 : vector<48x128xf32>
    %52 = vector.broadcast %19 : vector<48x1xf32> to vector<48x128xf32>
    %53 = arith.mulf %51, %52 : vector<48x128xf32>
    %c8 = arith.constant 8 : index
    %c0_31 = arith.constant 0 : index
    %54 = vector.load %arg20[%c8, %c0_31] : memref<64x128xf32, #tpu.memory_space<vmem>>, vector<48x128xf32>
    tpu.vector_store %arg20[%c8, %c0_31], %53 {strides = array<i32>} : memref<64x128xf32, #tpu.memory_space<vmem>>, vector<48x128xf32>,
    %c7 = arith.constant 7 : index
    %c0_32 = arith.constant 0 : index
    %55 = vector.load %arg20[%c7, %c0_32] : memref<64x128xf32, #tpu.memory_space<vmem>>, vector<48x128xf32>
    %56 = arith.truncf %55 : vector<48x128xf32> to vector<48x128xbf16>
    %c0_33 = arith.constant 0 : index
    %c0_34 = arith.constant 0 : index
    %57 = vector.load %arg21[%c0_33, %c0_34] : memref<48x512xbf16, #tpu.memory_space<vmem>>, vector<48x128xbf16>
    tpu.vector_store %arg21[%c0_33, %c0_34], %56 {strides = array<i32>} : memref<48x512xbf16, #tpu.memory_space<vmem>>, vector<48x128xbf16>,
    %58 = arith.truncf %53 : vector<48x128xf32> to vector<48x128xbf16>
    %c0_35 = arith.constant 0 : index
    %c128_36 = arith.constant 128 : index
    %59 = vector.load %arg21[%c0_35, %c128_36] : memref<48x512xbf16, #tpu.memory_space<vmem>>, vector<48x128xbf16>
    tpu.vector_store %arg21[%c0_35, %c128_36], %58 {strides = array<i32>} : memref<48x512xbf16, #tpu.memory_space<vmem>>, vector<48x128xbf16>,
    %c9 = arith.constant 9 : index
    %c0_37 = arith.constant 0 : index
    %60 = vector.load %arg20[%c9, %c0_37] : memref<64x128xf32, #tpu.memory_space<vmem>>, vector<48x128xf32>
    %61 = arith.truncf %60 : vector<48x128xf32> to vector<48x128xbf16>
    %c0_38 = arith.constant 0 : index
    %c256_39 = arith.constant 256 : index
    %62 = vector.load %arg21[%c0_38, %c256_39] : memref<48x512xbf16, #tpu.memory_space<vmem>>, vector<48x128xbf16>
    tpu.vector_store %arg21[%c0_38, %c256_39], %61 {strides = array<i32>} : memref<48x512xbf16, #tpu.memory_space<vmem>>, vector<48x128xbf16>,
    %c0_40 = arith.constant 0 : index
    %c0_41 = arith.constant 0 : index
    %63 = vector.load %arg21[%c0_40, %c0_41] : memref<48x512xbf16, #tpu.memory_space<vmem>>, vector<48x512xbf16>
    %c0_42 = arith.constant 0 : index
    %c0_43 = arith.constant 0 : index
    %c0_44 = arith.constant 0 : index
    %64 = vector.load %arg7[%c0_42, %c0_43, %c0_44] : memref<3x512x256xbf16, #tpu.memory_space<vmem>>, vector<1x512x256xbf16>
    %65 = vector.shape_cast %64 : vector<1x512x256xbf16> to vector<512x256xbf16>
    %cst_45 = arith.constant dense<0.000000e+00> : vector<48x256xf32>
    %66 = tpu.matmul %63, %65, %cst_45 {dimension_numbers = #tpu.dot_dimension_numbers<[1], [0], [0], [1], [0, 0, 1, 1], [], []>} : vector<48x512xbf16>, vector<512x256xbf16>, vector<48x256xf32> -> vector<48x256xf32>
    %c0_46 = arith.constant 0 : index
    %c0_47 = arith.constant 0 : index
    %c0_48 = arith.constant 0 : index
    %67 = vector.load %arg8[%c0_46, %c0_47, %c0_48] : memref<3x1x256xf32, #tpu.memory_space<vmem>>, vector<1x1x256xf32>
    %68 = vector.shape_cast %67 : vector<1x1x256xf32> to vector<1x256xf32>
    %69 = vector.broadcast %68 : vector<1x256xf32> to vector<48x256xf32>
    %70 = arith.addf %66, %69 : vector<48x256xf32>
    %71 = vector.extract_strided_slice %70 {offsets = [0, 0], sizes = [48, 128], strides = [1, 1]} : vector<48x256xf32> to vector<48x128xf32>
    %72 = math.tanh %71 : vector<48x128xf32>
    %73 = vector.extract_strided_slice %70 {offsets = [0, 128], sizes = [48, 128], strides = [1, 1]} : vector<48x256xf32> to vector<48x128xf32>
    %74 = arith.negf %73 : vector<48x128xf32>
    %75 = math.exp %74 : vector<48x128xf32>
    %cst_49 = arith.constant 1.000000e+00 : f32
    %76 = vector.broadcast %cst_49 : f32 to vector<48x128xf32>
    %77 = arith.addf %76, %75 : vector<48x128xf32>
    %78 = arith.divf %76, %77 : vector<48x128xf32>
    %79 = arith.mulf %72, %78 : vector<48x128xf32>
    %80 = arith.truncf %79 : vector<48x128xf32> to vector<48x128xbf16>
    %c0_50 = arith.constant 0 : index
    %c0_51 = arith.constant 0 : index
    %c0_52 = arith.constant 0 : index
    %81 = vector.load %arg9[%c0_50, %c0_51, %c0_52] : memref<3x128x256xbf16, #tpu.memory_space<vmem>>, vector<1x128x256xbf16>
    %82 = vector.shape_cast %81 : vector<1x128x256xbf16> to vector<128x256xbf16>
    %cst_53 = arith.constant dense<0.000000e+00> : vector<48x256xf32>
    %83 = tpu.matmul %80, %82, %cst_53 {dimension_numbers = #tpu.dot_dimension_numbers<[1], [0], [0], [1], [0, 0, 1, 1], [], []>} : vector<48x128xbf16>, vector<128x256xbf16>, vector<48x256xf32> -> vector<48x256xf32>
    %c0_54 = arith.constant 0 : index
    %c0_55 = arith.constant 0 : index
    %c0_56 = arith.constant 0 : index
    %84 = vector.load %arg10[%c0_54, %c0_55, %c0_56] : memref<3x1x256xf32, #tpu.memory_space<vmem>>, vector<1x1x256xf32>
    %85 = vector.shape_cast %84 : vector<1x1x256xf32> to vector<1x256xf32>
    %86 = vector.broadcast %85 : vector<1x256xf32> to vector<48x256xf32>
    %87 = arith.addf %83, %86 : vector<48x256xf32>
    %88 = vector.extract_strided_slice %87 {offsets = [0, 0], sizes = [48, 128], strides = [1, 1]} : vector<48x256xf32> to vector<48x128xf32>
    %89 = arith.addf %53, %88 : vector<48x128xf32>
    %cst_57 = arith.constant 0.707106769 : f32
    %90 = vector.broadcast %cst_57 : f32 to vector<48x128xf32>
    %91 = arith.mulf %89, %90 : vector<48x128xf32>
    %92 = vector.broadcast %19 : vector<48x1xf32> to vector<48x128xf32>
    %93 = arith.mulf %91, %92 : vector<48x128xf32>
    %c0_58 = arith.constant 0 : index
    %c0_59 = arith.constant 0 : index
    %94 = vector.load %arg22[%c0_58, %c0_59] : memref<32x128xf32, #tpu.memory_space<vmem>>, vector<32x128xf32>
    %95 = vector.extract_strided_slice %87 {offsets = [8, 128], sizes = [32, 128], strides = [1, 1]} : vector<48x256xf32> to vector<32x128xf32>
    %96 = arith.addf %94, %95 : vector<32x128xf32>
    %c0_60 = arith.constant 0 : index
    %c0_61 = arith.constant 0 : index
    %97 = vector.load %arg22[%c0_60, %c0_61] : memref<32x128xf32, #tpu.memory_space<vmem>>, vector<32x128xf32>
    tpu.vector_store %arg22[%c0_60, %c0_61], %96 {strides = array<i32>} : memref<32x128xf32, #tpu.memory_space<vmem>>, vector<32x128xf32>,
    %c8_62 = arith.constant 8 : index
    %c0_63 = arith.constant 0 : index
    %98 = vector.load %arg20[%c8_62, %c0_63] : memref<64x128xf32, #tpu.memory_space<vmem>>, vector<48x128xf32>
    tpu.vector_store %arg20[%c8_62, %c0_63], %93 {strides = array<i32>} : memref<64x128xf32, #tpu.memory_space<vmem>>, vector<48x128xf32>,
    %c6 = arith.constant 6 : index
    %c0_64 = arith.constant 0 : index
    %99 = vector.load %arg20[%c6, %c0_64] : memref<64x128xf32, #tpu.memory_space<vmem>>, vector<48x128xf32>
    %100 = arith.truncf %99 : vector<48x128xf32> to vector<48x128xbf16>
    %c0_65 = arith.constant 0 : index
    %c0_66 = arith.constant 0 : index
    %101 = vector.load %arg21[%c0_65, %c0_66] : memref<48x512xbf16, #tpu.memory_space<vmem>>, vector<48x128xbf16>
    tpu.vector_store %arg21[%c0_65, %c0_66], %100 {strides = array<i32>} : memref<48x512xbf16, #tpu.memory_space<vmem>>, vector<48x128xbf16>,
    %102 = arith.truncf %93 : vector<48x128xf32> to vector<48x128xbf16>
    %c0_67 = arith.constant 0 : index
    %c128_68 = arith.constant 128 : index
    %103 = vector.load %arg21[%c0_67, %c128_68] : memref<48x512xbf16, #tpu.memory_space<vmem>>, vector<48x128xbf16>
    tpu.vector_store %arg21[%c0_67, %c128_68], %102 {strides = array<i32>} : memref<48x512xbf16, #tpu.memory_space<vmem>>, vector<48x128xbf16>,
    %c10 = arith.constant 10 : index
    %c0_69 = arith.constant 0 : index
    %104 = vector.load %arg20[%c10, %c0_69] : memref<64x128xf32, #tpu.memory_space<vmem>>, vector<48x128xf32>
    %105 = arith.truncf %104 : vector<48x128xf32> to vector<48x128xbf16>
    %c0_70 = arith.constant 0 : index
    %c256_71 = arith.constant 256 : index
    %106 = vector.load %arg21[%c0_70, %c256_71] : memref<48x512xbf16, #tpu.memory_space<vmem>>, vector<48x128xbf16>
    tpu.vector_store %arg21[%c0_70, %c256_71], %105 {strides = array<i32>} : memref<48x512xbf16, #tpu.memory_space<vmem>>, vector<48x128xbf16>,
    %c0_72 = arith.constant 0 : index
    %c0_73 = arith.constant 0 : index
    %107 = vector.load %arg21[%c0_72, %c0_73] : memref<48x512xbf16, #tpu.memory_space<vmem>>, vector<48x512xbf16>
    %c1_74 = arith.constant 1 : index
    %c0_75 = arith.constant 0 : index
    %c0_76 = arith.constant 0 : index
    %108 = vector.load %arg7[%c1_74, %c0_75, %c0_76] : memref<3x512x256xbf16, #tpu.memory_space<vmem>>, vector<1x512x256xbf16>
    %109 = vector.shape_cast %108 : vector<1x512x256xbf16> to vector<512x256xbf16>
    %cst_77 = arith.constant dense<0.000000e+00> : vector<48x256xf32>
    %110 = tpu.matmul %107, %109, %cst_77 {dimension_numbers = #tpu.dot_dimension_numbers<[1], [0], [0], [1], [0, 0, 1, 1], [], []>} : vector<48x512xbf16>, vector<512x256xbf16>, vector<48x256xf32> -> vector<48x256xf32>
    %c1_78 = arith.constant 1 : index
    %c0_79 = arith.constant 0 : index
    %c0_80 = arith.constant 0 : index
    %111 = vector.load %arg8[%c1_78, %c0_79, %c0_80] : memref<3x1x256xf32, #tpu.memory_space<vmem>>, vector<1x1x256xf32>
    %112 = vector.shape_cast %111 : vector<1x1x256xf32> to vector<1x256xf32>
    %113 = vector.broadcast %112 : vector<1x256xf32> to vector<48x256xf32>
    %114 = arith.addf %110, %113 : vector<48x256xf32>
    %115 = vector.extract_strided_slice %114 {offsets = [0, 0], sizes = [48, 128], strides = [1, 1]} : vector<48x256xf32> to vector<48x128xf32>
    %116 = math.tanh %115 : vector<48x128xf32>
    %117 = vector.extract_strided_slice %114 {offsets = [0, 128], sizes = [48, 128], strides = [1, 1]} : vector<48x256xf32> to vector<48x128xf32>
    %118 = arith.negf %117 : vector<48x128xf32>
    %119 = math.exp %118 : vector<48x128xf32>
    %cst_81 = arith.constant 1.000000e+00 : f32
    %120 = vector.broadcast %cst_81 : f32 to vector<48x128xf32>
    %121 = arith.addf %120, %119 : vector<48x128xf32>
    %122 = arith.divf %120, %121 : vector<48x128xf32>
    %123 = arith.mulf %116, %122 : vector<48x128xf32>
    %124 = arith.truncf %123 : vector<48x128xf32> to vector<48x128xbf16>
    %c1_82 = arith.constant 1 : index
    %c0_83 = arith.constant 0 : index
    %c0_84 = arith.constant 0 : index
    %125 = vector.load %arg9[%c1_82, %c0_83, %c0_84] : memref<3x128x256xbf16, #tpu.memory_space<vmem>>, vector<1x128x256xbf16>
    %126 = vector.shape_cast %125 : vector<1x128x256xbf16> to vector<128x256xbf16>
    %cst_85 = arith.constant dense<0.000000e+00> : vector<48x256xf32>
    %127 = tpu.matmul %124, %126, %cst_85 {dimension_numbers = #tpu.dot_dimension_numbers<[1], [0], [0], [1], [0, 0, 1, 1], [], []>} : vector<48x128xbf16>, vector<128x256xbf16>, vector<48x256xf32> -> vector<48x256xf32>
    %c1_86 = arith.constant 1 : index
    %c0_87 = arith.constant 0 : index
    %c0_88 = arith.constant 0 : index
    %128 = vector.load %arg10[%c1_86, %c0_87, %c0_88] : memref<3x1x256xf32, #tpu.memory_space<vmem>>, vector<1x1x256xf32>
    %129 = vector.shape_cast %128 : vector<1x1x256xf32> to vector<1x256xf32>
    %130 = vector.broadcast %129 : vector<1x256xf32> to vector<48x256xf32>
    %131 = arith.addf %127, %130 : vector<48x256xf32>
    %132 = vector.extract_strided_slice %131 {offsets = [0, 0], sizes = [48, 128], strides = [1, 1]} : vector<48x256xf32> to vector<48x128xf32>
    %133 = arith.addf %93, %132 : vector<48x128xf32>
    %cst_89 = arith.constant 0.707106769 : f32
    %134 = vector.broadcast %cst_89 : f32 to vector<48x128xf32>
    %135 = arith.mulf %133, %134 : vector<48x128xf32>
    %136 = vector.broadcast %19 : vector<48x1xf32> to vector<48x128xf32>
    %137 = arith.mulf %135, %136 : vector<48x128xf32>
    %c0_90 = arith.constant 0 : index
    %c0_91 = arith.constant 0 : index
    %138 = vector.load %arg22[%c0_90, %c0_91] : memref<32x128xf32, #tpu.memory_space<vmem>>, vector<32x128xf32>
    %139 = vector.extract_strided_slice %131 {offsets = [8, 128], sizes = [32, 128], strides = [1, 1]} : vector<48x256xf32> to vector<32x128xf32>
    %140 = arith.addf %138, %139 : vector<32x128xf32>
    %c0_92 = arith.constant 0 : index
    %c0_93 = arith.constant 0 : index
    %141 = vector.load %arg22[%c0_92, %c0_93] : memref<32x128xf32, #tpu.memory_space<vmem>>, vector<32x128xf32>
    tpu.vector_store %arg22[%c0_92, %c0_93], %140 {strides = array<i32>} : memref<32x128xf32, #tpu.memory_space<vmem>>, vector<32x128xf32>,
    %c8_94 = arith.constant 8 : index
    %c0_95 = arith.constant 0 : index
    %142 = vector.load %arg20[%c8_94, %c0_95] : memref<64x128xf32, #tpu.memory_space<vmem>>, vector<48x128xf32>
    tpu.vector_store %arg20[%c8_94, %c0_95], %137 {strides = array<i32>} : memref<64x128xf32, #tpu.memory_space<vmem>>, vector<48x128xf32>,
    %c4 = arith.constant 4 : index
    %c0_96 = arith.constant 0 : index
    %143 = vector.load %arg20[%c4, %c0_96] : memref<64x128xf32, #tpu.memory_space<vmem>>, vector<48x128xf32>
    %144 = arith.truncf %143 : vector<48x128xf32> to vector<48x128xbf16>
    %c0_97 = arith.constant 0 : index
    %c0_98 = arith.constant 0 : index
    %145 = vector.load %arg21[%c0_97, %c0_98] : memref<48x512xbf16, #tpu.memory_space<vmem>>, vector<48x128xbf16>
    tpu.vector_store %arg21[%c0_97, %c0_98], %144 {strides = array<i32>} : memref<48x512xbf16, #tpu.memory_space<vmem>>, vector<48x128xbf16>,
    %146 = arith.truncf %137 : vector<48x128xf32> to vector<48x128xbf16>
    %c0_99 = arith.constant 0 : index
    %c128_100 = arith.constant 128 : index
    %147 = vector.load %arg21[%c0_99, %c128_100] : memref<48x512xbf16, #tpu.memory_space<vmem>>, vector<48x128xbf16>
    tpu.vector_store %arg21[%c0_99, %c128_100], %146 {strides = array<i32>} : memref<48x512xbf16, #tpu.memory_space<vmem>>, vector<48x128xbf16>,
    %c12 = arith.constant 12 : index
    %c0_101 = arith.constant 0 : index
    %148 = vector.load %arg20[%c12, %c0_101] : memref<64x128xf32, #tpu.memory_space<vmem>>, vector<48x128xf32>
    %149 = arith.truncf %148 : vector<48x128xf32> to vector<48x128xbf16>
    %c0_102 = arith.constant 0 : index
    %c256_103 = arith.constant 256 : index
    %150 = vector.load %arg21[%c0_102, %c256_103] : memref<48x512xbf16, #tpu.memory_space<vmem>>, vector<48x128xbf16>
    tpu.vector_store %arg21[%c0_102, %c256_103], %149 {strides = array<i32>} : memref<48x512xbf16, #tpu.memory_space<vmem>>, vector<48x128xbf16>,
    %c0_104 = arith.constant 0 : index
    %c0_105 = arith.constant 0 : index
    %151 = vector.load %arg21[%c0_104, %c0_105] : memref<48x512xbf16, #tpu.memory_space<vmem>>, vector<48x512xbf16>
    %c2_106 = arith.constant 2 : index
    %c0_107 = arith.constant 0 : index
    %c0_108 = arith.constant 0 : index
    %152 = vector.load %arg7[%c2_106, %c0_107, %c0_108] : memref<3x512x256xbf16, #tpu.memory_space<vmem>>, vector<1x512x256xbf16>
    %153 = vector.shape_cast %152 : vector<1x512x256xbf16> to vector<512x256xbf16>
    %cst_109 = arith.constant dense<0.000000e+00> : vector<48x256xf32>
    %154 = tpu.matmul %151, %153, %cst_109 {dimension_numbers = #tpu.dot_dimension_numbers<[1], [0], [0], [1], [0, 0, 1, 1], [], []>} : vector<48x512xbf16>, vector<512x256xbf16>, vector<48x256xf32> -> vector<48x256xf32>
    %c2_110 = arith.constant 2 : index
    %c0_111 = arith.constant 0 : index
    %c0_112 = arith.constant 0 : index
    %155 = vector.load %arg8[%c2_110, %c0_111, %c0_112] : memref<3x1x256xf32, #tpu.memory_space<vmem>>, vector<1x1x256xf32>
    %156 = vector.shape_cast %155 : vector<1x1x256xf32> to vector<1x256xf32>
    %157 = vector.broadcast %156 : vector<1x256xf32> to vector<48x256xf32>
    %158 = arith.addf %154, %157 : vector<48x256xf32>
    %159 = vector.extract_strided_slice %158 {offsets = [0, 0], sizes = [48, 128], strides = [1, 1]} : vector<48x256xf32> to vector<48x128xf32>
    %160 = math.tanh %159 : vector<48x128xf32>
    %161 = vector.extract_strided_slice %158 {offsets = [0, 128], sizes = [48, 128], strides = [1, 1]} : vector<48x256xf32> to vector<48x128xf32>
    %162 = arith.negf %161 : vector<48x128xf32>
    %163 = math.exp %162 : vector<48x128xf32>
    %cst_113 = arith.constant 1.000000e+00 : f32
    %164 = vector.broadcast %cst_113 : f32 to vector<48x128xf32>
    %165 = arith.addf %164, %163 : vector<48x128xf32>
    %166 = arith.divf %164, %165 : vector<48x128xf32>
    %167 = arith.mulf %160, %166 : vector<48x128xf32>
    %168 = arith.truncf %167 : vector<48x128xf32> to vector<48x128xbf16>
    %c2_114 = arith.constant 2 : index
    %c0_115 = arith.constant 0 : index
    %c0_116 = arith.constant 0 : index
    %169 = vector.load %arg9[%c2_114, %c0_115, %c0_116] : memref<3x128x256xbf16, #tpu.memory_space<vmem>>, vector<1x128x256xbf16>
    %170 = vector.shape_cast %169 : vector<1x128x256xbf16> to vector<128x256xbf16>
    %cst_117 = arith.constant dense<0.000000e+00> : vector<48x256xf32>
    %171 = tpu.matmul %168, %170, %cst_117 {dimension_numbers = #tpu.dot_dimension_numbers<[1], [0], [0], [1], [0, 0, 1, 1], [], []>} : vector<48x128xbf16>, vector<128x256xbf16>, vector<48x256xf32> -> vector<48x256xf32>
    %c2_118 = arith.constant 2 : index
    %c0_119 = arith.constant 0 : index
    %c0_120 = arith.constant 0 : index
    %172 = vector.load %arg10[%c2_118, %c0_119, %c0_120] : memref<3x1x256xf32, #tpu.memory_space<vmem>>, vector<1x1x256xf32>
    %173 = vector.shape_cast %172 : vector<1x1x256xf32> to vector<1x256xf32>
    %174 = vector.broadcast %173 : vector<1x256xf32> to vector<48x256xf32>
    %175 = arith.addf %171, %174 : vector<48x256xf32>
    %c0_121 = arith.constant 0 : index
    %c0_122 = arith.constant 0 : index
    %176 = vector.load %arg22[%c0_121, %c0_122] : memref<32x128xf32, #tpu.memory_space<vmem>>, vector<32x128xf32>
    %177 = vector.extract_strided_slice %175 {offsets = [8, 128], sizes = [32, 128], strides = [1, 1]} : vector<48x256xf32> to vector<32x128xf32>
    %178 = arith.addf %176, %177 : vector<32x128xf32>
    %c0_123 = arith.constant 0 : index
    %c0_124 = arith.constant 0 : index
    %179 = vector.load %arg22[%c0_123, %c0_124] : memref<32x128xf32, #tpu.memory_space<vmem>>, vector<32x128xf32>
    tpu.vector_store %arg22[%c0_123, %c0_124], %178 {strides = array<i32>} : memref<32x128xf32, #tpu.memory_space<vmem>>, vector<32x128xf32>,
    %c0_125 = arith.constant 0 : index
    %c0_126 = arith.constant 0 : index
    %180 = vector.load %arg22[%c0_125, %c0_126] : memref<32x128xf32, #tpu.memory_space<vmem>>, vector<32x128xf32>
    %cst_127 = arith.constant 0.000000e+00 : f32
    %181 = vector.broadcast %cst_127 : f32 to vector<32x128xf32>
    %182 = arith.maximumf %180, %181 : vector<32x128xf32>
    %183 = arith.truncf %182 : vector<32x128xf32> to vector<32x128xbf16>
    %c0_128 = arith.constant 0 : index
    %c0_129 = arith.constant 0 : index
    %184 = vector.load %arg11[%c0_128, %c0_129] : memref<128x128xbf16, #tpu.memory_space<vmem>>, vector<128x128xbf16>
    %cst_130 = arith.constant dense<0.000000e+00> : vector<32x128xf32>
    %185 = tpu.matmul %183, %184, %cst_130 {dimension_numbers = #tpu.dot_dimension_numbers<[1], [0], [0], [1], [0, 0, 1, 1], [], []>} : vector<32x128xbf16>, vector<128x128xbf16>, vector<32x128xf32> -> vector<32x128xf32>
    %c0_131 = arith.constant 0 : index
    %c0_132 = arith.constant 0 : index
    %186 = vector.load %arg12[%c0_131, %c0_132] : memref<1x128xf32, #tpu.memory_space<vmem>>, vector<1x128xf32>
    %187 = vector.broadcast %186 : vector<1x128xf32> to vector<32x128xf32>
    %188 = arith.addf %185, %187 : vector<32x128xf32>
    %cst_133 = arith.constant 0.000000e+00 : f32
    %189 = vector.broadcast %cst_133 : f32 to vector<32x128xf32>
    %190 = arith.maximumf %188, %189 : vector<32x128xf32>
    %191 = arith.truncf %190 : vector<32x128xf32> to vector<32x128xbf16>
    %c0_134 = arith.constant 0 : index
    %c0_135 = arith.constant 0 : index
    %192 = vector.load %arg13[%c0_134, %c0_135] : memref<128x256xbf16, #tpu.memory_space<vmem>>, vector<128x256xbf16>
    %cst_136 = arith.constant dense<0.000000e+00> : vector<32x256xf32>
    %193 = tpu.matmul %191, %192, %cst_136 {dimension_numbers = #tpu.dot_dimension_numbers<[1], [0], [0], [1], [0, 0, 1, 1], [], []>} : vector<32x128xbf16>, vector<128x256xbf16>, vector<32x256xf32> -> vector<32x256xf32>
    %c0_137 = arith.constant 0 : index
    %c0_138 = arith.constant 0 : index
    %194 = vector.load %arg14[%c0_137, %c0_138] : memref<1x256xf32, #tpu.memory_space<vmem>>, vector<1x256xf32>
    %195 = vector.broadcast %194 : vector<1x256xf32> to vector<32x256xf32>
    %196 = arith.addf %193, %195 : vector<32x256xf32>
    %197 = vector.extract_strided_slice %196 {offsets = [0, 0], sizes = [32, 128], strides = [1, 1]} : vector<32x256xf32> to vector<32x128xf32>
    %198 = vector.extract_strided_slice %196 {offsets = [0, 128], sizes = [32, 128], strides = [1, 1]} : vector<32x256xf32> to vector<32x128xf32>
    %c0_139 = arith.constant 0 : index
    %c0_140 = arith.constant 0 : index
    %c0_141 = arith.constant 0 : index
    %199 = vector.load %arg4[%c0_139, %c0_140, %c0_141] : memref<1x32x128xf32, #tpu.memory_space<vmem>>, vector<1x32x128xf32>
    %200 = vector.shape_cast %199 : vector<1x32x128xf32> to vector<32x128xf32>
    %201 = arith.subf %200, %198 : vector<32x128xf32>
    %cst_142 = arith.constant 0.000000e+00 : f32
    %202 = vector.broadcast %cst_142 : f32 to vector<32x128xf32>
    %203 = arith.subf %202, %197 : vector<32x128xf32>
    %204 = math.exp %203 : vector<32x128xf32>
    %205 = arith.mulf %201, %204 : vector<32x128xf32>
    %c0_143 = arith.constant 0 : index
    %c0_144 = arith.constant 0 : index
    %c0_145 = arith.constant 0 : index
    %206 = vector.load %arg15[%c0_143, %c0_144, %c0_145] : memref<1x32x128xf32, #tpu.memory_space<vmem>>, vector<1x32x128xf32>
    %207 = vector.shape_cast %206 : vector<1x32x128xf32> to vector<32x128xf32>
    %208 = vector.shape_cast %205 : vector<32x128xf32> to vector<1x32x128xf32>
    tpu.vector_store %arg15[%c0_143, %c0_144, %c0_145], %208 {strides = array<i32>} : memref<1x32x128xf32, #tpu.memory_space<vmem>>, vector<1x32x128xf32>,
    %209 = vector.broadcast %20 : vector<32x1xf32> to vector<32x128xf32>
    %210 = arith.mulf %197, %209 : vector<32x128xf32>
    %211 = vector.shape_cast %210 : vector<32x128xf32> to vector<1x32x128xf32>
    %cst_146 = arith.constant dense<0.000000e+00> : vector<1xf32>
    %212 = vector.multi_reduction <add>, %211, %cst_146 [1, 2] : vector<1x32x128xf32> to vector<1xf32>
    %213 = vector.shape_cast %212 : vector<1xf32> to vector<1x1x1xf32>
    %214 = vector.extract %213[0, 0, 0] : f32 from vector<1x1x1xf32>
    %cst_147 = arith.constant 0.000000e+00 : f32
    %215 = arith.subf %cst_147, %214 : f32
    %216 = vector.broadcast %215 : f32 to vector<1x1x1x1xf32>
    %c0_148 = arith.constant 0 : index
    %c0_149 = arith.constant 0 : index
    %c0_150 = arith.constant 0 : index
    %c0_151 = arith.constant 0 : index
    %217 = vector.load %arg16[%c0_148, %c0_149, %c0_150, %c0_151] : memref<1x1x1x1xf32, #tpu.memory_space<vmem>>, vector<1x1x1x1xf32>
    tpu.vector_store %arg16[%c0_148, %c0_149, %c0_150, %c0_151], %216 {strides = array<i32>} : memref<1x1x1x1xf32, #tpu.memory_space<vmem>>, vector<1x1x1x1xf32>,
    return
  }
  func.func @transform_2(%arg0: i32, %arg1: i32) -> (i32, i32, i32) {
    %c0_i32 = arith.constant 0 : i32
    %c0_i32_0 = arith.constant 0 : i32
    return %arg0, %arg1, %c0_i32 : i32, i32, i32
  }
  func.func @transform_3(%arg0: i32, %arg1: i32) -> (i32, i32) {
    %c0_i32 = arith.constant 0 : i32
    %c0_i32_0 = arith.constant 0 : i32
    %c0_i32_1 = arith.constant 0 : i32
    return %c0_i32, %c0_i32_0 : i32, i32
  }
  func.func @transform_4(%arg0: i32, %arg1: i32) -> (i32, i32) {
    %c0_i32 = arith.constant 0 : i32
    %c0_i32_0 = arith.constant 0 : i32
    %c0_i32_1 = arith.constant 0 : i32
    return %c0_i32, %c0_i32_0 : i32, i32
  }
  func.func @transform_5(%arg0: i32, %arg1: i32) -> (i32, i32, i32) {
    %c0_i32 = arith.constant 0 : i32
    %c0_i32_0 = arith.constant 0 : i32
    %c0_i32_1 = arith.constant 0 : i32
    %c0_i32_2 = arith.constant 0 : i32
    return %c0_i32, %c0_i32_0, %c0_i32_1 : i32, i32, i32
  }
  func.func @transform_6(%arg0: i32, %arg1: i32) -> (i32, i32, i32) {
    %c0_i32 = arith.constant 0 : i32
    %c0_i32_0 = arith.constant 0 : i32
    %c0_i32_1 = arith.constant 0 : i32
    %c0_i32_2 = arith.constant 0 : i32
    return %c0_i32, %c0_i32_0, %c0_i32_1 : i32, i32, i32
  }
  func.func @transform_7(%arg0: i32, %arg1: i32) -> (i32, i32, i32) {
    %c0_i32 = arith.constant 0 : i32
    %c0_i32_0 = arith.constant 0 : i32
    %c0_i32_1 = arith.constant 0 : i32
    %c0_i32_2 = arith.constant 0 : i32
    return %c0_i32, %c0_i32_0, %c0_i32_1 : i32, i32, i32
  }
  func.func @transform_8(%arg0: i32, %arg1: i32) -> (i32, i32, i32) {
    %c0_i32 = arith.constant 0 : i32
    %c0_i32_0 = arith.constant 0 : i32
    %c0_i32_1 = arith.constant 0 : i32
    %c0_i32_2 = arith.constant 0 : i32
    return %c0_i32, %c0_i32_0, %c0_i32_1 : i32, i32, i32
  }
  func.func @transform_9(%arg0: i32, %arg1: i32) -> (i32, i32) {
    %c0_i32 = arith.constant 0 : i32
    %c0_i32_0 = arith.constant 0 : i32
    %c0_i32_1 = arith.constant 0 : i32
    return %c0_i32, %c0_i32_0 : i32, i32
  }
  func.func @transform_10(%arg0: i32, %arg1: i32) -> (i32, i32) {
    %c0_i32 = arith.constant 0 : i32
    %c0_i32_0 = arith.constant 0 : i32
    %c0_i32_1 = arith.constant 0 : i32
    return %c0_i32, %c0_i32_0 : i32, i32
  }
  func.func @transform_11(%arg0: i32, %arg1: i32) -> (i32, i32) {
    %c0_i32 = arith.constant 0 : i32
    %c0_i32_0 = arith.constant 0 : i32
    %c0_i32_1 = arith.constant 0 : i32
    return %c0_i32, %c0_i32_0 : i32, i32
  }
  func.func @transform_12(%arg0: i32, %arg1: i32) -> (i32, i32) {
    %c0_i32 = arith.constant 0 : i32
    %c0_i32_0 = arith.constant 0 : i32
    %c0_i32_1 = arith.constant 0 : i32
    return %c0_i32, %c0_i32_0 : i32, i32
  }
  func.func @transform_13(%arg0: i32, %arg1: i32) -> (i32, i32, i32) {
    %c0_i32 = arith.constant 0 : i32
    %c0_i32_0 = arith.constant 0 : i32
    return %arg0, %arg1, %c0_i32 : i32, i32, i32
  }
  func.func @transform_14(%arg0: i32, %arg1: i32) -> (i32, i32, i32, i32) {
    %c0_i32 = arith.constant 0 : i32
    %c0_i32_0 = arith.constant 0 : i32
    %c0_i32_1 = arith.constant 0 : i32
    return %arg0, %arg1, %c0_i32, %c0_i32_0 : i32, i32, i32, i32
  }
}

</mosaic_0001>

<bundles_post_ra>
// kernel: affine_coupling_forward.1
= control target key start
LH: loop header
LB: loop body
LE: loop exit
PB: predicated region body
PF: predicated region fallthrough
CT: control target
= control target key end

     0   :  { %s7492_s0 = inlined_call_operand.vmem [shape: f32[2,82,128], index: 0, kind: input, shape index: {}]   ;;  %s7493_s1 = inlined_call_operand.vmem [shape: bf16[2,80,128], index: 1, kind: input, shape index: {}]   ;;  %s7494_s2 = inlined_call_operand.vmem [shape: f32[2,64,128], index: 2, kind: input, shape index: {}]   ;;  %s7495_s3 = inlined_call_operand.hbm [shape: bf16[384,128], index: 3, kind: input, shape index: {}]   ;;  %s7496_s4 = inlined_call_operand.vmem [shape: f32[1,128], index: 4, kind: input, shape index: {}]   ;;  %s7497_s5 = inlined_call_operand.vmem [shape: bf16[3,512,256], index: 5, kind: input, shape index: {}]   ;;  %s7498_s6 = inlined_call_operand.hbm [shape: f32[3,1,256], index: 6, kind: input, shape index: {}]   ;;  %s7499_s7 = inlined_call_operand.hbm [shape: bf16[3,128,256], index: 7, kind: input, shape index: {}]   ;;  %s7500_s8 = inlined_call_operand.hbm [shape: f32[3,1,256], index: 8, kind: input, shape index: {}]   ;;  %s7501_s9 = inlined_call_operand.vmem [shape: bf16[128,128], index: 9, kind: input, shape index: {}]   ;;  %s7502_s10 = inlined_call_operand.hbm [shape: f32[1,128], index: 10, kind: input, shape index: {}]   ;;  %s7503_s11 = inlined_call_operand.hbm [shape: bf16[128,256], index: 11, kind: input, shape index: {}]   ;;  %s7504_s12 = inlined_call_operand.hbm [shape: f32[1,256], index: 12, kind: input, shape index: {}]   ;;  %s7505_s13 = inlined_call_operand.vmem [shape: f32[2,64,128], index: 13, kind: output, shape index: {0}]   ;;  %s7506_s14 = inlined_call_operand.vmem [shape: f32[2,2,1,1], index: 14, kind: output, shape index: {1}]  }
   0x1   :  { %7513 = sst [smem:[#allocation28_spill]] %s7495_s3 }
   0x2   :  { %7514 = sst [smem:[#allocation29_spill]] %s7496_s4 }
   0x3   :  { %7515 = sst [smem:[#allocation30_spill]] %s7498_s6 }
   0x4   :  { %7516 = sst [smem:[#allocation31_spill]] %s7499_s7 }
   0x5   :  { %7517 = sst [smem:[#allocation32_spill]] %s7500_s8 }
   0x6   :  { %7518 = sst [smem:[#allocation33_spill]] %s7501_s9 }
   0x7   :  { %7519 = sst [smem:[#allocation34_spill]] %s7502_s10 }
   0x8   :  { %20 = vsyncpa [#allocation9], 0 }
   0x9   :  { %21 = vsyncpa [#allocation11], 0 }
   0xa   :  { %22 = vsyncpa [#allocation14], 0 }
   0xb   :  { %23 = vsyncpa [#allocation17], 0  ;;  %s6498_s29 = smov 0   ;;  %s6500_s30 = smov 0  }
   0xc   :  { %s6502_s15 = smov 0   ;;  %s6504_s16 = smov 0  }
   0xd   :  { %s6506_s17 = smov 0  }
   0xe LB: > { %7520 = sst [smem:[#allocation27_spill]] %s6405_s17  ;;  %s6407_s18 = smov [#allocation10]   ;;  %s6405_s17 = sphi %s6506_s17, %s29_s17   ;;  %s6401_s16 = sphi %s6504_s16, %s7539_s16   ;;  %s6397_s15 = sphi %s6502_s15, %s7538_s15   ;;  %s6393_s30 = sphi %s6500_s30, %s7537_s30   ;;  %s6389_s29 = sphi %s6498_s29, %s7536_s29  }
   0xf   : > { %s371_s19 = sshll.u32 %s6407_s18, 4  ;;  %s4677_s20 = sadd.s32 4294967295, %s6405_s17   ;;  %s372_s19 = int_to_ptr.vmem [resolvable:$true] %s371_s19 }
  0x10   : > { %p4679_p0 = scmp.ge.s32.totalorder %s6405_s17, 1  ;;  %p340_p1 = scmp.lt.s32.totalorder %s6405_s17, 5 }
  0x11   : > { %p6526_p2 = scmp.eq.s32.totalorder %s4677_s20, 0  ;;  %s6408_s23 = smov [#allocation13]  }
  0x12   : > { %p6530_p3 = pnand %p4679_p0, %p340_p1  ;;  %s397_s24 = sshll.u32 %s6408_s23, 4  ;;  %s6536_s24 = int_to_ptr.vmem [resolvable:$true] %s397_s24 }
  0x13   : > { %s7521_s21 = scalar_select %p6526_p2, 1, 0 }
  0x14   : > { %p5475_p4 = pneg %p6530_p3  ;;  %s6409_s26 = smov [#allocation16]  }
  0x15   : > { %s424_s27 = sshll.u32 %s6409_s26, 4  ;;  %s6176_s18 = scalar_lea.vmem %s372_s19, 96  ;;  %s425_s27 = int_to_ptr.vmem [resolvable:$true] %s424_s27 }
  0x16   : > { %p6540_p5 = pnand %p6526_p2, %p5475_p4  ;;  %p6177_p7 = scmp.ne.s32.totalorder %s372_s19, %s6176_s18 }
  0x17   : > { %p6184_p10 = scmp.lt.s32.totalorder %s372_s19, %s372_s19  ;;  %p6185_p11 = scmp.lt.s32.totalorder %s6176_s18, %s6176_s18 }
  0x18   : > { %p6546_p6 = pneg %p6540_p5 }
  0x19   : > { %p6186_p12 = por %p6185_p11, %p6184_p10 }
  0x1a   : > { %p6179_p8 = pnand %p6177_p7, %p6546_p6 }
  0x1c   : > { %p6180_p9 = pneg %p6179_p8 }
  0x1e   : > { %p6187_p13 = pnand %p6186_p12, %p6180_p9 }
  0x20   : > { %6190 = shalt.err (!%p6187_p13)
}
  0x21   : > { %s6410_s20 = smov 32   ;;  %s6411_s23 = smov 2  }
  0x22   : > { %s7525_s6 = sld [smem:[#allocation30_spill]]  ;;  %s6202_s9 = scalar_lea.vmem %s6536_s24, 96 }
  0x23   : > { %p6203_p0 = scmp.ne.s32.totalorder %s6536_s24, %s6202_s9  ;;  %p6210_p7 = scmp.lt.s32.totalorder %s6536_s24, %s6536_s24 }
  0x24   : > { %p6211_p8 = scmp.lt.s32.totalorder %s6202_s9, %s6202_s9 }
  0x25   : > { %p6205_p1 = pnand %p6203_p0, %p6546_p6 }
  0x26   : > { %p6212_p9 = por %p6211_p8, %p6210_p7 }
  0x27   : > { %p6206_p4 = pneg %p6205_p1 }
  0x28   : > { %5481 = dma.hbm_to_vmem [thread:$0]  (!%p6540_p5), %s7525_s6, 96, %s372_s19, [#allocation11], %s6410_s20, %s6410_s20, %s6411_s23  }
  0x29   : > { %p6213_p10 = pnand %p6212_p9, %p6206_p4 }
  0x2b   : > { %6216 = shalt.err (!%p6213_p10)
}
  0x2c   : > { %s7526_s8 = sld [smem:[#allocation32_spill]]  ;;  %s6228_s17 = scalar_lea.vmem %s425_s27, 2048 }
  0x2d   : > { %p6229_p11 = scmp.ne.s32.totalorder %s425_s27, %s6228_s17  ;;  %p6236_p0 = scmp.lt.s32.totalorder %s425_s27, %s425_s27 }
  0x2e   : > { %p6237_p1 = scmp.lt.s32.totalorder %s6228_s17, %s6228_s17 }
  0x2f   : > { %p6231_p12 = pnand %p6229_p11, %p6546_p6 }
  0x30   : > { %p6238_p2 = por %p6237_p1, %p6236_p0 }
  0x31   : > { %p6232_p13 = pneg %p6231_p12 }
  0x32   : > { %5487 = dma.hbm_to_vmem [thread:$0]  (!%p6540_p5), %s7526_s8, 96, %s6536_s24, [#allocation14], %s6410_s20, %s6410_s20, %s6411_s23  }
  0x33   : > { %p6239_p7 = pnand %p6238_p2, %p6232_p13 }
  0x35   : > { %6242 = shalt.err (!%p6239_p7)
}
  0x36   : > { %s7511_s9 = smov 128   ;;  %s7512_s4 = smov 8  }
  0x37   : > { %5493 = dma.hbm_to_vmem [thread:$0]  (!%p6540_p5), %s7503_s11, 2048, %s425_s27, [#allocation17], %s7511_s9, %s7511_s9, %s7512_s4  }
  0x38   : > { %s38_s20 = sadd.s32 1, %s6397_s15  ;;  %s41_s23 = sadd.s32 1, %s6401_s16 }
  0x39   : > { %p39_p4 = scmp.ge.s32.totalorder %s38_s20, 2  ;;  %s6414_s26 = smov [#allocation8]  }
  0x3a   : > { %s352_s18 = sshll.u32 %s6414_s26, 4  ;;  %s353_s18 = int_to_ptr.vmem [resolvable:$true] %s352_s18 }
  0x3b   : > { %s7541_s20 = smov (%p39_p4, %s38_s20), 0  ;;  %s7543_s23 = smov (!%p39_p4, %s41_s23), %s6401_s16 }
  0x3c   : > { %p43_p2 = scmp.ge.s32.totalorder %s7543_s23, 2  ;;  %s6254_s17 = scalar_lea.vmem %s353_s18, 3072 }
  0x3d   : > { %p6255_p8 = scmp.ne.s32.totalorder %s353_s18, %s6254_s17  ;;  %p6262_p11 = scmp.lt.s32.totalorder %s353_s18, %s353_s18 }
  0x3e   : > { %p6263_p12 = scmp.lt.s32.totalorder %s6254_s17, %s6254_s17 }
  0x3f   : > { %p6257_p9 = pnand %p6255_p8, %p6546_p6 }
  0x40   : > { %p6264_p13 = por %p6263_p12, %p6262_p11 }
  0x41   : > { %p6258_p10 = pneg %p6257_p9 }
  0x43   : > { %p6265_p0 = pnand %p6264_p13, %p6258_p10 }
  0x45   : > { %6268 = shalt.err (!%p6265_p0)
}
  0x46   : > { %s6415_s27 = smov 64   ;;  %s6416_s19 = smov 4  }
  0x47   : > { %s7527_s3 = sld [smem:[#allocation28_spill]]  ;;  %s7545_s23 = smov (%p43_p2, %s7543_s23), 0 }
  0x48   : > { %s6417_s9 = smov [#allocation12]   ;;  %s6418_s6 = smov [#allocation15]  }
  0x49   : > { %s384_s4 = sshll.u32 %s6417_s9, 4  ;;  %s414_s8 = sshll.u32 %s6418_s6, 4  ;;  %s385_s4 = int_to_ptr.vmem [resolvable:$true] %s384_s4  ;;  %s415_s8 = int_to_ptr.vmem [resolvable:$true] %s414_s8 }
  0x4a   : > { %s6280_s17 = scalar_lea.vmem %s385_s4, 6144  ;;  %p6288_p8 = scmp.lt.s32.totalorder %s385_s4, %s385_s4 }
  0x4b   : > { %p6281_p1 = scmp.ne.s32.totalorder %s385_s4, %s6280_s17  ;;  %p6289_p9 = scmp.lt.s32.totalorder %s6280_s17, %s6280_s17 }
  0x4d   : > { %5478 = dma.hbm_to_vmem [thread:$0]  (!%p6540_p5), %s7527_s3, 3072, %s353_s18, [#allocation9], %s6415_s27, %s6415_s27, %s6416_s19  }
  0x4e   : > { %p6283_p7 = pnand %p6281_p1, %p6546_p6  ;;  %p6290_p10 = por %p6289_p9, %p6288_p8 }
  0x50   : > { %p6284_p4 = pneg %p6283_p7 }
  0x52   : > { %p6291_p11 = pnand %p6290_p10, %p6284_p4 }
  0x54   : > { %6294 = shalt.err (!%p6291_p11)
}
  0x55   : > { %s7528_s18 = smov 8   ;;  %s7529_s27 = smov 128  }
  0x56   : > { %s7530_s7 = sld [smem:[#allocation31_spill]]  ;;  %s6306_s6 = scalar_lea.vmem %s415_s8, 16 }
  0x57   : > { %p6307_p2 = scmp.ne.s32.totalorder %s415_s8, %s6306_s6  ;;  %s6313_s24 = scalar_lea.vmem %s415_s8, 32 }
  0x58   : > { %p6314_p0 = scmp.lt.s32.totalorder %s415_s8, %s415_s8  ;;  %p6315_p1 = scmp.lt.s32.totalorder %s6313_s24, %s6306_s6 }
  0x59   : > { %p6309_p12 = pnand %p6307_p2, %p6546_p6 }
  0x5a   : > { %p6316_p7 = por %p6315_p1, %p6314_p0 }
  0x5b   : > { %p6310_p13 = pneg %p6309_p12 }
  0x5c   : > { %5484 = dma.hbm_to_vmem [thread:$0]  (!%p6540_p5), %s7530_s7, 6144, %s385_s4, [#allocation11], %s7529_s27, %s7529_s27, %s7528_s18  }
  0x5d   : > { %p6317_p4 = pnand %p6316_p7, %p6310_p13 }
  0x5f   : > { %6320 = shalt.err (!%p6317_p4)
}
  0x60   : > { %s7531_s10 = sld [smem:[#allocation34_spill]]  ;;  %s6419_s4 = smov [#allocation18]  }
  0x61   : > { %s438_s18 = sshll.u32 %s6419_s4, 4  ;;  %s439_s18 = int_to_ptr.vmem [resolvable:$true] %s438_s18 }
  0x62   : > { %s6332_s27 = scalar_lea.vmem %s439_s18, 32  ;;  %p6340_p11 = scmp.lt.s32.totalorder %s439_s18, %s439_s18 }
  0x63   : > { %p6333_p8 = scmp.ne.s32.totalorder %s439_s18, %s6332_s27  ;;  %p6341_p2 = scmp.lt.s32.totalorder %s6332_s27, %s6332_s27 }
  0x65   : > { %p6335_p9 = pnand %p6333_p8, %p6546_p6  ;;  %p6342_p12 = por %p6341_p2, %p6340_p11 }
  0x66   : > { %5490 = dma.hbm_to_vmem [thread:$0]  (!%p6540_p5), %s7531_s10, 16, %s415_s8, [#allocation14]  }
  0x67   : > { %p6336_p10 = pneg %p6335_p9 }
  0x69   : > { %p6343_p13 = pnand %p6342_p12, %p6336_p10 }
  0x6b   : > { %6346 = shalt.err (!%p6343_p13)
}
  0x6c   : > { %5496 = dma.hbm_to_vmem [thread:$0]  (!%p6540_p5), %s7504_s12, 32, %s439_s18, [#allocation17]  }
  0x6d   : > { %464 = sbr.rel (%p6530_p3) target bundleno = 2461 (0x99d), region = 64  ;;  %p7532_p0 = scmp.ne.s32.totalorder (!%p6530_p3), %s7521_s21, 0 }
  0x72   : > { %6368 = dma.done.wait (%p7532_p0), [#allocation9], 3072  }
  0x73   : > { %6370 = vsyncadd (%p7532_p0), [#allocation9], 4294964224 }
  0x74   : > { %6372 = dma.done.wait (%p7532_p0), [#allocation11], 6240  }
  0x75   : > { %6374 = vsyncadd (%p7532_p0), [#allocation11], 4294961056 }
  0x76   : > { %6376 = dma.done.wait (%p7532_p0), [#allocation14], 112  }
  0x77   : > { %6378 = vsyncadd (%p7532_p0), [#allocation14], 4294967184 }
  0x78   : > { %6380 = dma.done.wait (%p7532_p0), [#allocation17], 2080  }
  0x79   : > { %6382 = vsyncadd (%p7532_p0), [#allocation17], 4294965216  ;;  %s4696_s8 = sshll.u32 %s6389_s29, 2  ;;  %p546_p3 = scmp.lt.s32.totalorder %s6393_s30, 1 }
  0x7a   : > { %p548_p5 = scmp.lt.s32.totalorder %s4696_s8, 7  ;;  %p567_p6 = scmp.lt.s32.totalorder %s6389_s29, 1 }
  0x7b   : > { %s547_s22 = scalar_select %p546_p3, %s6393_s30, 1 }
  0x7c   : > { %s7547_s8 = smov (!%p548_p5, %s4696_s8), 7  ;;  %s6640_s24 = sshll.u32 %s6389_s29, 5 }
  0x7d   : > { %s4697_s25 = sshll.u32 %s547_s22, 3  ;;  %s4702_s28 = sshll.u32 %s547_s22, 1 }
  0x7e   : > { %s551_s6 = sadd.s32 %s4697_s25, %s7547_s8  ;;  %s574_s26 = smul.u32 88, %s6393_s30 }
  0x7f   : > { %s4698_s21 = sshll.u32 %s551_s6, 3  ;;  %s7549_s29 = smov (!%p567_p6, %s6389_s29), 1 }
  0x80   : > { %s6646_s18 = scalar_lea.vmem %s7494_s2, %s4698_s21  ;;  %s6651_s9 = scalar_lea.vmem %s7505_s13, %s4698_s21 }
  0x81   : > { %s575_s3 = sadd.s32 %s6640_s24, %s574_s26  ;;  %s6655_s7 = sadd.s32 %s4702_s28, %s7549_s29 }
  0x82   : > { %s576_s25 = scalar_lea.vmem %s7492_s0, %s575_s3  ;;  %s571_s17 = scalar_lea.vmem %s7506_s14, %s6655_s7 }
  0x83   : > { %v615_v0 = vld [vmem:[%s576_s25] sm:$0xff]  ;;  %v617_v1 = vld [vmem:[%s576_s25 + $0x8] sm:$0xff]  ;;  %v619_v2 = vld [vmem:[%s576_s25 + $0x10] sm:$0xff] }
  0x84   : > { %616 = vst [vmem:[#allocation2] sm:$0xff] %v615_v0  ;;  %618 = vst [vmem:[#allocation2 + $0x8] sm:$0xff] %v617_v1  ;;  %v621_v3 = vld [vmem:[%s576_s25 + $0x18] sm:$0xff]  ;;  %v623_v4 = vld [vmem:[%s576_s25 + $0x20] sm:$0xff] }
  0x85   : > { %620 = vst [vmem:[#allocation2 + $0x10] sm:$0xff] %v619_v2  ;;  %v625_v5 = vld [vmem:[%s576_s25 + $0x28] sm:$0xff]  ;;  %622 = vst [vmem:[#allocation2 + $0x18] sm:$0xff] %v621_v3  ;;  %v4704_v6 = vld [vmem:[%s576_s25 + $0x30] sm:$0x3] }
  0x86   : > { %624 = vst [vmem:[#allocation2 + $0x20] sm:$0xff] %v623_v4  ;;  %626 = vst [vmem:[#allocation2 + $0x28] sm:$0xff] %v625_v5 }
  0x87   : > { %638 = vst [vmem:[#allocation2 + $0x30] sm:$0x3] %v4704_v6 }
  0x88   : > { %642 = vsyncadd [#allocation4], 800  ;;  %s643_s3 = sshra.s32 %s6640_s24, 3  ;;  %s645_s10 = smul.u32 10, %s6393_s30 }
  0x8a   : > { %s646_s29 = sadd.s32 %s645_s10, %s643_s3 }
  0x8b   : > { %s4705_s28 = sshll.u32 %s646_s29, 2 }
  0x8c   : > { %s648_s4 = scalar_lea.vmem %s7493_s1, %s4705_s28 }
  0x8d   : > { %v683_v7 = vld [vmem:[%s648_s4] sm:$0xff]  ;;  %v685_v8 = vld [vmem:[%s648_s4 + $0x8] sm:$0xff]  ;;  %v687_v9 = vld [vmem:[%s648_s4 + $0x10] sm:$0xff] }
  0x8e   : > { %684 = vst [vmem:[#allocation3] sm:$0xff] %v683_v7  ;;  %686 = vst [vmem:[#allocation3 + $0x8] sm:$0xff] %v685_v8 }
  0x8f   : > { %688 = vst [vmem:[#allocation3 + $0x10] sm:$0xff] %v687_v9 }
  0x90   : > { %696 = vsyncadd [#allocation4 + $0x1], 384  ;;  %v697_v10 = vlaneseq  ;;  %s4706_s27 = sadd.s32 4294967288, %s6640_s24  ;;  %v6420_v11 = vmov 0.0  }
  0x91   : > { %742 = vst [vmem:[#allocation5] sm:$0xff] %v6420_v11  ;;  %743 = vst [vmem:[#allocation5 + $0x38] sm:$0xff] %v6420_v11  ;;  %v705_v13 = vstv %s4706_s27 }
  0x92   : > { %v6672_v12 = vshrl.u32 %v697_v10, 7 }
  0x94   : > { %v699_v14 = vadd.s32 8, %v6672_v12  ;;  %v700_v15 = vadd.s32 16, %v6672_v12  ;;  %v701_v16 = vadd.s32 24, %v6672_v12  ;;  %v702_v17 = vadd.s32 32, %v6672_v12 }
  0x95   : > { %v703_v18 = vadd.s32 40, %v6672_v12  ;;  %v706_v19 = vadd.s32 %v705_v13, %v6672_v12 }
  0x96   : > { %v707_v20 = vadd.s32 %v705_v13, %v699_v14  ;;  %v708_v21 = vadd.s32 %v705_v13, %v700_v15  ;;  %v709_v22 = vadd.s32 %v705_v13, %v701_v16  ;;  %v710_v23 = vadd.s32 %v705_v13, %v702_v17 }
  0x97   : > { %v711_v24 = vadd.s32 %v705_v13, %v703_v18  ;;  %vm712_vm0 = vcmp.ge.s32.totalorder %v706_v19, 0  ;;  %vm718_vm1 = vcmp.lt.s32.totalorder %v706_v19, 64 }
  0x98   : > { %vm713_vm2 = vcmp.ge.s32.totalorder %v707_v20, 0  ;;  %vm714_vm3 = vcmp.ge.s32.totalorder %v708_v21, 0  ;;  %vm724_vm4 = vmand %vm712_vm0, %vm718_vm1  ;;  %vm715_vm5 = vcmp.ge.s32.totalorder %v709_v22, 0  ;;  %vm719_vm6 = vcmp.lt.s32.totalorder %v707_v20, 64 }
  0x99   : > { %vm720_vm7 = vcmp.lt.s32.totalorder %v708_v21, 64  ;;  %vm721_vm8 = vcmp.lt.s32.totalorder %v709_v22, 64  ;;  %vm716_vm9 = vcmp.ge.s32.totalorder %v710_v23, 0  ;;  %vm722_vm10 = vcmp.lt.s32.totalorder %v710_v23, 64  ;;  %vm725_vm11 = vmand %vm713_vm2, %vm719_vm6 }
  0x9a   : > { %v6681_v25 = vsel %vm724_vm4, 1.0, %v6420_v11  ;;  %vm717_vm12 = vcmp.ge.s32.totalorder %v711_v24, 0  ;;  %vm723_vm13 = vcmp.lt.s32.totalorder %v711_v24, 64  ;;  %vm726_vm14 = vmand %vm714_vm3, %vm720_vm7  ;;  %v6684_v26 = vsel %vm725_vm11, 1.0, %v6420_v11 }
  0x9b   : > { %vm727_vm15 = vmand %vm715_vm5, %vm721_vm8  ;;  %v6687_v27 = vsel %vm726_vm14, 1.0, %v6420_v11 }
  0x9c   : > { %vm728_vm0 = vmand %vm716_vm9, %vm722_vm10  ;;  %v6690_v28 = vsel %vm727_vm15, 1.0, %v6420_v11 }
  0x9d   : > { %vm729_vm1 = vmand %vm717_vm12, %vm723_vm13  ;;  %v6693_v29 = vsel %vm728_vm0, 1.0, %v6420_v11 }
  0x9e   : > { %v6696_v30 = vsel %vm729_vm1, 1.0, %v6420_v11 }
  0x9f   : > { %6383 = dma.done.wait [#allocation4 + $0x1], 384 }
  0xa0   : > { %6384 = vsyncadd [#allocation4 + $0x1], 4294966912  ;;  %v752_v31 = vld [vmem:[#allocation3] sm:$0xf]  ;;  %v753_v32 = vld [vmem:[#allocation3 + $0x4] sm:$0xf] }
  0xa1   : > { %v754_v33 = vld [vmem:[#allocation3 + $0x8] sm:$0xf]  ;;  %758 = vst [vmem:[#allocation6 + $0xc] sm:$0xf] %v752_v31  ;;  %759 = vst [vmem:[#allocation6 + $0x1c] sm:$0xf] %v753_v32 }
  0xa2   : > { %760 = vst [vmem:[#allocation6 + $0x2c] sm:$0xf] %v754_v33  ;;  %v755_v34 = vld [vmem:[#allocation3 + $0xc] sm:$0xf]  ;;  %v756_v35 = vld [vmem:[#allocation3 + $0x10] sm:$0xf] }
  0xa3   : > { %v757_v36 = vld [vmem:[#allocation3 + $0x14] sm:$0xf]  ;;  %761 = vst [vmem:[#allocation6 + $0x3c] sm:$0xf] %v755_v34  ;;  %762 = vst [vmem:[#allocation6 + $0x4c] sm:$0xf] %v756_v35 }
  0xa4   : > { %763 = vst [vmem:[#allocation6 + $0x5c] sm:$0xf] %v757_v36 }
  0xa5   : > { %6385 = dma.done.wait [#allocation4], 800 }
  0xa6   : > { %6386 = vsyncadd [#allocation4], 4294966496  ;;  %v5567_v37 = vld [vmem:[#allocation8 + $0x78] sm:$0xff]   ;;  %v5569_v39 = vld [vmem:[#allocation8 + $0x70] sm:$0xff]   ;;  %vm6421_vm2 = vmmov 0   ;;  %s7533_s28 = sld [smem:[#allocation29_spill]] }
  0xa7   : > { %v5568_v38 = vld [vmem:[#allocation8 + $0x38] sm:$0xff]   ;;  %5342 = vmatprep.subr.bf16.mxu1 %v5567_v37  ;;  %v5570_v40 = vld [vmem:[#allocation8 + $0x30] sm:$0xff]   ;;  %v5571_v41 = vld [vmem:[#allocation8 + $0x68] sm:$0xff]   ;;  %s7534_s27 = sld [smem:[#allocation33_spill]]  ;;  %vm4432_vm3 = vcmask 0  }
  0xa8   : > { %5343 = vmatpush3.bf16.msra.mxu1 %v5568_v38  ;;  %v5572_v42 = vld [vmem:[#allocation8 + $0x28] sm:$0xff]   ;;  %v5573_v43 = vld [vmem:[#allocation8 + $0x60] sm:$0xff]   ;;  %v5575_v45 = vld [vmem:[#allocation8 + $0x58] sm:$0xff]  }
  0xa9   : > { %5344 = vmatprep.subr.bf16.mxu1 %v5569_v39  ;;  %v5574_v44 = vld [vmem:[#allocation8 + $0x20] sm:$0xff]   ;;  %v5576_v46 = vld [vmem:[#allocation8 + $0x18] sm:$0xff]   ;;  %v5577_v47 = vld [vmem:[#allocation8 + $0x50] sm:$0xff]  }
  0xaa   : > { %v767_v48 = vld [vmem:[#allocation2] sm:$0xff]  ;;  %v768_v49 = vld [vmem:[#allocation2 + $0x8] sm:$0xff]  ;;  %v5579_v57 = vld [vmem:[#allocation8 + $0x48] sm:$0xff]  }
  0xab   : > { %v803_v50 = vld [vmem:[#allocation2 + $0x1] sm:$0xff]  ;;  %v5270_v51 = vpack.c.bf16 %v767_v48, %v767_v48  ;;  %v5271_v52 = vpack.c.bf16 %v768_v49, %v768_v49  ;;  %v804_v53 = vld [vmem:[#allocation2 + $0x9] sm:$0xff]  ;;  %v770_v59 = vld [vmem:[#allocation2 + $0x18] sm:$0xff] }
  0xac   : > { %5345 = vmatpush3.bf16.msra.mxu1 %v5570_v40  ;;  %v5276_v54 = vpack.c.bf16 %v803_v50, %v803_v50  ;;  %v5578_v55 = vld [vmem:[#allocation8 + $0x10] sm:$0xff]   ;;  %v5277_v56 = vpack.c.bf16 %v804_v53, %v804_v53  ;;  %v769_v58 = vld [vmem:[#allocation2 + $0x10] sm:$0xff]  ;;  %v5273_v61 = vpack.c.bf16 %v770_v59, %v770_v59  ;;  %v5580_v2 = vld [vmem:[#allocation8 + $0x8] sm:$0xff]  }
  0xad   : > { %5346 = vmatprep.subr.bf16.mxu1 %v5571_v41  ;;  %797 = vst [vmem:[#allocation6] sm:$0xf] %v5270_v51  ;;  %798 = vst [vmem:[#allocation6 + $0x10] sm:$0xf] %v5271_v52  ;;  %v5272_v60 = vpack.c.bf16 %v769_v58, %v769_v58  ;;  %v805_v62 = vld [vmem:[#allocation2 + $0x11] sm:$0xff]  ;;  %v806_v63 = vld [vmem:[#allocation2 + $0x19] sm:$0xff] }
  0xae   : > { %833 = vst [vmem:[#allocation6 + $0x4] sm:$0xf] %v5276_v54  ;;  %834 = vst [vmem:[#allocation6 + $0x14] sm:$0xf] %v5277_v56  ;;  %v5278_v0 = vpack.c.bf16 %v805_v62, %v805_v62  ;;  %v5279_v1 = vpack.c.bf16 %v806_v63, %v806_v63  ;;  %v771_v3 = vld [vmem:[#allocation2 + $0x20] sm:$0xff]  ;;  %v772_v4 = vld [vmem:[#allocation2 + $0x28] sm:$0xff] }
  0xaf   : > { %799 = vst [vmem:[#allocation6 + $0x20] sm:$0xf] %v5272_v60  ;;  %800 = vst [vmem:[#allocation6 + $0x30] sm:$0xf] %v5273_v61  ;;  %v5274_v5 = vpack.c.bf16 %v771_v3, %v771_v3  ;;  %v807_v6 = vld [vmem:[#allocation2 + $0x21] sm:$0xff]  ;;  %v808_v7 = vld [vmem:[#allocation2 + $0x29] sm:$0xff]  ;;  %v5275_v9 = vpack.c.bf16 %v772_v4, %v772_v4 }
  0xb0   : > { %5347 = vmatpush3.bf16.msra.mxu1 %v5572_v42  ;;  %835 = vst [vmem:[#allocation6 + $0x24] sm:$0xf] %v5278_v0  ;;  %836 = vst [vmem:[#allocation6 + $0x34] sm:$0xf] %v5279_v1  ;;  %v5581_v8 = vld [vmem:[#allocation8 + $0x40] sm:$0xff]   ;;  %v5280_v10 = vpack.c.bf16 %v807_v6, %v807_v6  ;;  %v5281_v13 = vpack.c.bf16 %v808_v7, %v808_v7  ;;  %v5586_v16 = vld [vmem:[#allocation8 + $0xb8] sm:$0xff]  }
  0xb1   : > { %5348 = vmatprep.subr.bf16.mxu1 %v5573_v43  ;;  %801 = vst [vmem:[#allocation6 + $0x40] sm:$0xf] %v5274_v5  ;;  %802 = vst [vmem:[#allocation6 + $0x50] sm:$0xf] %v5275_v9  ;;  %v5582_v14 = vld [vmem:[#allocation8] sm:$0xff]   ;;  %v839_v17 = vld [vmem:[#allocation2 + $0x2] sm:$0xff] }
  0xb2   : > { %837 = vst [vmem:[#allocation6 + $0x44] sm:$0xf] %v5280_v10  ;;  %838 = vst [vmem:[#allocation6 + $0x54] sm:$0xf] %v5281_v13  ;;  %v840_v18 = vld [vmem:[#allocation2 + $0xa] sm:$0xff]  ;;  %v5282_v20 = vpack.c.bf16 %v839_v17, %v839_v17  ;;  %v841_v23 = vld [vmem:[#allocation2 + $0x12] sm:$0xff] }
  0xb3   : > { %v5283_v21 = vpack.c.bf16 %v840_v18, %v840_v18  ;;  %v842_v24 = vld [vmem:[#allocation2 + $0x1a] sm:$0xff]  ;;  %v5284_v31 = vpack.c.bf16 %v841_v23, %v841_v23  ;;  %v843_v33 = vld [vmem:[#allocation2 + $0x22] sm:$0xff]  ;;  %v844_v34 = vld [vmem:[#allocation2 + $0x2a] sm:$0xff] }
  0xb4   : > { %5349 = vmatpush3.bf16.msra.mxu1 %v5574_v44  ;;  %v5585_v19 = vld [vmem:[#allocation6] ss:$16 sps:$4 sm:$0xff]   ;;  %869 = vst [vmem:[#allocation6 + $0x8] sm:$0xf] %v5282_v20  ;;  %v5285_v32 = vpack.c.bf16 %v842_v24, %v842_v24  ;;  %v5286_v35 = vpack.c.bf16 %v843_v33, %v843_v33  ;;  %v5287_v36 = vpack.c.bf16 %v844_v34, %v844_v34  ;;  %v5603_v38 = vld [vmem:[%s7497_s5 + $0x74] ss:$8 sps:$4 sm:$0xff]  }
  0xb5   : > { %5350 = vmatprep.subr.bf16.mxu1 %v5575_v45  ;;  %v5583_v15 = vld [vmem:[#allocation6 + $0x4] ss:$16 sps:$4 sm:$0xff]   ;;  %870 = vst [vmem:[#allocation6 + $0x18] sm:$0xf] %v5283_v21  ;;  %871 = vst [vmem:[#allocation6 + $0x28] sm:$0xf] %v5284_v31  ;;  %1830 = vmatprep.subr.bf16.mxu0 %v5603_v38 }
  0xb6   : > { %1166 = vmatprep.mubr.bf16.mxu1 %v5583_v15  ;;  %v5587_v37 = vld [vmem:[#allocation8 + $0xb0] sm:$0xff]   ;;  %872 = vst [vmem:[#allocation6 + $0x38] sm:$0xf] %v5285_v32  ;;  %873 = vst [vmem:[#allocation6 + $0x48] sm:$0xf] %v5286_v35  ;;  %v5590_v41 = vld [vmem:[#allocation8 + $0xa8] sm:$0xff]  }
  0xb7   : > { %v5588_v22 = vld [vmem:[#allocation6 + $0x24] ss:$16 sps:$4 sm:$0xff]   ;;  %874 = vst [vmem:[#allocation6 + $0x58] sm:$0xf] %v5287_v36  ;;  %v5605_v39 = vld [vmem:[%s7497_s5 + $0x70] ss:$8 sps:$4 sm:$0xff]  }
  0xb8   : > { %5351 = vmatpush3.bf16.msra.mxu1 %v5576_v46  ;;  %v5591_v40 = vld [vmem:[#allocation6 + $0x20] ss:$16 sps:$4 sm:$0xff]   ;;  %1831 = vmatpush1.bf16.msra.mxu0 %v5605_v39  ;;  %v5595_v45 = vld [vmem:[#allocation8 + $0x98] sm:$0xff]   ;;  %v5610_v53 = vld [vmem:[%s7497_s5 + $0x174] ss:$8 sps:$4 sm:$0xff]  }
  0xb9   : > { %5352 = vmatprep.subr.bf16.mxu1 %v5577_v47  ;;  %v5593_v42 = vld [vmem:[#allocation6 + $0x44] ss:$16 sps:$4 sm:$0xff]   ;;  %v5596_v44 = vld [vmem:[#allocation6 + $0x40] ss:$16 sps:$4 sm:$0xff]   ;;  %v5598_v47 = vld [vmem:[#allocation8 + $0x88] sm:$0xff]  }
  0xba   : > { %v5592_v43 = vld [vmem:[#allocation8 + $0xa0] sm:$0xff]   ;;  %v5597_v46 = vld [vmem:[#allocation8 + $0x90] sm:$0xff]  }
  0xbb   : > { %v5599_v48 = vld [vmem:[#allocation8 + $0x80] sm:$0xff]   ;;  %v5606_v52 = vld [vmem:[%s7497_s5 + $0x64] ss:$8 sps:$4 sm:$0xff]   ;;  %v5623_v62 = vld [vmem:[%s7497_s5 + $0x40] ss:$8 sps:$4 sm:$0xff]  }
  0xbc   : > { %5353 = vmatpush3.bf16.msra.mxu1 %v5578_v55  ;;  %v5600_v49 = vld [vmem:[#allocation6 + $0x8] ss:$16 sps:$4 sm:$0xff]   ;;  %1832 = vmatprep.subr.bf16.mxu0 %v5606_v52  ;;  %v5616_v56 = vld [vmem:[%s7497_s5 + $0x164] ss:$8 sps:$4 sm:$0xff]   ;;  %v5622_v60 = vld [vmem:[%s7497_s5 + $0x154] ss:$8 sps:$4 sm:$0xff]  }
  0xbd   : > { %5354 = vmatprep.subr.bf16.mxu1 %v5579_v57  ;;  %v5601_v50 = vld [vmem:[#allocation6 + $0x28] ss:$16 sps:$4 sm:$0xff]   ;;  %v5618_v59 = vld [vmem:[%s7497_s5 + $0x44] ss:$8 sps:$4 sm:$0xff]   ;;  %v5624_v63 = vld [vmem:[%s7497_s5 + $0x34] ss:$8 sps:$4 sm:$0xff]  }
  0xbe   : > { %v5602_v51 = vld [vmem:[#allocation6 + $0x48] ss:$16 sps:$4 sm:$0xff]   ;;  %v5628_v0 = vld [vmem:[%s7497_s5 + $0x144] ss:$8 sps:$4 sm:$0xff]   ;;  %v5634_v4 = vld [vmem:[%s7497_s5 + $0x134] ss:$8 sps:$4 sm:$0xff]  }
  0xbf   : > { %v5608_v54 = vld [vmem:[%s7497_s5 + $0x170] ss:$8 sps:$4 sm:$0xff]   ;;  %v5611_v55 = vld [vmem:[%s7497_s5 + $0x60] ss:$8 sps:$4 sm:$0xff]   ;;  %v5630_v3 = vld [vmem:[%s7497_s5 + $0x24] ss:$8 sps:$4 sm:$0xff]  }
  0xc0   : > { %5355 = vmatpush3.bf16.msra.mxu1 %v5580_v2  ;;  %1833 = vmatpush1.bf16.msra.mxu0 %v5611_v55  ;;  %v5614_v57 = vld [vmem:[%s7497_s5 + $0x160] ss:$8 sps:$4 sm:$0xff]   ;;  %v5617_v58 = vld [vmem:[%s7497_s5 + $0x50] ss:$8 sps:$4 sm:$0xff]   ;;  %v5636_v7 = vld [vmem:[%s7497_s5 + $0x14] ss:$8 sps:$4 sm:$0xff]  }
  0xc1   : > { %5356 = vmatprep.subr.bf16.mxu1 %v5581_v8  ;;  %v5620_v61 = vld [vmem:[%s7497_s5 + $0x150] ss:$8 sps:$4 sm:$0xff]   ;;  %v5626_v1 = vld [vmem:[%s7497_s5 + $0x140] ss:$8 sps:$4 sm:$0xff]   ;;  %v5640_v8 = vld [vmem:[%s7497_s5 + $0x124] ss:$8 sps:$4 sm:$0xff]  }
  0xc2   : > { %v5629_v2 = vld [vmem:[%s7497_s5 + $0x30] ss:$8 sps:$4 sm:$0xff]   ;;  %v5635_v6 = vld [vmem:[%s7497_s5 + $0x20] ss:$8 sps:$4 sm:$0xff]   ;;  %v5642_v13 = vld [vmem:[%s7497_s5 + $0x4] ss:$8 sps:$4 sm:$0xff]  }
  0xc3   : > { %v5632_v5 = vld [vmem:[%s7497_s5 + $0x130] ss:$8 sps:$4 sm:$0xff]   ;;  %v5638_v9 = vld [vmem:[%s7497_s5 + $0x120] ss:$8 sps:$4 sm:$0xff]   ;;  %v5646_v15 = vld [vmem:[%s7497_s5 + $0x114] ss:$8 sps:$4 sm:$0xff]  }
  0xc4   : > { %5357 = vmatpush3.bf16.msra.mxu1 %v5582_v14  ;;  %v5641_v10 = vld [vmem:[%s7497_s5 + $0x10] ss:$8 sps:$4 sm:$0xff]   ;;  %v5648_v17 = vld [vmem:[%s7497_s5 + $0xf4] ss:$8 sps:$4 sm:$0xff]   ;;  %v5650_v18 = vld [vmem:[%s7497_s5 + $0x100] ss:$8 sps:$4 sm:$0xff]  }
  0xc5   : > { %5397 = vmatprep.subr.bf16.mxu1 %v6420_v11  ;;  %v5644_v14 = vld [vmem:[%s7497_s5 + $0x110] ss:$8 sps:$4 sm:$0xff]   ;;  %v5654_v21 = vld [vmem:[%s7497_s5 + $0xe4] ss:$8 sps:$4 sm:$0xff]   ;;  %v5659_v24 = vld [vmem:[%s7497_s5 + $0xe0] ss:$8 sps:$4 sm:$0xff]  }
  0xc6   : > { %v5653_v20 = vld [vmem:[%s7497_s5 + $0xf0] ss:$8 sps:$4 sm:$0xff]   ;;  %v5660_v31 = vld [vmem:[%s7497_s5 + $0xd4] ss:$8 sps:$4 sm:$0xff]   ;;  %v5664_v32 = vld [vmem:[%s7497_s5 + $0x1e4] ss:$8 sps:$4 sm:$0xff]  }
  0xc7   : > { %1167 = vmatmul.mubr.bf16.vlgmr.msra.gmra.mxu1 %v5585_v19  ;;  %v5652_v19 = vld [vmem:[%s7497_s5 + $0x104] ss:$8 sps:$4 sm:$0xff]   ;;  %v5656_v23 = vld [vmem:[%s7497_s5 + $0x1f0] ss:$8 sps:$4 sm:$0xff]   ;;  %v5662_v33 = vld [vmem:[%s7497_s5 + $0x1e0] ss:$8 sps:$4 sm:$0xff]  }
  0xc8   : > { %5398 = vmatpush3.bf16.msra.mxu1 %v5586_v16  ;;  %1174 = vmatprep.mubr.bf16.mxu1 %v5588_v22  ;;  %v5647_v16 = vld [vmem:[%s7497_s5] ss:$8 sps:$4 sm:$0xff]   ;;  %v5658_v22 = vld [vmem:[%s7497_s5 + $0x1f4] ss:$8 sps:$4 sm:$0xff]   ;;  %v5665_v34 = vld [vmem:[%s7497_s5 + $0xd0] ss:$8 sps:$4 sm:$0xff]  }
  0xc9   : > { %5399 = vmatprep.subr.bf16.mxu1 %v6420_v11  ;;  %v5666_v35 = vld [vmem:[%s7497_s5 + $0xc4] ss:$8 sps:$4 sm:$0xff]   ;;  %v5670_v36 = vld [vmem:[%s7497_s5 + $0x1d4] ss:$8 sps:$4 sm:$0xff]   ;;  %v5671_v38 = vld [vmem:[%s7497_s5 + $0xc0] ss:$8 sps:$4 sm:$0xff]  }
  0xca   : > { %v5672_v39 = vld [vmem:[%s7497_s5 + $0xb4] ss:$8 sps:$4 sm:$0xff]   ;;  %v5701_v55 = vld [vmem:[%s7497_s5 + $0x184] ss:$8 sps:$4 sm:$0xff]  }
  0xcb   : > { %v5694_v52 = vld [vmem:[%s7497_s5 + $0x194] ss:$8 sps:$4 sm:$0xff]  }
  0xcc   : > { %5400 = vmatpush3.bf16.msra.mxu1 %v5587_v37  ;;  %v5668_v37 = vld [vmem:[%s7497_s5 + $0x1d0] ss:$8 sps:$4 sm:$0xff]  }
  0xcd   : > { %5401 = vmatprep.subr.bf16.mxu1 %v6420_v11 }
  0xcf   : > { %1175 = vmatmul.mubr.bf16.gmra.mxu1 %v5591_v40  ;;  %v5676_v40 = vld [vmem:[%s7497_s5 + $0x1c4] ss:$8 sps:$4 sm:$0xff]  }
  0xd0   : > { %5402 = vmatpush3.bf16.msra.mxu1 %v5590_v41  ;;  %1182 = vmatprep.mubr.bf16.mxu1 %v5593_v42  ;;  %v5674_v41 = vld [vmem:[%s7497_s5 + $0x1c0] ss:$8 sps:$4 sm:$0xff]   ;;  %v5677_v42 = vld [vmem:[%s7497_s5 + $0xb0] ss:$8 sps:$4 sm:$0xff]  }
  0xd1   : > { %5403 = vmatprep.subr.bf16.mxu1 %v6420_v11 }
  0xd4   : > { %5404 = vmatpush3.bf16.msra.mxu1 %v5592_v43  ;;  %v5678_v43 = vld [vmem:[%s7497_s5 + $0xa4] ss:$8 sps:$4 sm:$0xff]  }
  0xd5   : > { %5405 = vmatprep.subr.bf16.mxu1 %v6420_v11 }
  0xd7   : > { %1183 = vmatmul.mubr.bf16.gmra.mxu1 %v5596_v44  ;;  %v5682_v44 = vld [vmem:[%s7497_s5 + $0x1b4] ss:$8 sps:$4 sm:$0xff]  }
  0xd8   : > { %5406 = vmatpush3.bf16.msra.mxu1 %v5595_v45  ;;  %5413 = vmatprep.mubr.msk.bf16.mxu1 %vm6421_vm2, %v6420_v11  ;;  %v5680_v45 = vld [vmem:[%s7497_s5 + $0x1b0] ss:$8 sps:$4 sm:$0xff]  }
  0xd9   : > { %5407 = vmatprep.subr.bf16.mxu1 %v6420_v11 }
  0xdc   : > { %5408 = vmatpush3.bf16.msra.mxu1 %v5597_v46  ;;  %v5683_v46 = vld [vmem:[%s7497_s5 + $0xa0] ss:$8 sps:$4 sm:$0xff]  }
  0xdd   : > { %5409 = vmatprep.subr.bf16.mxu1 %v6420_v11 }
  0xe0   : > { %5410 = vmatpush3.bf16.msra.mxu1 %v5598_v47  ;;  %v5684_v47 = vld [vmem:[%s7497_s5 + $0x94] ss:$8 sps:$4 sm:$0xff]  }
  0xe1   : > { %5411 = vmatprep.subr.bf16.mxu1 %v6420_v11 }
  0xe4   : > { %5412 = vmatpush3.bf16.msra.mxu1 %v5599_v48  ;;  %v5688_v48 = vld [vmem:[%s7497_s5 + $0x1a4] ss:$8 sps:$4 sm:$0xff]  }
  0xe5   : > { %1893 = vmatprep.subr.bf16.mxu1 %v5610_v53  ;;  %v5692_v53 = vld [vmem:[%s7497_s5 + $0x190] ss:$8 sps:$4 sm:$0xff]  }
  0xe7   : > { %5414 = vmatmul.mubr.bf16.vlgmr.msra.gmra.mxu1 %v5600_v49  ;;  %v5686_v49 = vld [vmem:[%s7497_s5 + $0x1a0] ss:$8 sps:$4 sm:$0xff]  }
  0xe8   : > { %5417 = vmatprep.mubr.msk.bf16.mxu1 %vm6421_vm2, %v6420_v11  ;;  %1894 = vmatpush1.bf16.msra.mxu1 %v5608_v54  ;;  %v5695_v54 = vld [vmem:[%s7497_s5 + $0x80] ss:$8 sps:$4 sm:$0xff]  }
  0xe9   : > { %1895 = vmatprep.subr.bf16.mxu1 %v5616_v56 }
  0xec   : > { %1896 = vmatpush1.bf16.msra.mxu1 %v5614_v57 }
  0xed   : > { %1897 = vmatprep.subr.bf16.mxu1 %v5622_v60 }
  0xef   : > { %5418 = vmatmul.mubr.bf16.gmra.mxu1 %v5601_v50  ;;  %v5689_v50 = vld [vmem:[%s7497_s5 + $0x90] ss:$8 sps:$4 sm:$0xff]  }
  0xf0   : > { %5421 = vmatprep.mubr.msk.bf16.mxu1 %vm6421_vm2, %v6420_v11  ;;  %v5612_v11 = vld [vmem:[%s7497_s5 + $0x54] ss:$8 sps:$4 sm:$0xff]   ;;  %1898 = vmatpush1.bf16.msra.mxu1 %v5620_v61 }
  0xf1   : > { %1834 = vmatprep.subr.bf16.mxu0 %v5612_v11  ;;  %1899 = vmatprep.subr.bf16.mxu1 %v5628_v0  ;;  %v5699_v11 = vld [vmem:[%s7497_s5 + $0x180] ss:$8 sps:$4 sm:$0xff]  }
  0xf2   : > { %1835 = vmatpush1.bf16.msra.mxu0 %v5617_v58 }
  0xf3   : > { %1836 = vmatprep.subr.bf16.mxu0 %v5618_v59 }
  0xf4   : > { %1900 = vmatpush1.bf16.msra.mxu1 %v5626_v1 }
  0xf5   : > { %1901 = vmatprep.subr.bf16.mxu1 %v5634_v4  ;;  %v4731_v4 = vld [vmem:[%s7533_s28] ss:$0 sm:$0xff] }
  0xf6   : > { %1837 = vmatpush1.bf16.msra.mxu0 %v5623_v62 }
  0xf7   : > { %5422 = vmatmul.mubr.bf16.gmra.mxu1 %v5602_v51  ;;  %1838 = vmatprep.subr.bf16.mxu0 %v5624_v63  ;;  %v5690_v51 = vld [vmem:[%s7497_s5 + $0x84] ss:$8 sps:$4 sm:$0xff]  }
  0xf8   : > { %1902 = vmatpush1.bf16.msra.mxu1 %v5632_v5 }
  0xf9   : > { %1903 = vmatprep.subr.bf16.mxu1 %v5640_v8 }
  0xfa   : > { %1839 = vmatpush1.bf16.msra.mxu0 %v5629_v2 }
  0xfb   : > { %1840 = vmatprep.subr.bf16.mxu0 %v5630_v3 }
  0xfc   : > { %1904 = vmatpush1.bf16.msra.mxu1 %v5638_v9 }
  0xfd   : > { %1905 = vmatprep.subr.bf16.mxu1 %v5646_v15 }
  0xfe   : > { %1841 = vmatpush1.bf16.msra.mxu0 %v5635_v6 }
  0xff   : > { %1842 = vmatprep.subr.bf16.mxu0 %v5636_v7 }
 0x100   : > { %1906 = vmatpush1.bf16.msra.mxu1 %v5644_v14 }
 0x101   : > { %1907 = vmatprep.subr.bf16.mxu1 %v5652_v19 }
 0x102   : > { %1843 = vmatpush1.bf16.msra.mxu0 %v5641_v10 }
 0x103   : > { %1844 = vmatprep.subr.bf16.mxu0 %v5642_v13 }
 0x104   : > { %1908 = vmatpush1.bf16.msra.mxu1 %v5650_v18 }
 0x105   : > { %1909 = vmatprep.subr.bf16.mxu1 %v5658_v22 }
 0x106   : > { %1845 = vmatpush1.bf16.msra.mxu0 %v5647_v16 }
 0x107   : > { %1846 = vmatprep.subr.bf16.mxu0 %v5648_v17 }
 0x108   : > { %1910 = vmatpush2.bf16.msra.mxu1 %v5656_v23 }
 0x109   : > { %1911 = vmatprep.subr.bf16.mxu1 %v5664_v32 }
 0x10a   : > { %1847 = vmatpush2.bf16.msra.mxu0 %v5653_v20 }
 0x10b   : > { %1848 = vmatprep.subr.bf16.mxu0 %v5654_v21 }
 0x10c   : > { %1912 = vmatpush2.bf16.msra.mxu1 %v5662_v33 }
 0x10d   : > { %1913 = vmatprep.subr.bf16.mxu1 %v5670_v36 }
 0x10e   : > { %1849 = vmatpush2.bf16.msra.mxu0 %v5659_v24 }
 0x10f   : > { %1850 = vmatprep.subr.bf16.mxu0 %v5660_v31 }
 0x110   : > { %1914 = vmatpush2.bf16.msra.mxu1 %v5668_v37 }
 0x111   : > { %1915 = vmatprep.subr.bf16.mxu1 %v5676_v40 }
 0x112   : > { %1851 = vmatpush2.bf16.msra.mxu0 %v5665_v34 }
 0x113   : > { %1852 = vmatprep.subr.bf16.mxu0 %v5666_v35 }
 0x114   : > { %1916 = vmatpush2.bf16.msra.mxu1 %v5674_v41 }
 0x115   : > { %1917 = vmatprep.subr.bf16.mxu1 %v5682_v44 }
 0x116   : > { %1853 = vmatpush2.bf16.msra.mxu0 %v5671_v38 }
 0x117   : > { %1854 = vmatprep.subr.bf16.mxu0 %v5672_v39 }
 0x118   : > { %1918 = vmatpush2.bf16.msra.mxu1 %v5680_v45 }
 0x119   : > { %1919 = vmatprep.subr.bf16.mxu1 %v5688_v48 }
 0x11a   : > { %1855 = vmatpush2.bf16.msra.mxu0 %v5677_v42 }
 0x11b   : > { %1856 = vmatprep.subr.bf16.mxu0 %v5678_v43 }
 0x11c   : > { %1920 = vmatpush2.bf16.msra.mxu1 %v5686_v49 }
 0x11d   : > { %1921 = vmatprep.subr.bf16.mxu1 %v5694_v52 }
 0x11e   : > { %1857 = vmatpush2.bf16.msra.mxu0 %v5683_v46 }
 0x11f   : > { %1858 = vmatprep.subr.bf16.mxu0 %v5684_v47 }
 0x120   : > { %1922 = vmatpush2.bf16.msra.mxu1 %v5692_v53 }
 0x121   : > { %1923 = vmatprep.subr.bf16.mxu1 %v5701_v55 }
 0x122   : > { %1859 = vmatpush2.bf16.msra.mxu0 %v5689_v50 }
 0x123   : > { %1860 = vmatprep.subr.bf16.mxu0 %v5690_v51 }
 0x124   : > { %1924 = vmatpush2.bf16.msra.mxu1 %v5699_v11 }
 0x126   : > { %1861 = vmatpush2.bf16.msra.mxu0 %v5695_v54 }
 0x187   : > { %v5358_v56 = vpop.f32.mrf.mxu1 }
 0x189   : > { %v5359_v57 = vpop.f32.mrf.mxu1 }
 0x18a   : > { %v5360_v3 = vadd.f32 %v5359_v57, %v5358_v56 }
 0x18b   : > { %v5361_v58 = vpop.f32.mrf.mxu1 }
 0x18c   : > { %v1169_v7 = vadd.f32 %v5360_v3, %v4731_v4 }
 0x18d   : > { %v5362_v59 = vpop.f32.mrf.mxu1 }
 0x18e   : > { %v5363_v6 = vadd.f32 %v5362_v59, %v5361_v58 }
 0x18f   : > { %v5364_v60 = vpop.f32.mrf.mxu1 }
 0x190   : > { %v1172_v15 = vadd.f32 %v5363_v6, %v4731_v4 }
 0x191   : > { %v5365_v61 = vpop.f32.mrf.mxu1 }
 0x192   : > { %v5366_v13 = vadd.f32 %v5365_v61, %v5364_v60 }
 0x193   : > { %v5367_v62 = vpop.f32.mrf.mxu1 }
 0x194   : > { %v1177_v22 = vadd.f32 %v5366_v13, %v4731_v4 }
 0x195   : > { %v5368_v63 = vpop.f32.mrf.mxu1 }
 0x196   : > { %v5369_v20 = vadd.f32 %v5368_v63, %v5367_v62 }
 0x197   : > { %v5370_v0 = vpop.f32.mrf.mxu1 }
 0x198   : > { %v1180_v35 = vadd.f32 %v5369_v20, %v4731_v4 }
 0x199   : > { %v5371_v1 = vpop.f32.mrf.mxu1 }
 0x19a   : > { %v5372_v33 = vadd.f32 %v5371_v1, %v5370_v0 }
 0x19b   : > { %v5373_v2 = vpop.f32.mrf.mxu1 }
 0x19c   : > { %v1185_v44 = vadd.f32 %v5372_v33, %v4731_v4  ;;  %v5713_v33 = vld [vmem:[#allocation6 + $0x4c] ss:$16 sps:$4 sm:$0xff]  }
 0x19d   : > { %v5374_v5 = vpop.f32.mrf.mxu1 }
 0x19e   : > { %v5375_v42 = vadd.f32 %v5374_v5, %v5373_v2 }
 0x1a0   : > { %v1188_v54 = vadd.f32 %v5375_v42, %v4731_v4  ;;  %v5723_v42 = vld [vmem:[#allocation12 + $0x50] ss:$8 sps:$4 sm:$0xff]  }
 0x1a7   : > { %v1225_v8 = vpop.f32.mrf.mxu1 }
 0x1a8   : > { %v1226_v9 = vadd.f32 %v1225_v8, %v1169_v7 }
 0x1a9   : > { %v5415_v10 = vpop.f32.mrf.mxu1 }
 0x1aa   : > { %v6905_v14 = vmul.f32 %v6681_v25, %v1226_v9  ;;  %v5702_v10 = vld [vmem:[#allocation6 + $0xc] ss:$16 sps:$4 sm:$0xff]  }
 0x1ab   : > { %v1228_v16 = vpop.f32.mrf.mxu1  ;;  %1925 = vmatprep.mubr.bf16.mxu1 %v5702_v10  ;;  %v1438_v10 = vld [vmem:[#allocation10] sm:$0x3] }
 0x1ac   : > { %1254 = vst [vmem:[#allocation5 + $0x8] sm:$0xff] %v6905_v14  ;;  %v5294_v17 = vpack.c.bf16 %v6905_v14, %v6905_v14  ;;  %v1229_v18 = vadd.f32 %v1228_v16, %v1172_v15 }
 0x1ad   : > { %v5416_v19 = vpop.f32.mrf.mxu1 }
 0x1ae   : > { %1320 = vst [vmem:[#allocation6 + $0x4] sm:$0xf] %v5294_v17  ;;  %v6911_v21 = vmul.f32 %v6684_v26, %v1229_v18 }
 0x1af   : > { %v1233_v23 = vpop.f32.mrf.mxu1 }
 0x1b0   : > { %1255 = vst [vmem:[#allocation5 + $0x10] sm:$0xff] %v6911_v21  ;;  %v5295_v24 = vpack.c.bf16 %v6911_v21, %v6911_v21  ;;  %v1234_v31 = vadd.f32 %v1233_v23, %v1177_v22 }
 0x1b1   : > { %v5419_v32 = vpop.f32.mrf.mxu1 }
 0x1b2   : > { %1321 = vst [vmem:[#allocation6 + $0x14] sm:$0xf] %v5295_v24  ;;  %v6917_v34 = vmul.f32 %v6687_v27, %v1234_v31  ;;  %v5708_v24 = vld [vmem:[#allocation6 + $0x2c] ss:$16 sps:$4 sm:$0xff]  }
 0x1b3   : > { %v1260_v36 = vld [vmem:[#allocation5 + $0x7] sm:$0xff]  ;;  %v1236_v37 = vpop.f32.mrf.mxu1 }
 0x1b4   : > { %v5288_v38 = vpack.c.bf16 %v1260_v36, %v1260_v36  ;;  %1256 = vst [vmem:[#allocation5 + $0x18] sm:$0xff] %v6917_v34  ;;  %v5296_v39 = vpack.c.bf16 %v6917_v34, %v6917_v34  ;;  %v1237_v40 = vadd.f32 %v1236_v37, %v1180_v35  ;;  %v5719_v37 = vld [vmem:[#allocation12 + $0x74] ss:$8 sps:$4 sm:$0xff]  }
 0x1b5   : > { %v5420_v41 = vpop.f32.mrf.mxu1  ;;  %2115 = vmatprep.subr.bf16.mxu0 %v5719_v37 }
 0x1b6   : > { %1290 = vst [vmem:[#allocation6] sm:$0xf] %v5288_v38  ;;  %1322 = vst [vmem:[#allocation6 + $0x24] sm:$0xf] %v5296_v39  ;;  %v6923_v43 = vmul.f32 %v6690_v28, %v1237_v40  ;;  %v5717_v38 = vld [vmem:[#allocation12 + $0x70] ss:$8 sps:$4 sm:$0xff]  }
 0x1b7   : > { %v1261_v45 = vld [vmem:[#allocation5 + $0xf] sm:$0xff]  ;;  %v1241_v47 = vpop.f32.mrf.mxu1  ;;  %v5725_v41 = vld [vmem:[#allocation12 + $0x54] ss:$8 sps:$4 sm:$0xff]  }
 0x1b8   : > { %v1326_v46 = vld [vmem:[#allocation5 + $0x9] sm:$0xff]  ;;  %v5289_v48 = vpack.c.bf16 %v1261_v45, %v1261_v45  ;;  %1257 = vst [vmem:[#allocation5 + $0x20] sm:$0xff] %v6923_v43  ;;  %v5297_v50 = vpack.c.bf16 %v6923_v43, %v6923_v43  ;;  %v1242_v51 = vadd.f32 %v1241_v47, %v1185_v44  ;;  %v5729_v47 = vld [vmem:[#allocation12 + $0x30] ss:$8 sps:$4 sm:$0xff]  }
 0x1b9   : > { %v5300_v49 = vpack.c.bf16 %v1326_v46, %v1326_v46  ;;  %v5423_v52 = vpop.f32.mrf.mxu1  ;;  %v5696_v4 = vld [vmem:[#allocation6 + $0x4] ss:$16 sps:$4 sm:$0xff]  }
 0x1ba   : > { %1291 = vst [vmem:[#allocation6 + $0x10] sm:$0xf] %v5289_v48  ;;  %1323 = vst [vmem:[#allocation6 + $0x34] sm:$0xf] %v5297_v50  ;;  %v6929_v53 = vmul.f32 %v6693_v29, %v1242_v51  ;;  %1862 = vmatprep.mubr.bf16.mxu0 %v5696_v4  ;;  %v5722_v39 = vld [vmem:[#allocation12 + $0x64] ss:$8 sps:$4 sm:$0xff]  }
 0x1bb   : > { %1356 = vst [vmem:[#allocation6 + $0x8] sm:$0xf] %v5300_v49  ;;  %v1262_v55 = vld [vmem:[#allocation5 + $0x17] sm:$0xff]  ;;  %v1244_v56 = vpop.f32.mrf.mxu1  ;;  %v5720_v40 = vld [vmem:[#allocation12 + $0x60] ss:$8 sps:$4 sm:$0xff]  }
 0x1bc   : > { %v1327_v11 = vld [vmem:[#allocation5 + $0x11] sm:$0xff]  ;;  %v5290_v57 = vpack.c.bf16 %v1262_v55, %v1262_v55  ;;  %1258 = vst [vmem:[#allocation5 + $0x28] sm:$0xff] %v6929_v53  ;;  %v5298_v59 = vpack.c.bf16 %v6929_v53, %v6929_v53  ;;  %v1245_v60 = vadd.f32 %v1244_v56, %v1188_v54  ;;  %v5731_v46 = vld [vmem:[#allocation12 + $0x34] ss:$8 sps:$4 sm:$0xff]   ;;  %v6422_v55 = vmov 0  }
 0x1bd   : > { %v5301_v58 = vpack.c.bf16 %v1327_v11, %v1327_v11  ;;  %v5424_v61 = vpop.f32.mrf.mxu1  ;;  %v5728_v44 = vld [vmem:[#allocation12 + $0x44] ss:$8 sps:$4 sm:$0xff]   ;;  %v5726_v45 = vld [vmem:[#allocation12 + $0x40] ss:$8 sps:$4 sm:$0xff]   ;;  %v5737_v50 = vld [vmem:[#allocation12 + $0x14] ss:$8 sps:$4 sm:$0xff]  }
 0x1be   : > { %1292 = vst [vmem:[#allocation6 + $0x20] sm:$0xf] %v5290_v57  ;;  %1324 = vst [vmem:[#allocation6 + $0x44] sm:$0xf] %v5298_v59  ;;  %v6935_v62 = vmul.f32 %v6696_v30, %v1245_v60  ;;  %v5734_v48 = vld [vmem:[#allocation12 + $0x24] ss:$8 sps:$4 sm:$0xff]  }
 0x1bf   : > { %1357 = vst [vmem:[#allocation6 + $0x18] sm:$0xf] %v5301_v58  ;;  %v1263_v63 = vld [vmem:[#allocation5 + $0x1f] sm:$0xff]  ;;  %v5740_v52 = vld [vmem:[#allocation12 + $0x4] ss:$8 sps:$4 sm:$0xff]  }
 0x1c0   : > { %v1328_v0 = vld [vmem:[#allocation5 + $0x19] sm:$0xff]  ;;  %v5291_v1 = vpack.c.bf16 %v1263_v63, %v1263_v63  ;;  %1259 = vst [vmem:[#allocation5 + $0x30] sm:$0xff] %v6935_v62  ;;  %v5299_v3 = vpack.c.bf16 %v6935_v62, %v6935_v62  ;;  %v5732_v49 = vld [vmem:[#allocation12 + $0x20] ss:$8 sps:$4 sm:$0xff]  }
 0x1c1   : > { %v5302_v2 = vpack.c.bf16 %v1328_v0, %v1328_v0  ;;  %v5698_v5 = vld [vmem:[#allocation6] ss:$16 sps:$4 sm:$0xff]   ;;  %v5705_v22 = vld [vmem:[#allocation6 + $0x24] ss:$16 sps:$4 sm:$0xff]  }
 0x1c2   : > { %1293 = vst [vmem:[#allocation6 + $0x30] sm:$0xf] %v5291_v1  ;;  %1325 = vst [vmem:[#allocation6 + $0x54] sm:$0xf] %v5299_v3  ;;  %1863 = vmatmul.mubr.bf16.vlgmr.msra.gmra.mxu0 %v5698_v5  ;;  %v5735_v51 = vld [vmem:[#allocation12 + $0x10] ss:$8 sps:$4 sm:$0xff]  }
 0x1c3   : > { %1358 = vst [vmem:[#allocation6 + $0x28] sm:$0xf] %v5302_v2  ;;  %v1264_v6 = vld [vmem:[#allocation5 + $0x27] sm:$0xff]  ;;  %1872 = vmatprep.mubr.bf16.mxu0 %v5705_v22  ;;  %2116 = vmatpush1.bf16.msra.mxu0 %v5717_v38  ;;  %v5746_v57 = vld [vmem:[%s7497_s5 + $0x264] ss:$8 sps:$4 sm:$0xff]  }
 0x1c4   : > { %v1329_v7 = vld [vmem:[#allocation5 + $0x21] sm:$0xff]  ;;  %v5292_v8 = vpack.c.bf16 %v1264_v6, %v1264_v6  ;;  %2117 = vmatprep.subr.bf16.mxu0 %v5722_v39  ;;  %v5744_v59 = vld [vmem:[%s7497_s5 + $0x260] ss:$8 sps:$4 sm:$0xff]   ;;  %v5758_v63 = vld [vmem:[%s7497_s5 + $0x244] ss:$8 sps:$4 sm:$0xff]  }
 0x1c5   : > { %v5303_v9 = vpack.c.bf16 %v1329_v7, %v1329_v7  ;;  %v5738_v54 = vld [vmem:[#allocation12] ss:$8 sps:$4 sm:$0xff]   ;;  %v5770_v3 = vld [vmem:[%s7497_s5 + $0x224] ss:$8 sps:$4 sm:$0xff]  }
 0x1c6   : > { %v5704_v13 = vld [vmem:[#allocation6 + $0x8] ss:$16 sps:$4 sm:$0xff]   ;;  %1294 = vst [vmem:[#allocation6 + $0x40] sm:$0xf] %v5292_v8  ;;  %v5743_v56 = vld [vmem:[%s7497_s5 + $0x274] ss:$8 sps:$4 sm:$0xff]  }
 0x1c7   : > { %1359 = vst [vmem:[#allocation6 + $0x38] sm:$0xf] %v5303_v9  ;;  %v1265_v15 = vld [vmem:[#allocation5 + $0x2f] sm:$0xff]  ;;  %1926 = vmatmul.mubr.bf16.vlgmr.msra.gmra.mxu1 %v5704_v13  ;;  %2118 = vmatpush1.bf16.msra.mxu0 %v5720_v40  ;;  %v5741_v11 = vld [vmem:[%s7497_s5 + $0x270] ss:$8 sps:$4 sm:$0xff]   ;;  %v6993_v9 = vsub.s32 1, %v6672_v12 }
 0x1c8   : > { %v1330_v16 = vld [vmem:[#allocation5 + $0x29] sm:$0xff]  ;;  %v1331_v17 = vld [vmem:[#allocation5 + $0x31] sm:$0xff]  ;;  %v5293_v18 = vpack.c.bf16 %v1265_v15, %v1265_v15  ;;  %1935 = vmatprep.mubr.bf16.mxu1 %v5708_v24  ;;  %2119 = vmatprep.subr.bf16.mxu0 %v5725_v41  ;;  %v6997_v40 = vsub.s32 0, %v6672_v12 }
 0x1c9   : > { %v5304_v19 = vpack.c.bf16 %v1330_v16, %v1330_v16  ;;  %v5305_v20 = vpack.c.bf16 %v1331_v17, %v1331_v17  ;;  %v5707_v23 = vld [vmem:[#allocation6 + $0x20] ss:$16 sps:$4 sm:$0xff]   ;;  %v5711_v32 = vld [vmem:[#allocation6 + $0x44] ss:$16 sps:$4 sm:$0xff]   ;;  %2784 = vmatprep.subr.bf16.mxu1 %v5743_v56  ;;  %v1447_v15 = vrot.slane %v1438_v10, %v6993_v9 }
 0x1ca   : > { %1295 = vst [vmem:[#allocation6 + $0x50] sm:$0xf] %v5293_v18  ;;  %1873 = vmatmul.mubr.bf16.gmra.mxu0 %v5707_v23  ;;  %v5749_v58 = vld [vmem:[%s7497_s5 + $0x374] ss:$8 sps:$4 sm:$0xff]   ;;  %2785 = vmatpush1.bf16.msra.mxu1 %v5741_v11  ;;  %v5750_v61 = vld [vmem:[%s7497_s5 + $0x250] ss:$8 sps:$4 sm:$0xff]  }
 0x1cb   : > { %1360 = vst [vmem:[#allocation6 + $0x48] sm:$0xf] %v5304_v19  ;;  %1361 = vst [vmem:[#allocation6 + $0x58] sm:$0xf] %v5305_v20  ;;  %1882 = vmatprep.mubr.bf16.mxu0 %v5711_v32  ;;  %2120 = vmatpush1.bf16.msra.mxu0 %v5723_v42  ;;  %v5752_v60 = vld [vmem:[%s7497_s5 + $0x254] ss:$8 sps:$4 sm:$0xff]  }
 0x1cc   : > { %2121 = vmatprep.subr.bf16.mxu0 %v5728_v44  ;;  %2786 = vmatprep.subr.bf16.mxu1 %v5746_v57  ;;  %v5756_v0 = vld [vmem:[%s7497_s5 + $0x240] ss:$8 sps:$4 sm:$0xff]   ;;  %v5764_v1 = vld [vmem:[%s7497_s5 + $0x234] ss:$8 sps:$4 sm:$0xff]   ;;  %v5762_v2 = vld [vmem:[%s7497_s5 + $0x230] ss:$8 sps:$4 sm:$0xff]  }
 0x1cd   : > { %v5768_v4 = vld [vmem:[%s7497_s5 + $0x220] ss:$8 sps:$4 sm:$0xff]   ;;  %v5776_v5 = vld [vmem:[%s7497_s5 + $0x214] ss:$8 sps:$4 sm:$0xff]   ;;  %v5774_v6 = vld [vmem:[%s7497_s5 + $0x210] ss:$8 sps:$4 sm:$0xff]  }
 0x1ce   : > { %v5710_v31 = vld [vmem:[#allocation6 + $0x28] ss:$16 sps:$4 sm:$0xff]   ;;  %2787 = vmatpush1.bf16.msra.mxu1 %v5744_v59  ;;  %v5782_v7 = vld [vmem:[%s7497_s5 + $0x204] ss:$8 sps:$4 sm:$0xff]  }
 0x1cf   : > { %1936 = vmatmul.mubr.bf16.gmra.mxu1 %v5710_v31  ;;  %2122 = vmatpush1.bf16.msra.mxu0 %v5726_v45  ;;  %v5780_v8 = vld [vmem:[%s7497_s5 + $0x200] ss:$8 sps:$4 sm:$0xff]  }
 0x1d0   : > { %1945 = vmatprep.mubr.bf16.mxu1 %v5713_v33  ;;  %2123 = vmatprep.subr.bf16.mxu0 %v5731_v46 }
 0x1d1   : > { %v5715_v35 = vld [vmem:[#allocation6 + $0x40] ss:$16 sps:$4 sm:$0xff]   ;;  %2788 = vmatprep.subr.bf16.mxu1 %v5752_v60 }
 0x1d2   : > { %1883 = vmatmul.mubr.bf16.gmra.mxu0 %v5715_v35  ;;  %v5716_v36 = vld [vmem:[#allocation6 + $0x48] ss:$16 sps:$4 sm:$0xff]   ;;  %2789 = vmatpush1.bf16.msra.mxu1 %v5750_v61 }
 0x1d3   : > { %2124 = vmatpush1.bf16.msra.mxu0 %v5729_v47  ;;  %2147 = vmatprep.mubr.bf16.mxu0 %v6422_v55 }
 0x1d4   : > { %2125 = vmatprep.subr.bf16.mxu0 %v5734_v48  ;;  %2790 = vmatprep.subr.bf16.mxu1 %v5758_v63 }
 0x1d6   : > { %2791 = vmatpush1.bf16.msra.mxu1 %v5756_v0 }
 0x1d7   : > { %1946 = vmatmul.mubr.bf16.gmra.mxu1 %v5716_v36  ;;  %2126 = vmatpush1.bf16.msra.mxu0 %v5732_v49  ;;  %v1443_v49 = vrot.slane %v1438_v10, %v6997_v40 }
 0x1d8   : > { %2127 = vmatprep.subr.bf16.mxu0 %v5737_v50  ;;  %2792 = vmatprep.subr.bf16.mxu1 %v5764_v1 }
 0x1da   : > { %2793 = vmatpush1.bf16.msra.mxu1 %v5762_v2 }
 0x1db   : > { %2128 = vmatpush1.bf16.msra.mxu0 %v5735_v51  ;;  %2794 = vmatprep.subr.bf16.mxu1 %v5770_v3 }
 0x1dc   : > { %2129 = vmatprep.subr.bf16.mxu0 %v5740_v52 }
 0x1de   : > { %2795 = vmatpush1.bf16.msra.mxu1 %v5768_v4 }
 0x1df   : > { %2130 = vmatpush1.bf16.msra.mxu0 %v5738_v54  ;;  %2796 = vmatprep.subr.bf16.mxu1 %v5776_v5 }
 0x1e0   : > { %2847 = vmatprep.subr.bf16.mxu0 %v5749_v58 }
 0x1e2   : > { %2797 = vmatpush1.bf16.msra.mxu1 %v5774_v6 }
 0x1e3   : > { %2798 = vmatprep.subr.bf16.mxu1 %v5782_v7 }
 0x1e6   : > { %2799 = vmatpush1.bf16.msra.mxu1 %v5780_v8 }
 0x282   : > { %v1864_v13 = vpop.f32.mrf.mxu0 }
 0x283   : > { %v1865_v12 = vadd.f32 %v1864_v13, %v1443_v49 }
 0x284   : > { %v1866_v16 = vpop.f32.mrf.mxu0 }
 0x285   : > { %v1867_v19 = vadd.f32 %v1866_v16, %v1447_v15 }
 0x286   : > { %v1868_v17 = vpop.f32.mrf.mxu0 }
 0x287   : > { %v1927_v18 = vpop.f32.mrf.mxu1  ;;  %v1869_v2 = vadd.f32 %v1868_v17, %v1443_v49 }
 0x288   : > { %v1870_v20 = vpop.f32.mrf.mxu0  ;;  %v1928_v63 = vadd.f32 %v1927_v18, %v1865_v12 }
 0x289   : > { %v1929_v22 = vpop.f32.mrf.mxu1  ;;  %v1871_v32 = vadd.f32 %v1870_v20, %v1447_v15 }
 0x28a   : > { %v1930_v23 = vadd.f32 %v1929_v22, %v1867_v19  ;;  %v1874_v24 = vpop.f32.mrf.mxu0 }
 0x28b   : > { %v1931_v31 = vpop.f32.mrf.mxu1  ;;  %v1875_v20 = vadd.f32 %v1874_v24, %v1443_v49 }
 0x28c   : > { %v4859_v33 = vmul.f32 -1.442695, %v1930_v23  ;;  %v1876_v35 = vpop.f32.mrf.mxu0  ;;  %v1932_v7 = vadd.f32 %v1931_v31, %v1869_v2 }
 0x28d   : > { %v1933_v36 = vpop.f32.mrf.mxu1  ;;  %v1877_v41 = vadd.f32 %v1876_v35, %v1447_v15 }
 0x28e   : > { %6049 = vpow2.f32 %v4859_v33  ;;  %v1934_v37 = vadd.f32 %v1933_v36, %v1871_v32  ;;  %v1878_v38 = vpop.f32.mrf.mxu0 }
 0x28f   : > { %v1937_v39 = vpop.f32.mrf.mxu1  ;;  %v1879_v22 = vadd.f32 %v1878_v38, %v1443_v49 }
 0x290   : > { %v4860_v42 = vmul.f32 -1.442695, %v1934_v37  ;;  %v1880_v44 = vpop.f32.mrf.mxu0  ;;  %v1938_v23 = vadd.f32 %v1937_v39, %v1875_v20  ;;  %v5783_v20 = vld [vmem:[%s7497_s5 + $0x310] ss:$8 sps:$4 sm:$0xff]  }
 0x291   : > { %v1939_v45 = vpop.f32.mrf.mxu1  ;;  %v1881_v50 = vadd.f32 %v1880_v44, %v1447_v15 }
 0x292   : > { %6051 = vpow2.f32 %v4860_v42  ;;  %v1940_v46 = vadd.f32 %v1939_v45, %v1877_v41  ;;  %v1884_v47 = vpop.f32.mrf.mxu0 }
 0x293   : > { %v1941_v48 = vpop.f32.mrf.mxu1  ;;  %v1885_v33 = vadd.f32 %v1884_v47, %v1443_v49  ;;  %v5747_v47 = vld [vmem:[%s7497_s5 + $0x370] ss:$8 sps:$4 sm:$0xff]  }
 0x294   : > { %v4861_v51 = vmul.f32 -1.442695, %v1940_v46  ;;  %v1886_v52 = vpop.f32.mrf.mxu0  ;;  %v1942_v32 = vadd.f32 %v1941_v48, %v1879_v22  ;;  %v5791_v22 = vld [vmem:[%s7497_s5 + $0x304] ss:$8 sps:$4 sm:$0xff]  }
 0x295   : > { %v1943_v54 = vpop.f32.mrf.mxu1  ;;  %v1887_v58 = vadd.f32 %v1886_v52, %v1447_v15 }
 0x296   : > { %6053 = vpow2.f32 %v4861_v51  ;;  %v1944_v11 = vadd.f32 %v1943_v54, %v1881_v50  ;;  %v1888_v56 = vpop.f32.mrf.mxu0 }
 0x297   : > { %v1947_v57 = vpop.f32.mrf.mxu1  ;;  %v1889_v37 = vadd.f32 %v1888_v56, %v1443_v49  ;;  %v5755_v49 = vld [vmem:[%s7497_s5 + $0x364] ss:$8 sps:$4 sm:$0xff]  }
 0x298   : > { %v4862_v59 = vmul.f32 -1.442695, %v1944_v11  ;;  %v1890_v60 = vpop.f32.mrf.mxu0  ;;  %v1948_v41 = vadd.f32 %v1947_v57, %v1885_v33  ;;  %v5753_v11 = vld [vmem:[%s7497_s5 + $0x360] ss:$8 sps:$4 sm:$0xff]   ;;  %v5761_v57 = vld [vmem:[%s7497_s5 + $0x354] ss:$8 sps:$4 sm:$0xff]  }
 0x299   : > { %v1949_v61 = vpop.f32.mrf.mxu1  ;;  %v1891_v5 = vadd.f32 %v1890_v60, %v1447_v15  ;;  %v5759_v60 = vld [vmem:[%s7497_s5 + $0x350] ss:$8 sps:$4 sm:$0xff]  }
 0x29a   : > { %6055 = vpow2.f32 %v4862_v59  ;;  %v1950_v0 = vadd.f32 %v1949_v61, %v1887_v58  ;;  %v5795_v33 = vld [vmem:[%s7497_s5 + $0x3f0] ss:$8 sps:$4 sm:$0xff]  }
 0x29b   : > { %v6050_v1 = vpop.eup %6049  ;;  %v1951_v3 = vpop.f32.mrf.mxu1  ;;  %6057 = vtanh.f32 %v1928_v63  ;;  %v5767_v63 = vld [vmem:[%s7497_s5 + $0x344] ss:$8 sps:$4 sm:$0xff]  }
 0x29c   : > { %v1980_v4 = vadd.f32 1.0, %v6050_v1  ;;  %v4863_v6 = vmul.f32 -1.442695, %v1950_v0  ;;  %v1952_v45 = vadd.f32 %v1951_v3, %v1889_v37  ;;  %v5765_v1 = vld [vmem:[%s7497_s5 + $0x340] ss:$8 sps:$4 sm:$0xff]  }
 0x29d   : > { %v1953_v8 = vpop.f32.mrf.mxu1  ;;  %v5773_v3 = vld [vmem:[%s7497_s5 + $0x334] ss:$8 sps:$4 sm:$0xff]   ;;  %v5798_v37 = vld [vmem:[%s7497_s5 + $0x2d0] ss:$8 sps:$4 sm:$0xff]  }
 0x29e   : > { %v1954_v10 = vadd.f32 %v1953_v8, %v1891_v5  ;;  %6059 = vpow2.f32 %v4863_v6  ;;  %v5771_v8 = vld [vmem:[%s7497_s5 + $0x330] ss:$8 sps:$4 sm:$0xff]  }
 0x29f   : > { %v6052_v16 = vpop.eup %6051  ;;  %6061 = vrcp.f32 %v1980_v4 }
 0x2a0   : > { %v1981_v13 = vadd.f32 1.0, %v6052_v16  ;;  %v4864_v19 = vmul.f32 -1.442695, %v1954_v10  ;;  %6063 = vtanh.f32 %v1932_v7  ;;  %v5779_v16 = vld [vmem:[%s7497_s5 + $0x324] ss:$8 sps:$4 sm:$0xff]  }
 0x2a2   : > { %6065 = vrcp.f32 %v1981_v13  ;;  %v5777_v13 = vld [vmem:[%s7497_s5 + $0x320] ss:$8 sps:$4 sm:$0xff]  }
 0x2a3   : > { %v6054_v18 = vpop.eup %6053  ;;  %6067 = vpow2.f32 %v4864_v19  ;;  %v5785_v19 = vld [vmem:[%s7497_s5 + $0x314] ss:$8 sps:$4 sm:$0xff]  }
 0x2a4   : > { %v1982_v17 = vadd.f32 1.0, %v6054_v18  ;;  %6069 = vtanh.f32 %v1938_v23  ;;  %v5788_v18 = vld [vmem:[%s7497_s5 + $0x2f4] ss:$8 sps:$4 sm:$0xff]   ;;  %v5786_v23 = vld [vmem:[%s7497_s5 + $0x2f0] ss:$8 sps:$4 sm:$0xff]  }
 0x2a5   : > { %2800 = vmatprep.subr.bf16.mxu1 %v5788_v18 }
 0x2a6   : > { %6071 = vrcp.f32 %v1982_v17  ;;  %v5789_v17 = vld [vmem:[%s7497_s5 + $0x300] ss:$8 sps:$4 sm:$0xff]   ;;  %2801 = vmatpush2.bf16.msra.mxu1 %v5786_v23 }
 0x2a7   : > { %v6056_v15 = vpop.eup %6055  ;;  %6073 = vtanh.f32 %v1942_v32  ;;  %v5794_v32 = vld [vmem:[%s7497_s5 + $0x2e4] ss:$8 sps:$4 sm:$0xff]  }
 0x2a8   : > { %v1983_v31 = vadd.f32 1.0, %v6056_v15  ;;  %v6058_v35 = vpop.eup %6057  ;;  %v5797_v15 = vld [vmem:[%s7497_s5 + $0x3f4] ss:$8 sps:$4 sm:$0xff]   ;;  %2802 = vmatprep.subr.bf16.mxu1 %v5794_v32 }
 0x2aa   : > { %6075 = vrcp.f32 %v1983_v31  ;;  %v5792_v31 = vld [vmem:[%s7497_s5 + $0x2e0] ss:$8 sps:$4 sm:$0xff]  }
 0x2ab   : > { %v6060_v36 = vpop.eup %6059  ;;  %6077 = vtanh.f32 %v1948_v41  ;;  %2803 = vmatpush2.bf16.msra.mxu1 %v5792_v31  ;;  %v5801_v41 = vld [vmem:[%s7497_s5 + $0x3e0] ss:$8 sps:$4 sm:$0xff]  }
 0x2ac   : > { %v6062_v24 = vpop.eup %6061  ;;  %v1984_v42 = vadd.f32 1.0, %v6060_v36  ;;  %v5803_v36 = vld [vmem:[%s7497_s5 + $0x3e4] ss:$8 sps:$4 sm:$0xff]  }
 0x2ad   : > { %v6064_v44 = vpop.eup %6063  ;;  %v1998_v46 = vmul.f32 %v6062_v24, %v6058_v35  ;;  %v5800_v35 = vld [vmem:[%s7497_s5 + $0x2d4] ss:$8 sps:$4 sm:$0xff]   ;;  %v5806_v24 = vld [vmem:[%s7497_s5 + $0x2c4] ss:$8 sps:$4 sm:$0xff]  }
 0x2ae   : > { %6079 = vrcp.f32 %v1984_v42  ;;  %2804 = vmatprep.subr.bf16.mxu1 %v5800_v35  ;;  %v5809_v42 = vld [vmem:[%s7497_s5 + $0x3d4] ss:$8 sps:$4 sm:$0xff]  }
 0x2af   : > { %v6066_v38 = vpop.eup %6065  ;;  %6081 = vtanh.f32 %v1952_v45  ;;  %2805 = vmatpush2.bf16.msra.mxu1 %v5798_v37  ;;  %v5807_v45 = vld [vmem:[%s7497_s5 + $0x3d0] ss:$8 sps:$4 sm:$0xff]  }
 0x2b0   : > { %v6068_v39 = vpop.eup %6067  ;;  %v1999_v48 = vmul.f32 %v6066_v38, %v6064_v44  ;;  %v5804_v44 = vld [vmem:[%s7497_s5 + $0x2c0] ss:$8 sps:$4 sm:$0xff]   ;;  %2806 = vmatprep.subr.bf16.mxu1 %v5806_v24  ;;  %v5812_v38 = vld [vmem:[%s7497_s5 + $0x2b4] ss:$8 sps:$4 sm:$0xff]  }
 0x2b1   : > { %v1985_v50 = vadd.f32 1.0, %v6068_v39  ;;  %v6070_v52 = vpop.eup %6069  ;;  %v5815_v39 = vld [vmem:[%s7497_s5 + $0x3c4] ss:$8 sps:$4 sm:$0xff]  }
 0x2b2   : > { %v2004_v51 = vpack.c.bf16 %v1999_v48, %v1998_v46  ;;  %v5810_v46 = vld [vmem:[%s7497_s5 + $0x2b0] ss:$8 sps:$4 sm:$0xff]   ;;  %v5813_v48 = vld [vmem:[%s7497_s5 + $0x3c0] ss:$8 sps:$4 sm:$0xff]  }
 0x2b3   : > { %6083 = vrcp.f32 %v1985_v50  ;;  %v6072_v54 = vpop.eup %6071  ;;  %2807 = vmatpush2.bf16.msra.mxu1 %v5804_v44  ;;  %v5818_v50 = vld [vmem:[%s7497_s5 + $0x2a4] ss:$8 sps:$4 sm:$0xff]  }
 0x2b4   : > { %2148 = vmatmul.mubr.bf16.vlgmr.msra.gmra.mxu0 %v2004_v51  ;;  %v6074_v56 = vpop.eup %6073  ;;  %v2000_v58 = vmul.f32 %v6072_v54, %v6070_v52  ;;  %2808 = vmatprep.subr.bf16.mxu1 %v5812_v38  ;;  %v5816_v51 = vld [vmem:[%s7497_s5 + $0x2a0] ss:$8 sps:$4 sm:$0xff]   ;;  %v5824_v52 = vld [vmem:[%s7497_s5 + $0x294] ss:$8 sps:$4 sm:$0xff]   ;;  %v5827_v54 = vld [vmem:[%s7497_s5 + $0x3a4] ss:$8 sps:$4 sm:$0xff]  }
 0x2b5   : > { %2156 = vmatprep.mubr.bf16.mxu0 %v6422_v55  ;;  %2848 = vmatpush1.bf16.msra.mxu0 %v5747_v47  ;;  %v5821_v47 = vld [vmem:[%s7497_s5 + $0x3b4] ss:$8 sps:$4 sm:$0xff]  }
 0x2b6   : > { %2849 = vmatprep.subr.bf16.mxu0 %v5755_v49  ;;  %v5819_v49 = vld [vmem:[%s7497_s5 + $0x3b0] ss:$8 sps:$4 sm:$0xff]  }
 0x2b7   : > { %v6076_v12 = vpop.eup %6075  ;;  %2809 = vmatpush2.bf16.msra.mxu1 %v5810_v46 }
 0x2b8   : > { %v2001_v59 = vmul.f32 %v6076_v12, %v6074_v56  ;;  %v6078_v0 = vpop.eup %6077  ;;  %2810 = vmatprep.subr.bf16.mxu1 %v5818_v50  ;;  %v5825_v56 = vld [vmem:[%s7497_s5 + $0x3a0] ss:$8 sps:$4 sm:$0xff]   ;;  %v5833_v12 = vld [vmem:[%s7497_s5 + $0x394] ss:$8 sps:$4 sm:$0xff]  }
 0x2b9   : > { %2850 = vmatpush1.bf16.msra.mxu0 %v5753_v11  ;;  %v5822_v11 = vld [vmem:[%s7497_s5 + $0x290] ss:$8 sps:$4 sm:$0xff]  }
 0x2ba   : > { %v2005_v61 = vpack.c.bf16 %v2001_v59, %v2000_v58  ;;  %2851 = vmatprep.subr.bf16.mxu0 %v5761_v57  ;;  %v5830_v57 = vld [vmem:[%s7497_s5 + $0x284] ss:$8 sps:$4 sm:$0xff]   ;;  %v5828_v58 = vld [vmem:[%s7497_s5 + $0x280] ss:$8 sps:$4 sm:$0xff]   ;;  %v5831_v59 = vld [vmem:[%s7497_s5 + $0x390] ss:$8 sps:$4 sm:$0xff]  }
 0x2bb   : > { %v6080_v2 = vpop.eup %6079  ;;  %2811 = vmatpush2.bf16.msra.mxu1 %v5816_v51 }
 0x2bc   : > { %2157 = vmatmul.mubr.bf16.gmra.mxu0 %v2005_v61  ;;  %v6082_v4 = vpop.eup %6081  ;;  %v2002_v6 = vmul.f32 %v6080_v2, %v6078_v0  ;;  %2812 = vmatprep.subr.bf16.mxu1 %v5824_v52  ;;  %v5837_v61 = vld [vmem:[%s7497_s5 + $0x380] ss:$8 sps:$4 sm:$0xff]  }
 0x2bd   : > { %2166 = vmatprep.mubr.bf16.mxu0 %v6422_v55  ;;  %2852 = vmatpush1.bf16.msra.mxu0 %v5759_v60  ;;  %v5839_v60 = vld [vmem:[%s7497_s5 + $0x384] ss:$8 sps:$4 sm:$0xff]  }
 0x2be   : > { %2853 = vmatprep.subr.bf16.mxu0 %v5767_v63  ;;  %v7143_v63 = vld [vmem:[#allocation13] sm:$0x3] }
 0x2bf   : > { %2813 = vmatpush2.bf16.msra.mxu1 %v5822_v11  ;;  %v2028_v0 = vrot.slane %v7143_v63, %v6997_v40 }
 0x2c0   : > { %v6084_v5 = vpop.eup %6083  ;;  %2814 = vmatprep.subr.bf16.mxu1 %v5830_v57 }
 0x2c1   : > { %v2003_v7 = vmul.f32 %v6084_v5, %v6082_v4  ;;  %2854 = vmatpush1.bf16.msra.mxu0 %v5765_v1 }
 0x2c2   : > { %2855 = vmatprep.subr.bf16.mxu0 %v5773_v3 }
 0x2c3   : > { %v2006_v10 = vpack.c.bf16 %v2003_v7, %v2002_v6  ;;  %2815 = vmatpush2.bf16.msra.mxu1 %v5828_v58 }
 0x2c5   : > { %2167 = vmatmul.mubr.bf16.gmra.mxu0 %v2006_v10 }
 0x2c6   : > { %2856 = vmatpush1.bf16.msra.mxu0 %v5771_v8 }
 0x2c7   : > { %2857 = vmatprep.subr.bf16.mxu0 %v5779_v16 }
 0x2ca   : > { %2858 = vmatpush1.bf16.msra.mxu0 %v5777_v13 }
 0x2cb   : > { %2859 = vmatprep.subr.bf16.mxu0 %v5785_v19 }
 0x2ce   : > { %2860 = vmatpush1.bf16.msra.mxu0 %v5783_v20 }
 0x2cf   : > { %2861 = vmatprep.subr.bf16.mxu0 %v5791_v22 }
 0x2d2   : > { %2862 = vmatpush1.bf16.msra.mxu0 %v5789_v17 }
 0x2d3   : > { %2863 = vmatprep.subr.bf16.mxu0 %v5797_v15 }
 0x2d6   : > { %2864 = vmatpush2.bf16.msra.mxu0 %v5795_v33 }
 0x2d7   : > { %2865 = vmatprep.subr.bf16.mxu0 %v5803_v36 }
 0x2da   : > { %2866 = vmatpush2.bf16.msra.mxu0 %v5801_v41 }
 0x2db   : > { %2867 = vmatprep.subr.bf16.mxu0 %v5809_v42 }
 0x2de   : > { %2868 = vmatpush2.bf16.msra.mxu0 %v5807_v45 }
 0x2df   : > { %2869 = vmatprep.subr.bf16.mxu0 %v5815_v39 }
 0x2e2   : > { %2870 = vmatpush2.bf16.msra.mxu0 %v5813_v48 }
 0x2e3   : > { %2871 = vmatprep.subr.bf16.mxu0 %v5821_v47 }
 0x2e6   : > { %2872 = vmatpush2.bf16.msra.mxu0 %v5819_v49 }
 0x2e7   : > { %2873 = vmatprep.subr.bf16.mxu0 %v5827_v54 }
 0x2ea   : > { %2874 = vmatpush2.bf16.msra.mxu0 %v5825_v56 }
 0x2eb   : > { %2875 = vmatprep.subr.bf16.mxu0 %v5833_v12 }
 0x2ee   : > { %2876 = vmatpush2.bf16.msra.mxu0 %v5831_v59 }
 0x2ef   : > { %2877 = vmatprep.subr.bf16.mxu0 %v5839_v60 }
 0x2f2   : > { %2878 = vmatpush2.bf16.msra.mxu0 %v5837_v61 }
 0x374   : > { %v2149_v1 = vpop.f32.mrf.mxu0 }
 0x375   : > { %v2150_v2 = vadd.f32 %v2149_v1, %v2028_v0 }
 0x376   : > { %v2151_v3 = vpop.f32.mrf.mxu0 }
 0x377   : > { %v2176_v4 = vadd.f32 %v2150_v2, %v6905_v14 }
 0x378   : > { %v2152_v5 = vpop.f32.mrf.mxu0 }
 0x379   : > { %v2182_v6 = vmul.f32 0.70710677, %v2176_v4  ;;  %v2153_v7 = vadd.f32 %v2152_v5, %v2028_v0 }
 0x37a   : > { %v7148_v8 = vpop.f32.mrf.mxu0 }
 0x37b   : > { %v7151_v10 = vmul.f32 %v6681_v25, %v2182_v6  ;;  %v2177_v16 = vadd.f32 %v2153_v7, %v6911_v21 }
 0x37c   : > { %v2158_v13 = vpop.f32.mrf.mxu0 }
 0x37d   : > { %2206 = vst [vmem:[#allocation5 + $0x8] sm:$0xff] %v7151_v10  ;;  %v5312_v19 = vpack.c.bf16 %v7151_v10, %v7151_v10  ;;  %v2183_v20 = vmul.f32 0.70710677, %v2177_v16  ;;  %v2159_v18 = vadd.f32 %v2158_v13, %v2028_v0  ;;  %v5842_v16 = vld [vmem:[#allocation6 + $0xc] ss:$16 sps:$4 sm:$0xff]  }
 0x37e   : > { %v7157_v22 = vpop.f32.mrf.mxu0  ;;  %2879 = vmatprep.mubr.bf16.mxu0 %v5842_v16  ;;  %v5908_v16 = vld [vmem:[%s7497_s5 + $0x424] ss:$8 sps:$4 sm:$0xff]  }
 0x37f   : > { %2272 = vst [vmem:[#allocation6 + $0x4] sm:$0xf] %v5312_v19  ;;  %v7160_v14 = vmul.f32 %v6684_v26, %v2183_v20  ;;  %v2178_v23 = vadd.f32 %v2159_v18, %v6917_v34 }
 0x380   : > { %v2162_v17 = vpop.f32.mrf.mxu0 }
 0x381   : > { %2207 = vst [vmem:[#allocation5 + $0x10] sm:$0xff] %v7160_v14  ;;  %v5313_v21 = vpack.c.bf16 %v7160_v14, %v7160_v14  ;;  %v2184_v32 = vmul.f32 0.70710677, %v2178_v23  ;;  %v2163_v15 = vadd.f32 %v2162_v17, %v2028_v0 }
 0x382   : > { %v7166_v31 = vpop.f32.mrf.mxu0 }
 0x383   : > { %2273 = vst [vmem:[#allocation6 + $0x14] sm:$0xf] %v5313_v21  ;;  %v7169_v33 = vmul.f32 %v6687_v27, %v2184_v32  ;;  %v2179_v35 = vadd.f32 %v2163_v15, %v6923_v43 }
 0x384   : > { %v2212_v36 = vld [vmem:[#allocation5 + $0x6] sm:$0xff] }
 0x385   : > { %2208 = vst [vmem:[#allocation5 + $0x18] sm:$0xff] %v7169_v33  ;;  %v5314_v34 = vpack.c.bf16 %v7169_v33, %v7169_v33  ;;  %v2185_v37 = vmul.f32 0.70710677, %v2179_v35  ;;  %v2168_v41 = vpop.f32.mrf.mxu0  ;;  %v5306_v24 = vpack.c.bf16 %v2212_v36, %v2212_v36  ;;  %v5846_v36 = vld [vmem:[#allocation6 + $0x2c] ss:$16 sps:$4 sm:$0xff]  }
 0x386   : > { %v2169_v42 = vadd.f32 %v2168_v41, %v2028_v0  ;;  %v5851_v41 = vld [vmem:[#allocation6 + $0x4c] ss:$16 sps:$4 sm:$0xff]  }
 0x387   : > { %2274 = vst [vmem:[#allocation6 + $0x24] sm:$0xf] %v5314_v34  ;;  %v7176_v44 = vmul.f32 %v6690_v28, %v2185_v37  ;;  %v7178_v45 = vpop.f32.mrf.mxu0  ;;  %2242 = vst [vmem:[#allocation6] sm:$0xf] %v5306_v24 }
 0x388   : > { %v2180_v38 = vadd.f32 %v2169_v42, %v6929_v53  ;;  %v2213_v43 = vld [vmem:[#allocation5 + $0xe] sm:$0xff] }
 0x389   : > { %v2278_v39 = vld [vmem:[#allocation5 + $0xa] sm:$0xff]  ;;  %2209 = vst [vmem:[#allocation5 + $0x20] sm:$0xff] %v7176_v44  ;;  %v5315_v46 = vpack.c.bf16 %v7176_v44, %v7176_v44  ;;  %v2172_v48 = vpop.f32.mrf.mxu0  ;;  %v5307_v50 = vpack.c.bf16 %v2213_v43, %v2213_v43  ;;  %v5855_v43 = vld [vmem:[#allocation12 + $0xf0] ss:$8 sps:$4 sm:$0xff]  }
 0x38a   : > { %v5318_v47 = vpack.c.bf16 %v2278_v39, %v2278_v39  ;;  %v2186_v51 = vmul.f32 0.70710677, %v2180_v38  ;;  %v2173_v49 = vadd.f32 %v2172_v48, %v2028_v0  ;;  %v5834_v3 = vld [vmem:[#allocation6 + $0x4] ss:$16 sps:$4 sm:$0xff]  }
 0x38b   : > { %2275 = vst [vmem:[#allocation6 + $0x34] sm:$0xf] %v5315_v46  ;;  %v2174_v52 = vpop.f32.mrf.mxu0  ;;  %2243 = vst [vmem:[#allocation6 + $0x10] sm:$0xf] %v5307_v50  ;;  %2816 = vmatprep.mubr.bf16.mxu1 %v5834_v3  ;;  %v5857_v38 = vld [vmem:[#allocation12 + $0xf4] ss:$8 sps:$4 sm:$0xff]  }
 0x38c   : > { %2308 = vst [vmem:[#allocation6 + $0x8] sm:$0xf] %v5318_v47  ;;  %v7185_v54 = vmul.f32 %v6693_v29, %v2186_v51  ;;  %v2181_v53 = vadd.f32 %v2173_v49, %v6935_v62  ;;  %v2279_v11 = vld [vmem:[#allocation5 + $0x12] sm:$0xff]  ;;  %3071 = vmatprep.subr.bf16.mxu1 %v5857_v38  ;;  %v5858_v46 = vld [vmem:[#allocation12 + $0xe0] ss:$8 sps:$4 sm:$0xff]  }
 0x38d   : > { %v2214_v56 = vld [vmem:[#allocation5 + $0x16] sm:$0xff]  ;;  %v5319_v57 = vpack.c.bf16 %v2279_v11, %v2279_v11  ;;  %v5860_v39 = vld [vmem:[#allocation12 + $0xe4] ss:$8 sps:$4 sm:$0xff]   ;;  %v5864_v51 = vld [vmem:[#allocation12 + $0xc0] ss:$8 sps:$4 sm:$0xff]  }
 0x38e   : > { %v5308_v12 = vpack.c.bf16 %v2214_v56, %v2214_v56  ;;  %2210 = vst [vmem:[#allocation5 + $0x28] sm:$0xff] %v7185_v54  ;;  %v5316_v58 = vpack.c.bf16 %v7185_v54, %v7185_v54  ;;  %v2187_v59 = vmul.f32 0.70710677, %v2181_v53  ;;  %v5863_v48 = vld [vmem:[#allocation12 + $0xd4] ss:$8 sps:$4 sm:$0xff]  }
 0x38f   : > { %2309 = vst [vmem:[#allocation6 + $0x18] sm:$0xf] %v5319_v57  ;;  %v5861_v50 = vld [vmem:[#allocation12 + $0xd0] ss:$8 sps:$4 sm:$0xff]   ;;  %v5866_v47 = vld [vmem:[#allocation12 + $0xc4] ss:$8 sps:$4 sm:$0xff]  }
 0x390   : > { %2244 = vst [vmem:[#allocation6 + $0x20] sm:$0xf] %v5308_v12  ;;  %2276 = vst [vmem:[#allocation6 + $0x44] sm:$0xf] %v5316_v58  ;;  %v7192_v60 = vmul.f32 %v6696_v30, %v2187_v59  ;;  %v2215_v61 = vld [vmem:[#allocation5 + $0x1e] sm:$0xff] }
 0x391   : > { %v2280_v0 = vld [vmem:[#allocation5 + $0x1a] sm:$0xff]  ;;  %v5309_v1 = vpack.c.bf16 %v2215_v61, %v2215_v61  ;;  %v5872_v53 = vld [vmem:[#allocation12 + $0xa4] ss:$8 sps:$4 sm:$0xff]   ;;  %v5870_v11 = vld [vmem:[#allocation12 + $0xa0] ss:$8 sps:$4 sm:$0xff]  }
 0x392   : > { %v5320_v62 = vpack.c.bf16 %v2280_v0, %v2280_v0  ;;  %2211 = vst [vmem:[#allocation5 + $0x30] sm:$0xff] %v7192_v60  ;;  %v5317_v2 = vpack.c.bf16 %v7192_v60, %v7192_v60  ;;  %v5836_v4 = vld [vmem:[#allocation6] ss:$16 sps:$4 sm:$0xff]   ;;  %v5843_v17 = vld [vmem:[#allocation6 + $0x24] ss:$16 sps:$4 sm:$0xff]  }
 0x393   : > { %2245 = vst [vmem:[#allocation6 + $0x30] sm:$0xf] %v5309_v1  ;;  %2817 = vmatmul.mubr.bf16.vlgmr.msra.gmra.mxu1 %v5836_v4  ;;  %v5869_v49 = vld [vmem:[#allocation12 + $0xb4] ss:$8 sps:$4 sm:$0xff]   ;;  %v5867_v52 = vld [vmem:[#allocation12 + $0xb0] ss:$8 sps:$4 sm:$0xff]  }
 0x394   : > { %2310 = vst [vmem:[#allocation6 + $0x28] sm:$0xf] %v5320_v62  ;;  %2277 = vst [vmem:[#allocation6 + $0x54] sm:$0xf] %v5317_v2  ;;  %2826 = vmatprep.mubr.bf16.mxu1 %v5843_v17  ;;  %3072 = vmatpush1.bf16.msra.mxu1 %v5855_v43  ;;  %v5875_v56 = vld [vmem:[#allocation12 + $0x94] ss:$8 sps:$4 sm:$0xff]  }
 0x395   : > { %v2281_v5 = vld [vmem:[#allocation5 + $0x22] sm:$0xff]  ;;  %3073 = vmatprep.subr.bf16.mxu1 %v5860_v39  ;;  %v5873_v57 = vld [vmem:[#allocation12 + $0x90] ss:$8 sps:$4 sm:$0xff]   ;;  %v5878_v12 = vld [vmem:[#allocation12 + $0x84] ss:$8 sps:$4 sm:$0xff]  }
 0x396   : > { %v2216_v6 = vld [vmem:[#allocation5 + $0x26] sm:$0xff]  ;;  %v5321_v13 = vpack.c.bf16 %v2281_v5, %v2281_v5  ;;  %v5884_v0 = vld [vmem:[%s7497_s5 + $0x464] ss:$8 sps:$4 sm:$0xff]   ;;  %v5882_v62 = vld [vmem:[%s7497_s5 + $0x460] ss:$8 sps:$4 sm:$0xff]  }
 0x397   : > { %v5840_v7 = vld [vmem:[#allocation6 + $0x8] ss:$16 sps:$4 sm:$0xff]   ;;  %v5310_v19 = vpack.c.bf16 %v2216_v6, %v2216_v6  ;;  %v5881_v61 = vld [vmem:[%s7497_s5 + $0x474] ss:$8 sps:$4 sm:$0xff]   ;;  %v5896_v4 = vld [vmem:[%s7497_s5 + $0x444] ss:$8 sps:$4 sm:$0xff]  }
 0x398   : > { %2311 = vst [vmem:[#allocation6 + $0x38] sm:$0xf] %v5321_v13  ;;  %2880 = vmatmul.mubr.bf16.vlgmr.msra.gmra.mxu0 %v5840_v7  ;;  %3074 = vmatpush1.bf16.msra.mxu1 %v5858_v46  ;;  %v5876_v58 = vld [vmem:[#allocation12 + $0x80] ss:$8 sps:$4 sm:$0xff]   ;;  %v2392_v17 = vld [vmem:[#allocation10 + $0x2] sm:$0x3] }
 0x399   : > { %2246 = vst [vmem:[#allocation6 + $0x40] sm:$0xf] %v5310_v19  ;;  %v2217_v20 = vld [vmem:[#allocation5 + $0x2e] sm:$0xff]  ;;  %2889 = vmatprep.mubr.bf16.mxu0 %v5846_v36  ;;  %3075 = vmatprep.subr.bf16.mxu1 %v5863_v48  ;;  %v5879_v59 = vld [vmem:[%s7497_s5 + $0x470] ss:$8 sps:$4 sm:$0xff]  }
 0x39a   : > { %v2282_v18 = vld [vmem:[#allocation5 + $0x2a] sm:$0xff]  ;;  %v2283_v23 = vld [vmem:[#allocation5 + $0x32] sm:$0xff]  ;;  %v5311_v32 = vpack.c.bf16 %v2217_v20, %v2217_v20  ;;  %3740 = vmatprep.subr.bf16.mxu0 %v5881_v61 }
 0x39b   : > { %v5845_v21 = vld [vmem:[#allocation6 + $0x20] ss:$16 sps:$4 sm:$0xff]   ;;  %v5322_v15 = vpack.c.bf16 %v2282_v18, %v2282_v18  ;;  %v5323_v35 = vpack.c.bf16 %v2283_v23, %v2283_v23  ;;  %v5849_v37 = vld [vmem:[#allocation6 + $0x44] ss:$16 sps:$4 sm:$0xff]   ;;  %3741 = vmatpush1.bf16.msra.mxu0 %v5879_v59 }
 0x39c   : > { %2247 = vst [vmem:[#allocation6 + $0x50] sm:$0xf] %v5311_v32  ;;  %2827 = vmatmul.mubr.bf16.gmra.mxu1 %v5845_v21  ;;  %v5887_v1 = vld [vmem:[%s7497_s5 + $0x574] ss:$8 sps:$4 sm:$0xff]   ;;  %3742 = vmatprep.subr.bf16.mxu0 %v5884_v0  ;;  %v5888_v3 = vld [vmem:[%s7497_s5 + $0x450] ss:$8 sps:$4 sm:$0xff]   ;;  %v2401_v32 = vrot.slane %v2392_v17, %v6993_v9 }
 0x39d   : > { %2312 = vst [vmem:[#allocation6 + $0x48] sm:$0xf] %v5322_v15  ;;  %2313 = vst [vmem:[#allocation6 + $0x58] sm:$0xf] %v5323_v35  ;;  %2836 = vmatprep.mubr.bf16.mxu1 %v5849_v37  ;;  %3076 = vmatpush1.bf16.msra.mxu1 %v5861_v50  ;;  %v5890_v2 = vld [vmem:[%s7497_s5 + $0x454] ss:$8 sps:$4 sm:$0xff]  }
 0x39e   : > { %3077 = vmatprep.subr.bf16.mxu1 %v5866_v47  ;;  %v5894_v5 = vld [vmem:[%s7497_s5 + $0x440] ss:$8 sps:$4 sm:$0xff]   ;;  %v5902_v6 = vld [vmem:[%s7497_s5 + $0x434] ss:$8 sps:$4 sm:$0xff]   ;;  %v5900_v7 = vld [vmem:[%s7497_s5 + $0x430] ss:$8 sps:$4 sm:$0xff]  }
 0x39f   : > { %v5848_v34 = vld [vmem:[#allocation6 + $0x28] ss:$16 sps:$4 sm:$0xff]   ;;  %3743 = vmatpush1.bf16.msra.mxu0 %v5882_v62  ;;  %v5914_v19 = vld [vmem:[%s7497_s5 + $0x414] ss:$8 sps:$4 sm:$0xff]   ;;  %v5920_v18 = vld [vmem:[%s7497_s5 + $0x404] ss:$8 sps:$4 sm:$0xff]  }
 0x3a0   : > { %2890 = vmatmul.mubr.bf16.gmra.mxu0 %v5848_v34  ;;  %3744 = vmatprep.subr.bf16.mxu0 %v5890_v2  ;;  %v5906_v13 = vld [vmem:[%s7497_s5 + $0x420] ss:$8 sps:$4 sm:$0xff]   ;;  %v5912_v20 = vld [vmem:[%s7497_s5 + $0x410] ss:$8 sps:$4 sm:$0xff]  }
 0x3a1   : > { %2899 = vmatprep.mubr.bf16.mxu0 %v5851_v41  ;;  %3078 = vmatpush1.bf16.msra.mxu1 %v5864_v51  ;;  %v5918_v23 = vld [vmem:[%s7497_s5 + $0x400] ss:$8 sps:$4 sm:$0xff]  }
 0x3a2   : > { %3079 = vmatprep.subr.bf16.mxu1 %v5869_v49 }
 0x3a3   : > { %v5853_v24 = vld [vmem:[#allocation6 + $0x40] ss:$16 sps:$4 sm:$0xff]   ;;  %3745 = vmatpush1.bf16.msra.mxu0 %v5888_v3 }
 0x3a4   : > { %2837 = vmatmul.mubr.bf16.gmra.mxu1 %v5853_v24  ;;  %v5854_v42 = vld [vmem:[#allocation6 + $0x48] ss:$16 sps:$4 sm:$0xff]   ;;  %3746 = vmatprep.subr.bf16.mxu0 %v5896_v4 }
 0x3a5   : > { %3103 = vmatprep.mubr.bf16.mxu1 %v6422_v55  ;;  %3080 = vmatpush1.bf16.msra.mxu1 %v5867_v52 }
 0x3a6   : > { %3081 = vmatprep.subr.bf16.mxu1 %v5872_v53 }
 0x3a7   : > { %3747 = vmatpush1.bf16.msra.mxu0 %v5894_v5 }
 0x3a8   : > { %2900 = vmatmul.mubr.bf16.gmra.mxu0 %v5854_v42  ;;  %3748 = vmatprep.subr.bf16.mxu0 %v5902_v6 }
 0x3a9   : > { %3082 = vmatpush1.bf16.msra.mxu1 %v5870_v11 }
 0x3aa   : > { %3083 = vmatprep.subr.bf16.mxu1 %v5875_v56 }
 0x3ab   : > { %3749 = vmatpush1.bf16.msra.mxu0 %v5900_v7 }
 0x3ac   : > { %3750 = vmatprep.subr.bf16.mxu0 %v5908_v16 }
 0x3ad   : > { %3084 = vmatpush1.bf16.msra.mxu1 %v5873_v57  ;;  %v2397_v57 = vrot.slane %v2392_v17, %v6997_v40 }
 0x3ae   : > { %3085 = vmatprep.subr.bf16.mxu1 %v5878_v12 }
 0x3af   : > { %3751 = vmatpush1.bf16.msra.mxu0 %v5906_v13 }
 0x3b0   : > { %3752 = vmatprep.subr.bf16.mxu0 %v5914_v19 }
 0x3b1   : > { %3086 = vmatpush1.bf16.msra.mxu1 %v5876_v58 }
 0x3b2   : > { %3803 = vmatprep.subr.bf16.mxu1 %v5887_v1 }
 0x3b3   : > { %3753 = vmatpush1.bf16.msra.mxu0 %v5912_v20 }
 0x3b4   : > { %3754 = vmatprep.subr.bf16.mxu0 %v5920_v18 }
 0x3b7   : > { %3755 = vmatpush1.bf16.msra.mxu0 %v5918_v23 }
 0x453   : > { %v2818_v21 = vpop.f32.mrf.mxu1 }
 0x454   : > { %v2819_v2 = vadd.f32 %v2818_v21, %v2397_v57 }
 0x455   : > { %v2820_v15 = vpop.f32.mrf.mxu1 }
 0x456   : > { %v2821_v34 = vadd.f32 %v2820_v15, %v2401_v32 }
 0x457   : > { %v2822_v35 = vpop.f32.mrf.mxu1 }
 0x458   : > { %v2881_v36 = vpop.f32.mrf.mxu0  ;;  %v2823_v20 = vadd.f32 %v2822_v35, %v2397_v57 }
 0x459   : > { %v2824_v37 = vpop.f32.mrf.mxu1  ;;  %v2882_v7 = vadd.f32 %v2881_v36, %v2819_v2 }
 0x45a   : > { %v2883_v41 = vpop.f32.mrf.mxu0  ;;  %v2825_v43 = vadd.f32 %v2824_v37, %v2401_v32 }
 0x45b   : > { %v2884_v24 = vadd.f32 %v2883_v41, %v2821_v34 }
 0x45c   : > { %v2828_v42 = vpop.f32.mrf.mxu1  ;;  %v2885_v38 = vpop.f32.mrf.mxu0 }
 0x45d   : > { %v5039_v39 = vmul.f32 -1.442695, %v2884_v24  ;;  %v2886_v15 = vadd.f32 %v2885_v38, %v2823_v20 }
 0x45e   : > { %v2830_v46 = vpop.f32.mrf.mxu1  ;;  %v2887_v48 = vpop.f32.mrf.mxu0 }
 0x45f   : > { %6085 = vpow2.f32 %v5039_v39  ;;  %v2888_v50 = vadd.f32 %v2887_v48, %v2825_v43  ;;  %v2831_v52 = vadd.f32 %v2830_v46, %v2401_v32  ;;  %v2829_v39 = vadd.f32 %v2828_v42, %v2397_v57 }
 0x460   : > { %v2832_v47 = vpop.f32.mrf.mxu1  ;;  %v2891_v49 = vpop.f32.mrf.mxu0 }
 0x461   : > { %v5040_v51 = vmul.f32 -1.442695, %v2888_v50  ;;  %v2833_v46 = vadd.f32 %v2832_v47, %v2397_v57  ;;  %v2892_v48 = vadd.f32 %v2891_v49, %v2829_v39  ;;  %v5909_v39 = vld [vmem:[%s7497_s5 + $0x530] ss:$8 sps:$4 sm:$0xff]  }
 0x462   : > { %v2834_v53 = vpop.f32.mrf.mxu1  ;;  %v2893_v11 = vpop.f32.mrf.mxu0 }
 0x463   : > { %6087 = vpow2.f32 %v5040_v51  ;;  %v2894_v56 = vadd.f32 %v2893_v11, %v2831_v52  ;;  %v2835_v59 = vadd.f32 %v2834_v53, %v2401_v32 }
 0x464   : > { %v2838_v12 = vpop.f32.mrf.mxu1  ;;  %v2895_v58 = vpop.f32.mrf.mxu0 }
 0x465   : > { %v5041_v61 = vmul.f32 -1.442695, %v2894_v56  ;;  %v2896_v51 = vadd.f32 %v2895_v58, %v2833_v46  ;;  %v2839_v52 = vadd.f32 %v2838_v12, %v2397_v57  ;;  %v5885_v12 = vld [vmem:[%s7497_s5 + $0x570] ss:$8 sps:$4 sm:$0xff]   ;;  %v5917_v46 = vld [vmem:[%s7497_s5 + $0x524] ss:$8 sps:$4 sm:$0xff]  }
 0x466   : > { %v2840_v0 = vpop.f32.mrf.mxu1  ;;  %v2897_v1 = vpop.f32.mrf.mxu0 }
 0x467   : > { %6089 = vpow2.f32 %v5041_v61  ;;  %v2898_v62 = vadd.f32 %v2897_v1, %v2835_v59  ;;  %v2841_v5 = vadd.f32 %v2840_v0, %v2401_v32 }
 0x468   : > { %v2842_v3 = vpop.f32.mrf.mxu1  ;;  %v2901_v4 = vpop.f32.mrf.mxu0 }
 0x469   : > { %v5042_v6 = vmul.f32 -1.442695, %v2898_v62  ;;  %v2843_v56 = vadd.f32 %v2842_v3, %v2397_v57  ;;  %v2902_v59 = vadd.f32 %v2901_v4, %v2839_v52  ;;  %v5893_v57 = vld [vmem:[%s7497_s5 + $0x564] ss:$8 sps:$4 sm:$0xff]   ;;  %v5891_v4 = vld [vmem:[%s7497_s5 + $0x560] ss:$8 sps:$4 sm:$0xff]  }
 0x46a   : > { %v2844_v16 = vpop.f32.mrf.mxu1  ;;  %v2903_v13 = vpop.f32.mrf.mxu0  ;;  %v5924_v52 = vld [vmem:[%s7497_s5 + $0x4f0] ss:$8 sps:$4 sm:$0xff]  }
 0x46b   : > { %6091 = vpow2.f32 %v5042_v6  ;;  %v2904_v18 = vadd.f32 %v2903_v13, %v2841_v5  ;;  %v2845_v34 = vadd.f32 %v2844_v16, %v2401_v32 }
 0x46c   : > { %v6086_v19 = vpop.eup %6085  ;;  %v2905_v17 = vpop.f32.mrf.mxu0  ;;  %6093 = vtanh.f32 %v2882_v7  ;;  %v5899_v7 = vld [vmem:[%s7497_s5 + $0x554] ss:$8 sps:$4 sm:$0xff]  }
 0x46d   : > { %v2934_v23 = vadd.f32 1.0, %v6086_v19  ;;  %v5043_v37 = vmul.f32 -1.442695, %v2904_v18  ;;  %v2906_v1 = vadd.f32 %v2905_v17, %v2843_v56  ;;  %v5897_v18 = vld [vmem:[%s7497_s5 + $0x550] ss:$8 sps:$4 sm:$0xff]  }
 0x46e   : > { %v2907_v41 = vpop.f32.mrf.mxu0  ;;  %v5905_v17 = vld [vmem:[%s7497_s5 + $0x544] ss:$8 sps:$4 sm:$0xff]   ;;  %v5935_v56 = vld [vmem:[%s7497_s5 + $0x5f4] ss:$8 sps:$4 sm:$0xff]  }
 0x46f   : > { %6095 = vpow2.f32 %v5043_v37  ;;  %v2908_v21 = vadd.f32 %v2907_v41, %v2845_v34  ;;  %v5903_v37 = vld [vmem:[%s7497_s5 + $0x540] ss:$8 sps:$4 sm:$0xff]  }
 0x470   : > { %v6088_v24 = vpop.eup %6087  ;;  %6097 = vrcp.f32 %v2934_v23 }
 0x471   : > { %v2935_v43 = vadd.f32 1.0, %v6088_v24  ;;  %6099 = vtanh.f32 %v2886_v15  ;;  %v5044_v36 = vmul.f32 -1.442695, %v2908_v21  ;;  %v5911_v24 = vld [vmem:[%s7497_s5 + $0x534] ss:$8 sps:$4 sm:$0xff]  }
 0x473   : > { %6101 = vrcp.f32 %v2935_v43 }
 0x474   : > { %6103 = vpow2.f32 %v5044_v36  ;;  %v6090_v35 = vpop.eup %6089 }
 0x475   : > { %v2936_v50 = vadd.f32 1.0, %v6090_v35  ;;  %6105 = vtanh.f32 %v2892_v48  ;;  %v5915_v48 = vld [vmem:[%s7497_s5 + $0x520] ss:$8 sps:$4 sm:$0xff]  }
 0x477   : > { %6107 = vrcp.f32 %v2936_v50  ;;  %v5923_v50 = vld [vmem:[%s7497_s5 + $0x514] ss:$8 sps:$4 sm:$0xff]  }
 0x478   : > { %v6092_v38 = vpop.eup %6091  ;;  %6109 = vtanh.f32 %v2896_v51  ;;  %v5921_v51 = vld [vmem:[%s7497_s5 + $0x510] ss:$8 sps:$4 sm:$0xff]  }
 0x479   : > { %v2937_v32 = vadd.f32 1.0, %v6092_v38  ;;  %v6094_v53 = vpop.eup %6093  ;;  %v5926_v38 = vld [vmem:[%s7497_s5 + $0x4f4] ss:$8 sps:$4 sm:$0xff]  }
 0x47a   : > { %3756 = vmatprep.subr.bf16.mxu0 %v5926_v38 }
 0x47b   : > { %6111 = vrcp.f32 %v2937_v32  ;;  %v5929_v32 = vld [vmem:[%s7497_s5 + $0x504] ss:$8 sps:$4 sm:$0xff]   ;;  %3757 = vmatpush2.bf16.msra.mxu0 %v5924_v52 }
 0x47c   : > { %v6096_v11 = vpop.eup %6095  ;;  %6113 = vtanh.f32 %v2902_v59  ;;  %v5930_v59 = vld [vmem:[%s7497_s5 + $0x4e0] ss:$8 sps:$4 sm:$0xff]  }
 0x47d   : > { %v6098_v61 = vpop.eup %6097  ;;  %v2938_v42 = vadd.f32 1.0, %v6096_v11  ;;  %v5932_v11 = vld [vmem:[%s7497_s5 + $0x4e4] ss:$8 sps:$4 sm:$0xff]  }
 0x47e   : > { %v6100_v0 = vpop.eup %6099  ;;  %v2952_v49 = vmul.f32 %v6098_v61, %v6094_v53  ;;  %v5927_v53 = vld [vmem:[%s7497_s5 + $0x500] ss:$8 sps:$4 sm:$0xff]   ;;  %v5933_v61 = vld [vmem:[%s7497_s5 + $0x5f0] ss:$8 sps:$4 sm:$0xff]   ;;  %3758 = vmatprep.subr.bf16.mxu0 %v5932_v11 }
 0x47f   : > { %6115 = vrcp.f32 %v2938_v42  ;;  %3759 = vmatpush2.bf16.msra.mxu0 %v5930_v59  ;;  %v5938_v42 = vld [vmem:[%s7497_s5 + $0x4d4] ss:$8 sps:$4 sm:$0xff]  }
 0x480   : > { %v6102_v62 = vpop.eup %6101  ;;  %6117 = vtanh.f32 %v2906_v1  ;;  %v5936_v1 = vld [vmem:[%s7497_s5 + $0x4d0] ss:$8 sps:$4 sm:$0xff]   ;;  %3760 = vmatprep.subr.bf16.mxu0 %v5938_v42 }
 0x481   : > { %v6104_v47 = vpop.eup %6103  ;;  %v2953_v58 = vmul.f32 %v6102_v62, %v6100_v0  ;;  %v5941_v0 = vld [vmem:[%s7497_s5 + $0x5e4] ss:$8 sps:$4 sm:$0xff]   ;;  %v5939_v62 = vld [vmem:[%s7497_s5 + $0x5e0] ss:$8 sps:$4 sm:$0xff]  }
 0x482   : > { %v2939_v2 = vadd.f32 1.0, %v6104_v47  ;;  %v6106_v3 = vpop.eup %6105  ;;  %v5944_v47 = vld [vmem:[%s7497_s5 + $0x4c4] ss:$8 sps:$4 sm:$0xff]  }
 0x483   : > { %v2958_v5 = vpack.c.bf16 %v2953_v58, %v2952_v49  ;;  %3761 = vmatpush2.bf16.msra.mxu0 %v5936_v1  ;;  %v5947_v49 = vld [vmem:[%s7497_s5 + $0x5d4] ss:$8 sps:$4 sm:$0xff]   ;;  %v5942_v58 = vld [vmem:[%s7497_s5 + $0x4c0] ss:$8 sps:$4 sm:$0xff]  }
 0x484   : > { %6119 = vrcp.f32 %v2939_v2  ;;  %v6108_v6 = vpop.eup %6107  ;;  %v5945_v2 = vld [vmem:[%s7497_s5 + $0x5d0] ss:$8 sps:$4 sm:$0xff]   ;;  %3762 = vmatprep.subr.bf16.mxu0 %v5944_v47 }
 0x485   : > { %3104 = vmatmul.mubr.bf16.vlgmr.msra.gmra.mxu1 %v2958_v5  ;;  %v6110_v16 = vpop.eup %6109  ;;  %v2954_v19 = vmul.f32 %v6108_v6, %v6106_v3  ;;  %v5953_v5 = vld [vmem:[%s7497_s5 + $0x5c4] ss:$8 sps:$4 sm:$0xff]   ;;  %v5951_v3 = vld [vmem:[%s7497_s5 + $0x5c0] ss:$8 sps:$4 sm:$0xff]   ;;  %v5959_v6 = vld [vmem:[%s7497_s5 + $0x5b4] ss:$8 sps:$4 sm:$0xff]  }
 0x486   : > { %3112 = vmatprep.mubr.bf16.mxu1 %v6422_v55  ;;  %3804 = vmatpush1.bf16.msra.mxu1 %v5885_v12  ;;  %v5950_v12 = vld [vmem:[%s7497_s5 + $0x4b4] ss:$8 sps:$4 sm:$0xff]  }
 0x487   : > { %3805 = vmatprep.subr.bf16.mxu1 %v5893_v57  ;;  %3763 = vmatpush2.bf16.msra.mxu0 %v5942_v58  ;;  %v5948_v57 = vld [vmem:[%s7497_s5 + $0x4b0] ss:$8 sps:$4 sm:$0xff]  }
 0x488   : > { %v6112_v13 = vpop.eup %6111  ;;  %3764 = vmatprep.subr.bf16.mxu0 %v5950_v12 }
 0x489   : > { %v2955_v20 = vmul.f32 %v6112_v13, %v6110_v16  ;;  %v6114_v15 = vpop.eup %6113  ;;  %v5957_v16 = vld [vmem:[%s7497_s5 + $0x5b0] ss:$8 sps:$4 sm:$0xff]   ;;  %v5962_v13 = vld [vmem:[%s7497_s5 + $0x494] ss:$8 sps:$4 sm:$0xff]  }
 0x48a   : > { %3806 = vmatpush1.bf16.msra.mxu1 %v5891_v4  ;;  %v5956_v4 = vld [vmem:[%s7497_s5 + $0x4a4] ss:$8 sps:$4 sm:$0xff]  }
 0x48b   : > { %3807 = vmatprep.subr.bf16.mxu1 %v5899_v7  ;;  %v2959_v23 = vpack.c.bf16 %v2955_v20, %v2954_v19  ;;  %3765 = vmatpush2.bf16.msra.mxu0 %v5948_v57  ;;  %v5954_v7 = vld [vmem:[%s7497_s5 + $0x4a0] ss:$8 sps:$4 sm:$0xff]   ;;  %v5965_v19 = vld [vmem:[%s7497_s5 + $0x5a4] ss:$8 sps:$4 sm:$0xff]   ;;  %v5960_v20 = vld [vmem:[%s7497_s5 + $0x490] ss:$8 sps:$4 sm:$0xff]  }
 0x48c   : > { %v6116_v34 = vpop.eup %6115  ;;  %3766 = vmatprep.subr.bf16.mxu0 %v5956_v4 }
 0x48d   : > { %3113 = vmatmul.mubr.bf16.gmra.mxu1 %v2959_v23  ;;  %v6118_v41 = vpop.eup %6117  ;;  %v2956_v43 = vmul.f32 %v6116_v34, %v6114_v15  ;;  %v5968_v23 = vld [vmem:[%s7497_s5 + $0x484] ss:$8 sps:$4 sm:$0xff]   ;;  %v5966_v15 = vld [vmem:[%s7497_s5 + $0x480] ss:$8 sps:$4 sm:$0xff]   ;;  %v5969_v34 = vld [vmem:[%s7497_s5 + $0x590] ss:$8 sps:$4 sm:$0xff]  }
 0x48e   : > { %3122 = vmatprep.mubr.bf16.mxu1 %v6422_v55  ;;  %3808 = vmatpush1.bf16.msra.mxu1 %v5897_v18  ;;  %v5963_v18 = vld [vmem:[%s7497_s5 + $0x5a0] ss:$8 sps:$4 sm:$0xff]  }
 0x48f   : > { %3809 = vmatprep.subr.bf16.mxu1 %v5905_v17  ;;  %3767 = vmatpush2.bf16.msra.mxu0 %v5954_v7  ;;  %v5971_v17 = vld [vmem:[%s7497_s5 + $0x594] ss:$8 sps:$4 sm:$0xff]  }
 0x490   : > { %3768 = vmatprep.subr.bf16.mxu0 %v5962_v13 }
 0x491   : > { %v6120_v21 = vpop.eup %6119 }
 0x492   : > { %v2957_v36 = vmul.f32 %v6120_v21, %v6118_v41  ;;  %3810 = vmatpush1.bf16.msra.mxu1 %v5903_v37  ;;  %v5975_v37 = vld [vmem:[%s7497_s5 + $0x580] ss:$8 sps:$4 sm:$0xff]   ;;  %v5977_v41 = vld [vmem:[%s7497_s5 + $0x584] ss:$8 sps:$4 sm:$0xff]  }
 0x493   : > { %3811 = vmatprep.subr.bf16.mxu1 %v5911_v24  ;;  %3769 = vmatpush2.bf16.msra.mxu0 %v5960_v20  ;;  %v2979_v24 = vld [vmem:[#allocation13 + $0x2] sm:$0x3] }
 0x494   : > { %v2960_v35 = vpack.c.bf16 %v2957_v36, %v2956_v43  ;;  %3770 = vmatprep.subr.bf16.mxu0 %v5968_v23  ;;  %v2984_v21 = vrot.slane %v2979_v24, %v6997_v40 }
 0x496   : > { %3123 = vmatmul.mubr.bf16.gmra.mxu1 %v2960_v35  ;;  %v2032_v35 = vrot.slane %v7143_v63, %v6993_v9 }
 0x497   : > { %3812 = vmatpush1.bf16.msra.mxu1 %v5909_v39  ;;  %3771 = vmatpush2.bf16.msra.mxu0 %v5966_v15 }
 0x498   : > { %3813 = vmatprep.subr.bf16.mxu1 %v5917_v46  ;;  %v2155_v52 = vadd.f32 %v7148_v8, %v2032_v35 }
 0x49b   : > { %3814 = vmatpush1.bf16.msra.mxu1 %v5915_v48  ;;  %v2988_v48 = vrot.slane %v2979_v24, %v6993_v9 }
 0x49c   : > { %3815 = vmatprep.subr.bf16.mxu1 %v5923_v50 }
 0x49f   : > { %3816 = vmatpush1.bf16.msra.mxu1 %v5921_v51 }
 0x4a0   : > { %3817 = vmatprep.subr.bf16.mxu1 %v5929_v32 }
 0x4a3   : > { %3818 = vmatpush1.bf16.msra.mxu1 %v5927_v53 }
 0x4a4   : > { %3819 = vmatprep.subr.bf16.mxu1 %v5935_v56 }
 0x4a7   : > { %3820 = vmatpush2.bf16.msra.mxu1 %v5933_v61 }
 0x4a8   : > { %3821 = vmatprep.subr.bf16.mxu1 %v5941_v0 }
 0x4ab   : > { %3822 = vmatpush2.bf16.msra.mxu1 %v5939_v62  ;;  %v2161_v62 = vadd.f32 %v7157_v22, %v2032_v35 }
 0x4ac   : > { %3823 = vmatprep.subr.bf16.mxu1 %v5947_v49 }
 0x4af   : > { %3824 = vmatpush2.bf16.msra.mxu1 %v5945_v2 }
 0x4b0   : > { %3825 = vmatprep.subr.bf16.mxu1 %v5953_v5  ;;  %v2165_v5 = vadd.f32 %v7166_v31, %v2032_v35 }
 0x4b3   : > { %3826 = vmatpush2.bf16.msra.mxu1 %v5951_v3 }
 0x4b4   : > { %3827 = vmatprep.subr.bf16.mxu1 %v5959_v6 }
 0x4b7   : > { %3828 = vmatpush2.bf16.msra.mxu1 %v5957_v16 }
 0x4b8   : > { %3829 = vmatprep.subr.bf16.mxu1 %v5965_v19 }
 0x4bb   : > { %3830 = vmatpush2.bf16.msra.mxu1 %v5963_v18  ;;  %v2171_v18 = vadd.f32 %v7178_v45, %v2032_v35 }
 0x4bc   : > { %3831 = vmatprep.subr.bf16.mxu1 %v5971_v17 }
 0x4bf   : > { %3832 = vmatpush2.bf16.msra.mxu1 %v5969_v34 }
 0x4c0   : > { %3833 = vmatprep.subr.bf16.mxu1 %v5977_v41 }
 0x4c3   : > { %3834 = vmatpush2.bf16.msra.mxu1 %v5975_v37 }
 0x545   : > { %v3105_v43 = vpop.f32.mrf.mxu1 }
 0x546   : > { %v3106_v36 = vadd.f32 %v3105_v43, %v2984_v21 }
 0x547   : > { %v3107_v39 = vpop.f32.mrf.mxu1 }
 0x548   : > { %v3132_v46 = vadd.f32 %v3106_v36, %v7151_v10 }
 0x549   : > { %v3108_v50 = vpop.f32.mrf.mxu1 }
 0x54a   : > { %v3138_v51 = vmul.f32 0.70710677, %v3132_v46  ;;  %v3109_v38 = vadd.f32 %v3108_v50, %v2984_v21 }
 0x54b   : > { %v3110_v32 = vpop.f32.mrf.mxu1 }
 0x54c   : > { %v3144_v53 = vmul.f32 %v6681_v25, %v3138_v51  ;;  %v3133_v11 = vadd.f32 %v3109_v38, %v7160_v14  ;;  %v3111_v56 = vadd.f32 %v3110_v32, %v2988_v48 }
 0x54d   : > { %v3114_v63 = vpop.f32.mrf.mxu1 }
 0x54e   : > { %3162 = vst [vmem:[#allocation5 + $0x8] sm:$0xff] %v3144_v53  ;;  %v5330_v59 = vpack.c.bf16 %v3144_v53, %v3144_v53  ;;  %v3139_v61 = vmul.f32 0.70710677, %v3133_v11  ;;  %v7402_v42 = vadd.f32 %v3111_v56, %v2155_v52  ;;  %v3115_v10 = vadd.f32 %v3114_v63, %v2984_v21  ;;  %v5980_v56 = vld [vmem:[#allocation6 + $0xc] ss:$16 sps:$4 sm:$0xff]  }
 0x54f   : > { %v3116_v1 = vpop.f32.mrf.mxu1  ;;  %3835 = vmatprep.mubr.bf16.mxu1 %v5980_v56 }
 0x550   : > { %3228 = vst [vmem:[#allocation6 + $0x4] sm:$0xf] %v5330_v59  ;;  %v3145_v0 = vmul.f32 %v6684_v26, %v3139_v61  ;;  %v3134_v8 = vadd.f32 %v3115_v10, %v7169_v33  ;;  %v3117_v47 = vadd.f32 %v3116_v1, %v2988_v48  ;;  %v5984_v1 = vld [vmem:[#allocation6 + $0x2c] ss:$16 sps:$4 sm:$0xff]  }
 0x551   : > { %v3118_v14 = vpop.f32.mrf.mxu1 }
 0x552   : > { %3163 = vst [vmem:[#allocation5 + $0x10] sm:$0xff] %v3145_v0  ;;  %v5331_v25 = vpack.c.bf16 %v3145_v0, %v3145_v0  ;;  %v3140_v49 = vmul.f32 0.70710677, %v3134_v8  ;;  %v7407_v58 = vadd.f32 %v3117_v47, %v2161_v62  ;;  %v3119_v2 = vadd.f32 %v3118_v14, %v2984_v21  ;;  %v5989_v47 = vld [vmem:[#allocation6 + $0x4c] ss:$16 sps:$4 sm:$0xff]  }
 0x553   : > { %v3120_v12 = vpop.f32.mrf.mxu1 }
 0x554   : > { %3229 = vst [vmem:[#allocation6 + $0x14] sm:$0xf] %v5331_v25  ;;  %v3146_v57 = vmul.f32 %v6687_v27, %v3140_v49  ;;  %v3135_v3 = vadd.f32 %v3119_v2, %v7176_v44  ;;  %v3121_v4 = vadd.f32 %v3120_v12, %v2988_v48  ;;  %v5995_v49 = vld [vmem:[#allocation12 + $0x174] ss:$8 sps:$4 sm:$0xff]   ;;  %v5993_v2 = vld [vmem:[#allocation12 + $0x170] ss:$8 sps:$4 sm:$0xff]  }
 0x555   : > { %v3168_v22 = vld [vmem:[#allocation5 + $0x4] sm:$0xff]  ;;  %4022 = vmatprep.subr.bf16.mxu0 %v5995_v49 }
 0x556   : > { %v3124_v6 = vpop.f32.mrf.mxu1  ;;  %v5324_v33 = vpack.c.bf16 %v3168_v22, %v3168_v22  ;;  %3164 = vst [vmem:[#allocation5 + $0x18] sm:$0xff] %v3146_v57  ;;  %v5332_v7 = vpack.c.bf16 %v3146_v57, %v3146_v57  ;;  %v3141_v16 = vmul.f32 0.70710677, %v3135_v3  ;;  %v7412_v13 = vadd.f32 %v3121_v4, %v2165_v5  ;;  %v5998_v12 = vld [vmem:[#allocation12 + $0x164] ss:$8 sps:$4 sm:$0xff]  }
 0x557   : > { %v3125_v19 = vadd.f32 %v3124_v6, %v2984_v21  ;;  %v5996_v5 = vld [vmem:[#allocation12 + $0x160] ss:$8 sps:$4 sm:$0xff]   ;;  %v6001_v57 = vld [vmem:[#allocation12 + $0x154] ss:$8 sps:$4 sm:$0xff]   ;;  %v5999_v3 = vld [vmem:[#allocation12 + $0x150] ss:$8 sps:$4 sm:$0xff]  }
 0x558   : > { %v3126_v20 = vpop.f32.mrf.mxu1  ;;  %3198 = vst [vmem:[#allocation6] sm:$0xf] %v5324_v33  ;;  %3230 = vst [vmem:[#allocation6 + $0x24] sm:$0xf] %v5332_v7  ;;  %v3147_v31 = vmul.f32 %v6690_v28, %v3141_v16  ;;  %v6004_v4 = vld [vmem:[#allocation12 + $0x144] ss:$8 sps:$4 sm:$0xff]  }
 0x559   : > { %v3136_v23 = vadd.f32 %v3125_v19, %v7185_v54  ;;  %v3127_v44 = vadd.f32 %v3126_v20, %v2988_v48  ;;  %v3169_v17 = vld [vmem:[#allocation5 + $0xc] sm:$0xff]  ;;  %v6007_v6 = vld [vmem:[#allocation12 + $0x134] ss:$8 sps:$4 sm:$0xff]   ;;  %v6005_v33 = vld [vmem:[#allocation12 + $0x130] ss:$8 sps:$4 sm:$0xff]  }
 0x55a   : > { %v3128_v15 = vpop.f32.mrf.mxu1  ;;  %v5325_v34 = vpack.c.bf16 %v3169_v17, %v3169_v17  ;;  %3165 = vst [vmem:[#allocation5 + $0x20] sm:$0xff] %v3147_v31  ;;  %v5333_v37 = vpack.c.bf16 %v3147_v31, %v3147_v31  ;;  %v6002_v22 = vld [vmem:[#allocation12 + $0x140] ss:$8 sps:$4 sm:$0xff]   ;;  %v6010_v7 = vld [vmem:[#allocation12 + $0x124] ss:$8 sps:$4 sm:$0xff]  }
 0x55b   : > { %v3142_v41 = vmul.f32 0.70710677, %v3136_v23  ;;  %v7417_v24 = vadd.f32 %v3127_v44, %v2171_v18  ;;  %v3129_v43 = vadd.f32 %v3128_v15, %v2984_v21  ;;  %v5974_v32 = vld [vmem:[#allocation6 + $0x4] ss:$16 sps:$4 sm:$0xff]   ;;  %v6017_v23 = vld [vmem:[%s7534_s27 + $0x38] sm:$0xff]  }
 0x55c   : > { %v3130_v36 = vpop.f32.mrf.mxu1  ;;  %3199 = vst [vmem:[#allocation6 + $0x10] sm:$0xf] %v5325_v34  ;;  %3264 = vst [vmem:[#allocation6 + $0x8] sm:$0xf] %v5325_v34  ;;  %3772 = vmatprep.mubr.bf16.mxu0 %v5974_v32  ;;  %v6008_v16 = vld [vmem:[#allocation12 + $0x120] ss:$8 sps:$4 sm:$0xff]   ;;  %5425 = vmatprep.subr.bf16.mxu1 %v6017_v23 }
 0x55d   : > { %3231 = vst [vmem:[#allocation6 + $0x34] sm:$0xf] %v5333_v37  ;;  %v3148_v45 = vmul.f32 %v6693_v29, %v3142_v41  ;;  %v3137_v39 = vadd.f32 %v3129_v43, %v7192_v60  ;;  %v3235_v35 = vld [vmem:[#allocation5 + $0x14] sm:$0xff]  ;;  %v6014_v31 = vld [vmem:[#allocation12 + $0x100] ss:$8 sps:$4 sm:$0xff]  }
 0x55e   : > { %v5337_v48 = vpack.c.bf16 %v3235_v35, %v3235_v35  ;;  %v6013_v19 = vld [vmem:[#allocation12 + $0x114] ss:$8 sps:$4 sm:$0xff]   ;;  %v6011_v20 = vld [vmem:[#allocation12 + $0x110] ss:$8 sps:$4 sm:$0xff]   ;;  %v6016_v18 = vld [vmem:[#allocation12 + $0x104] ss:$8 sps:$4 sm:$0xff]  }
 0x55f   : > { %3166 = vst [vmem:[#allocation5 + $0x28] sm:$0xff] %v3148_v45  ;;  %v5334_v54 = vpack.c.bf16 %v3148_v45, %v3148_v45  ;;  %v3143_v46 = vmul.f32 0.70710677, %v3137_v39  ;;  %v6018_v44 = vld [vmem:[%s7534_s27 + $0x30] sm:$0xff]  }
 0x560   : > { %3265 = vst [vmem:[#allocation6 + $0x18] sm:$0xf] %v5337_v48  ;;  %3200 = vst [vmem:[#allocation6 + $0x20] sm:$0xf] %v5337_v48  ;;  %v3348_v15 = vld [vmem:[#allocation10 + $0x4] sm:$0x3] }
 0x561   : > { %3232 = vst [vmem:[#allocation6 + $0x44] sm:$0xf] %v5334_v54  ;;  %v3149_v50 = vmul.f32 %v6696_v30, %v3143_v46  ;;  %v3171_v51 = vld [vmem:[#allocation5 + $0x1c] sm:$0xff]  ;;  %v3357_v34 = vrot.slane %v3348_v15, %v6993_v9 }
 0x562   : > { %v5327_v52 = vpack.c.bf16 %v3171_v51, %v3171_v51 }
 0x563   : > { %3167 = vst [vmem:[#allocation5 + $0x30] sm:$0xff] %v3149_v50  ;;  %v5335_v21 = vpack.c.bf16 %v3149_v50, %v3149_v50  ;;  %v5972_v38 = vld [vmem:[#allocation6] ss:$16 sps:$4 sm:$0xff]  }
 0x564   : > { %3201 = vst [vmem:[#allocation6 + $0x30] sm:$0xf] %v5327_v52  ;;  %3266 = vst [vmem:[#allocation6 + $0x28] sm:$0xf] %v5327_v52  ;;  %3773 = vmatmul.mubr.bf16.vlgmr.msra.gmra.mxu0 %v5972_v38  ;;  %v5981_v10 = vld [vmem:[#allocation6 + $0x24] ss:$16 sps:$4 sm:$0xff]  }
 0x565   : > { %3233 = vst [vmem:[#allocation6 + $0x54] sm:$0xf] %v5335_v21  ;;  %3782 = vmatprep.mubr.bf16.mxu0 %v5981_v10  ;;  %4023 = vmatpush1.bf16.msra.mxu0 %v5993_v2 }
 0x566   : > { %v3237_v60 = vld [vmem:[#allocation5 + $0x24] sm:$0xff]  ;;  %4024 = vmatprep.subr.bf16.mxu0 %v5998_v12 }
 0x567   : > { %v5339_v53 = vpack.c.bf16 %v3237_v60, %v3237_v60  ;;  %v5978_v11 = vld [vmem:[#allocation6 + $0x8] ss:$16 sps:$4 sm:$0xff]  }
 0x568   : > { %3836 = vmatmul.mubr.bf16.vlgmr.msra.gmra.mxu1 %v5978_v11 }
 0x569   : > { %3267 = vst [vmem:[#allocation6 + $0x38] sm:$0xf] %v5339_v53  ;;  %3202 = vst [vmem:[#allocation6 + $0x40] sm:$0xf] %v5339_v53  ;;  %3845 = vmatprep.mubr.bf16.mxu1 %v5984_v1  ;;  %4025 = vmatpush1.bf16.msra.mxu0 %v5996_v5 }
 0x56a   : > { %v3173_v30 = vld [vmem:[#allocation5 + $0x2c] sm:$0xff]  ;;  %v3239_v59 = vld [vmem:[#allocation5 + $0x34] sm:$0xff]  ;;  %4026 = vmatprep.subr.bf16.mxu0 %v6001_v57  ;;  %5426 = vmatpush3.bf16.msra.mxu1 %v6017_v23 }
 0x56b   : > { %v5329_v61 = vpack.c.bf16 %v3173_v30, %v3173_v30  ;;  %v5341_v63 = vpack.c.bf16 %v3239_v59, %v3239_v59  ;;  %v5983_v0 = vld [vmem:[#allocation6 + $0x20] ss:$16 sps:$4 sm:$0xff]   ;;  %5427 = vmatprep.subr.bf16.mxu1 %v6018_v44 }
 0x56c   : > { %3783 = vmatmul.mubr.bf16.gmra.mxu0 %v5983_v0  ;;  %v5987_v8 = vld [vmem:[#allocation6 + $0x44] ss:$16 sps:$4 sm:$0xff]  }
 0x56d   : > { %3203 = vst [vmem:[#allocation6 + $0x50] sm:$0xf] %v5329_v61  ;;  %3268 = vst [vmem:[#allocation6 + $0x48] sm:$0xf] %v5329_v61  ;;  %3792 = vmatprep.mubr.bf16.mxu0 %v5987_v8  ;;  %4027 = vmatpush1.bf16.msra.mxu0 %v5999_v3 }
 0x56e   : > { %3269 = vst [vmem:[#allocation6 + $0x58] sm:$0xf] %v5341_v63  ;;  %4028 = vmatprep.subr.bf16.mxu0 %v6004_v4  ;;  %5428 = vmatpush3.bf16.msra.mxu1 %v6018_v44  ;;  %v3353_v63 = vrot.slane %v3348_v15, %v6997_v40 }
 0x570   : > { %v5986_v62 = vld [vmem:[#allocation6 + $0x28] ss:$16 sps:$4 sm:$0xff]  }
 0x571   : > { %3846 = vmatmul.mubr.bf16.gmra.mxu1 %v5986_v62  ;;  %4029 = vmatpush1.bf16.msra.mxu0 %v6002_v22 }
 0x572   : > { %3855 = vmatprep.mubr.bf16.mxu1 %v5989_v47  ;;  %4030 = vmatprep.subr.bf16.mxu0 %v6007_v6 }
 0x574   : > { %v5991_v25 = vld [vmem:[#allocation6 + $0x40] ss:$16 sps:$4 sm:$0xff]  }
 0x575   : > { %3793 = vmatmul.mubr.bf16.gmra.mxu0 %v5991_v25  ;;  %v5992_v14 = vld [vmem:[#allocation6 + $0x48] ss:$16 sps:$4 sm:$0xff]  }
 0x576   : > { %4054 = vmatprep.mubr.bf16.mxu0 %v6422_v55  ;;  %4031 = vmatpush1.bf16.msra.mxu0 %v6005_v33 }
 0x577   : > { %4032 = vmatprep.subr.bf16.mxu0 %v6010_v7 }
 0x579   : > { %3856 = vmatmul.mubr.bf16.gmra.mxu1 %v5992_v14 }
 0x57a   : > { %4033 = vmatpush1.bf16.msra.mxu0 %v6008_v16 }
 0x57b   : > { %4034 = vmatprep.subr.bf16.mxu0 %v6013_v19 }
 0x57e   : > { %4035 = vmatpush1.bf16.msra.mxu0 %v6011_v20 }
 0x57f   : > { %4036 = vmatprep.subr.bf16.mxu0 %v6016_v18 }
 0x582   : > { %4037 = vmatpush1.bf16.msra.mxu0 %v6014_v31 }
 0x624   : > { %v3774_v17 = vpop.f32.mrf.mxu0 }
 0x625   : > { %v3775_v14 = vadd.f32 %v3774_v17, %v3353_v63 }
 0x626   : > { %v3776_v37 = vpop.f32.mrf.mxu0 }
 0x627   : > { %v3777_v36 = vadd.f32 %v3776_v37, %v3357_v34 }
 0x628   : > { %v3778_v41 = vpop.f32.mrf.mxu0  ;;  %v3837_v43 = vpop.f32.mrf.mxu1 }
 0x629   : > { %v3838_v57 = vadd.f32 %v3837_v43, %v3775_v14  ;;  %v3779_v22 = vadd.f32 %v3778_v41, %v3353_v63 }
 0x62a   : > { %v3780_v45 = vpop.f32.mrf.mxu0  ;;  %v3839_v39 = vpop.f32.mrf.mxu1 }
 0x62b   : > { %v3840_v35 = vadd.f32 %v3839_v39, %v3777_v36  ;;  %v3781_v48 = vadd.f32 %v3780_v45, %v3357_v34 }
 0x62c   : > { %v3784_v54 = vpop.f32.mrf.mxu0  ;;  %v3841_v46 = vpop.f32.mrf.mxu1 }
 0x62d   : > { %v5219_v50 = vmul.f32 -1.442695, %v3840_v35  ;;  %v3842_v19 = vadd.f32 %v3841_v46, %v3779_v22  ;;  %v3785_v17 = vadd.f32 %v3784_v54, %v3353_v63  ;;  %v6024_v22 = vld [vmem:[%s7534_s27] sm:$0xff]  }
 0x62e   : > { %v3786_v51 = vpop.f32.mrf.mxu0  ;;  %v3843_v21 = vpop.f32.mrf.mxu1 }
 0x62f   : > { %6121 = vpow2.f32 %v5219_v50  ;;  %v3844_v38 = vadd.f32 %v3843_v21, %v3781_v48  ;;  %v3787_v60 = vadd.f32 %v3786_v51, %v3357_v34 }
 0x630   : > { %v3788_v32 = vpop.f32.mrf.mxu0 }
 0x631   : > { %v3847_v52 = vpop.f32.mrf.mxu1  ;;  %v5220_v53 = vmul.f32 -1.442695, %v3844_v38  ;;  %v3789_v37 = vadd.f32 %v3788_v32, %v3353_v63 }
 0x632   : > { %v3790_v11 = vpop.f32.mrf.mxu0  ;;  %v3848_v43 = vadd.f32 %v3847_v52, %v3785_v17 }
 0x633   : > { %v3849_v56 = vpop.f32.mrf.mxu1  ;;  %6123 = vpow2.f32 %v5220_v53  ;;  %v3791_v10 = vadd.f32 %v3790_v11, %v3357_v34 }
 0x634   : > { %v3850_v30 = vadd.f32 %v3849_v56, %v3787_v60 }
 0x635   : > { %v3794_v59 = vpop.f32.mrf.mxu0  ;;  %v3851_v61 = vpop.f32.mrf.mxu1 }
 0x636   : > { %v5221_v0 = vmul.f32 -1.442695, %v3850_v30  ;;  %v3852_v36 = vadd.f32 %v3851_v61, %v3789_v37  ;;  %v3795_v39 = vadd.f32 %v3794_v59, %v3353_v63 }
 0x637   : > { %v3796_v1 = vpop.f32.mrf.mxu0  ;;  %v3853_v62 = vpop.f32.mrf.mxu1 }
 0x638   : > { %6125 = vpow2.f32 %v5221_v0  ;;  %v3854_v8 = vadd.f32 %v3853_v62, %v3791_v10  ;;  %v3797_v49 = vadd.f32 %v3796_v1, %v3357_v34 }
 0x639   : > { %v3798_v47 = vpop.f32.mrf.mxu0  ;;  %v3857_v25 = vpop.f32.mrf.mxu1 }
 0x63a   : > { %v5222_v2 = vmul.f32 -1.442695, %v3854_v8  ;;  %v3799_v48 = vadd.f32 %v3798_v47, %v3353_v63  ;;  %v3858_v50 = vadd.f32 %v3857_v25, %v3795_v39 }
 0x63b   : > { %v3800_v12 = vpop.f32.mrf.mxu0  ;;  %v3859_v5 = vpop.f32.mrf.mxu1 }
 0x63c   : > { %6127 = vpow2.f32 %v5222_v2  ;;  %v3860_v3 = vadd.f32 %v3859_v5, %v3797_v49  ;;  %v6122_v4 = vpop.eup %6121  ;;  %v3801_v7 = vadd.f32 %v3800_v12, %v3357_v34  ;;  %v6019_v12 = vld [vmem:[%s7534_s27 + $0x28] sm:$0xff]   ;;  %v6020_v5 = vld [vmem:[%s7534_s27 + $0x20] sm:$0xff]  }
 0x63d   : > { %v3861_v6 = vpop.f32.mrf.mxu1  ;;  %v3890_v33 = vadd.f32 1.0, %v6122_v4  ;;  %6129 = vtanh.f32 %v3838_v57  ;;  %5429 = vmatprep.subr.bf16.mxu1 %v6019_v12  ;;  %v6021_v57 = vld [vmem:[%s7534_s27 + $0x18] sm:$0xff]   ;;  %v6023_v4 = vld [vmem:[%s7534_s27 + $0x8] sm:$0xff]  }
 0x63e   : > { %v5223_v16 = vmul.f32 -1.442695, %v3860_v3  ;;  %v3862_v38 = vadd.f32 %v3861_v6, %v3799_v48  ;;  %5430 = vmatpush3.bf16.msra.mxu1 %v6019_v12  ;;  %v6022_v3 = vld [vmem:[%s7534_s27 + $0x10] sm:$0xff]  }
 0x63f   : > { %v3863_v20 = vpop.f32.mrf.mxu1  ;;  %5431 = vmatprep.subr.bf16.mxu1 %v6020_v5  ;;  %v6025_v6 = vld [vmem:[#allocation16 + $0x70] ss:$8 sps:$4 sm:$0xff]  }
 0x640   : > { %v3864_v18 = vadd.f32 %v3863_v20, %v3801_v7  ;;  %v6124_v31 = vpop.eup %6123  ;;  %6131 = vpow2.f32 %v5223_v16  ;;  %v6030_v7 = vld [vmem:[#allocation16 + $0x64] ss:$8 sps:$4 sm:$0xff]   ;;  %v6028_v16 = vld [vmem:[#allocation16 + $0x60] ss:$8 sps:$4 sm:$0xff]   ;;  %v6031_v20 = vld [vmem:[#allocation16 + $0x50] ss:$8 sps:$4 sm:$0xff]  }
 0x641   : > { %6133 = vrcp.f32 %v3890_v33  ;;  %v3891_v23 = vadd.f32 1.0, %v6124_v31  ;;  %v6027_v33 = vld [vmem:[#allocation16 + $0x74] ss:$8 sps:$4 sm:$0xff]   ;;  %v6034_v31 = vld [vmem:[#allocation16 + $0x40] ss:$8 sps:$4 sm:$0xff]  }
 0x642   : > { %v5224_v44 = vmul.f32 -1.442695, %v3864_v18  ;;  %6135 = vtanh.f32 %v3842_v19  ;;  %5432 = vmatpush3.bf16.msra.mxu1 %v6020_v5  ;;  %4333 = vmatprep.subr.bf16.mxu0 %v6027_v33  ;;  %v6033_v19 = vld [vmem:[#allocation16 + $0x54] ss:$8 sps:$4 sm:$0xff]   ;;  %v6036_v18 = vld [vmem:[#allocation16 + $0x44] ss:$8 sps:$4 sm:$0xff]  }
 0x643   : > { %6137 = vrcp.f32 %v3891_v23  ;;  %5433 = vmatprep.subr.bf16.mxu1 %v6021_v57  ;;  %v6039_v23 = vld [vmem:[#allocation16 + $0x34] ss:$8 sps:$4 sm:$0xff]  }
 0x644   : > { %6139 = vpow2.f32 %v5224_v44  ;;  %v6037_v44 = vld [vmem:[#allocation16 + $0x30] ss:$8 sps:$4 sm:$0xff]  }
 0x645   : > { %v6126_v15 = vpop.eup %6125  ;;  %6141 = vtanh.f32 %v3848_v43 }
 0x646   : > { %v3892_v41 = vadd.f32 1.0, %v6126_v15  ;;  %5434 = vmatpush3.bf16.msra.mxu1 %v6021_v57  ;;  %v3935_v15 = vld [vmem:[#allocation13 + $0x4] sm:$0x3] }
 0x647   : > { %5435 = vmatprep.subr.bf16.mxu1 %v6022_v3  ;;  %v3940_v43 = vrot.slane %v3935_v15, %v6993_v9 }
 0x648   : > { %6143 = vrcp.f32 %v3892_v41 }
 0x649   : > { %v6128_v34 = vpop.eup %6127  ;;  %6145 = vtanh.f32 %v3852_v36 }
 0x64a   : > { %v3893_v45 = vadd.f32 1.0, %v6128_v34  ;;  %v6130_v35 = vpop.eup %6129  ;;  %5436 = vmatpush3.bf16.msra.mxu1 %v6022_v3 }
 0x64b   : > { %5437 = vmatprep.subr.bf16.mxu1 %v6023_v4 }
 0x64c   : > { %6147 = vrcp.f32 %v3893_v45 }
 0x64d   : > { %v6132_v46 = vpop.eup %6131  ;;  %6149 = vtanh.f32 %v3858_v50 }
 0x64e   : > { %v6134_v54 = vpop.eup %6133  ;;  %v3894_v51 = vadd.f32 1.0, %v6132_v46  ;;  %5438 = vmatpush3.bf16.msra.mxu1 %v6023_v4 }
 0x64f   : > { %v6136_v21 = vpop.eup %6135  ;;  %v3908_v60 = vmul.f32 %v6134_v54, %v6130_v35  ;;  %5439 = vmatprep.subr.bf16.mxu1 %v6024_v22 }
 0x650   : > { %v6138_v32 = vpop.eup %6137  ;;  %6151 = vrcp.f32 %v3894_v51 }
 0x651   : > { %v6140_v52 = vpop.eup %6139  ;;  %v3909_v53 = vmul.f32 %v6138_v32, %v6136_v21  ;;  %6153 = vtanh.f32 %v3862_v38 }
 0x652   : > { %v3895_v11 = vadd.f32 1.0, %v6140_v52  ;;  %v6142_v30 = vpop.eup %6141  ;;  %5440 = vmatpush3.bf16.msra.mxu1 %v6024_v22 }
 0x653   : > { %v3914_v56 = vpack.c.bf16 %v3909_v53, %v3908_v60 }
 0x654   : > { %6155 = vrcp.f32 %v3895_v11 }
 0x655   : > { %4055 = vmatmul.mubr.bf16.vlgmr.msra.gmra.mxu0 %v3914_v56  ;;  %v6144_v59 = vpop.eup %6143 }
 0x656   : > { %4061 = vmatprep.mubr.bf16.mxu0 %v6422_v55  ;;  %v6146_v61 = vpop.eup %6145  ;;  %v3910_v10 = vmul.f32 %v6144_v59, %v6142_v30  ;;  %4334 = vmatpush1.bf16.msra.mxu0 %v6025_v6 }
 0x657   : > { %4335 = vmatprep.subr.bf16.mxu0 %v6030_v7  ;;  %v4241_v7 = vld [vmem:[#allocation18] sm:$0x3] }
 0x659   : > { %v6148_v63 = vpop.eup %6147 }
 0x65a   : > { %v3911_v0 = vmul.f32 %v6148_v63, %v6146_v61  ;;  %v6150_v62 = vpop.eup %6149  ;;  %4336 = vmatpush1.bf16.msra.mxu0 %v6028_v16  ;;  %v4246_v16 = vrot.slane %v4241_v7, %v6997_v40 }
 0x65b   : > { %4337 = vmatprep.subr.bf16.mxu0 %v6033_v19 }
 0x65c   : > { %v3915_v1 = vpack.c.bf16 %v3911_v0, %v3910_v10  ;;  %v6040_v10 = vld [vmem:[#allocation16 + $0x20] ss:$8 sps:$4 sm:$0xff]   ;;  %v6045_v0 = vld [vmem:[#allocation16 + $0x14] ss:$8 sps:$4 sm:$0xff]  }
 0x65d   : > { %v6152_v8 = vpop.eup %6151 }
 0x65e   : > { %4062 = vmatmul.mubr.bf16.gmra.mxu0 %v3915_v1  ;;  %v6154_v47 = vpop.eup %6153  ;;  %v3912_v14 = vmul.f32 %v6152_v8, %v6150_v62  ;;  %v6043_v1 = vld [vmem:[#allocation16 + $0x10] ss:$8 sps:$4 sm:$0xff]   ;;  %v6048_v62 = vld [vmem:[#allocation16 + $0x4] ss:$8 sps:$4 sm:$0xff]   ;;  %v6046_v8 = vld [vmem:[#allocation16] ss:$8 sps:$4 sm:$0xff]  }
 0x65f   : > { %4069 = vmatprep.mubr.bf16.mxu0 %v6422_v55  ;;  %4338 = vmatpush1.bf16.msra.mxu0 %v6031_v20 }
 0x660   : > { %4339 = vmatprep.subr.bf16.mxu0 %v6036_v18 }
 0x661   : > { %v6156_v25 = vpop.eup %6155 }
 0x662   : > { %v3913_v49 = vmul.f32 %v6156_v25, %v6154_v47 }
 0x663   : > { %4340 = vmatpush1.bf16.msra.mxu0 %v6034_v31 }
 0x664   : > { %v3916_v2 = vpack.c.bf16 %v3913_v49, %v3912_v14  ;;  %4341 = vmatprep.subr.bf16.mxu0 %v6039_v23 }
 0x666   : > { %4070 = vmatmul.mubr.bf16.gmra.mxu0 %v3916_v2 }
 0x667   : > { %4365 = vmatprep.mubr.bf16.mxu0 %v6422_v55  ;;  %4342 = vmatpush1.bf16.msra.mxu0 %v6037_v44 }
 0x715   : > { %v4056_v17 = vpop.f32.mrf.mxu0 }
 0x717   : > { %v4057_v37 = vpop.f32.mrf.mxu0 }
 0x719   : > { %v4058_v41 = vpop.f32.mrf.mxu0 }
 0x71b   : > { %v4059_v36 = vpop.f32.mrf.mxu0 }
 0x71c   : > { %v4060_v34 = vadd.f32 %v4059_v36, %v3940_v43 }
 0x71e   : > { %v4063_v45 = vpop.f32.mrf.mxu0  ;;  %v4081_v35 = vadd.f32 %v4060_v34, %v7402_v42  ;;  %v4250_v34 = vrot.slane %v4241_v7, %v6993_v9 }
 0x720   : > { %v4064_v39 = vpop.f32.mrf.mxu0  ;;  %v4093_v51 = vmax.f32 %v4081_v35, 0.0 }
 0x721   : > { %v4065_v46 = vadd.f32 %v4064_v39, %v3940_v43 }
 0x722   : > { %v4066_v48 = vpop.f32.mrf.mxu0 }
 0x723   : > { %v4082_v50 = vadd.f32 %v4065_v46, %v7407_v58  ;;  %v6042_v58 = vld [vmem:[#allocation16 + $0x24] ss:$8 sps:$4 sm:$0xff]  }
 0x724   : > { %v4067_v54 = vpop.f32.mrf.mxu0  ;;  %4343 = vmatprep.subr.bf16.mxu0 %v6042_v58 }
 0x725   : > { %v4094_v21 = vmax.f32 %v4082_v50, 0.0  ;;  %v4068_v38 = vadd.f32 %v4067_v54, %v3940_v43  ;;  %4344 = vmatpush1.bf16.msra.mxu0 %v6040_v10 }
 0x726   : > { %v4071_v32 = vpop.f32.mrf.mxu0  ;;  %4345 = vmatprep.subr.bf16.mxu0 %v6045_v0  ;;  %v4389_v0 = vld [vmem:[%s6646_s18 + $0x18] sm:$0xff] }
 0x727   : > { %v4097_v52 = vpack.c.bf16 %v4094_v21, %v4093_v51  ;;  %v4083_v53 = vadd.f32 %v4068_v38, %v7412_v13  ;;  %v4386_v38 = vld [vmem:[%s6646_s18] sm:$0xff] }
 0x728   : > { %v4072_v60 = vpop.f32.mrf.mxu0 }
 0x729   : > { %5441 = vmatprep.mubr.bf16.mxu1 %v4097_v52  ;;  %v4073_v11 = vadd.f32 %v4072_v60, %v3940_v43  ;;  %v4095_v42 = vmax.f32 %v4083_v53, 0.0  ;;  %4346 = vmatpush1.bf16.msra.mxu0 %v6043_v1  ;;  %v4387_v53 = vld [vmem:[%s6646_s18 + $0x8] sm:$0xff] }
 0x72a   : > { %v4074_v56 = vpop.f32.mrf.mxu0  ;;  %4347 = vmatprep.subr.bf16.mxu0 %v6048_v62 }
 0x72b   : > { %v4084_v30 = vadd.f32 %v4073_v11, %v7417_v24  ;;  %v5241_v24 = vld [vmem:[#allocation15] ss:$0 sm:$0xff] }
 0x72c   : > { %v4075_v59 = vpop.f32.mrf.mxu0 }
 0x72d   : > { %v4096_v61 = vmax.f32 %v4084_v30, 0.0  ;;  %4348 = vmatpush1.bf16.msra.mxu0 %v6046_v8  ;;  %v4388_v59 = vld [vmem:[%s6646_s18 + $0x10] sm:$0xff] }
 0x72f   : > { %v4098_v63 = vpack.c.bf16 %v4096_v61, %v4095_v42 }
 0x731   : > { %5442 = vmatmul.mubr.bf16.vlgmr.msra.gmra.mxu1 %v4098_v63 }
 0x7f1   : > { %v5443_v13 = vpop.f32.mrf.mxu1 }
 0x7f2   : > { %v4213_v4 = vadd.f32 %v5443_v13, %v5241_v24 }
 0x7f3   : > { %v4204_v47 = vpop.f32.mrf.mxu1 }
 0x7f4   : > { %v4205_v14 = vadd.f32 %v5241_v24, %v4204_v47  ;;  %v4221_v6 = vmax.f32 %v4213_v4, 0.0 }
 0x7f5   : > { %v5444_v25 = vpop.f32.mrf.mxu1 }
 0x7f6   : > { %v4219_v12 = vmax.f32 %v4205_v14, 0.0  ;;  %v4216_v57 = vadd.f32 %v5444_v25, %v5241_v24 }
 0x7f7   : > { %v4207_v49 = vpop.f32.mrf.mxu1 }
 0x7f8   : > { %v4208_v2 = vadd.f32 %v5241_v24, %v4207_v49  ;;  %v4222_v22 = vmax.f32 %v4216_v57, 0.0 }
 0x7fa   : > { %v4220_v5 = vmax.f32 %v4208_v2, 0.0  ;;  %v4224_v33 = vpack.c.bf16 %v4222_v22, %v4221_v6 }
 0x7fc   : > { %v4223_v3 = vpack.c.bf16 %v4220_v5, %v4219_v12 }
 0x7fe   : > { %4366 = vmatmul.mubr.bf16.vlgmr.msra.gmra.mxu0 %v4223_v3 }
 0x7ff   : > { %4375 = vmatprep.mubr.bf16.mxu0 %v6422_v55 }
 0x806   : > { %4376 = vmatmul.mubr.bf16.gmra.mxu0 %v4224_v33 }
 0x8be   : > { %v4367_v19 = vpop.f32.mrf.mxu0 }
 0x8bf   : > { %v4368_v20 = vadd.f32 %v4367_v19, %v4246_v16 }
 0x8c0   : > { %v4369_v18 = vpop.f32.mrf.mxu0 }
 0x8c1   : > { %v4394_v31 = vsub.f32 0.0, %v4368_v20  ;;  %v4414_v40 = vmul.f32 %v6684_v26, %v4368_v20  ;;  %v4370_v51 = vadd.f32 %v4369_v18, %v4250_v34 }
 0x8c2   : > { %v4371_v23 = vpop.f32.mrf.mxu0 }
 0x8c3   : > { %v4398_v44 = vmul.f32 1.442695, %v4394_v31  ;;  %v4372_v17 = vadd.f32 %v4371_v23, %v4246_v16  ;;  %v4390_v52 = vsub.f32 %v4386_v38, %v4370_v51 }
 0x8c4   : > { %v4373_v15 = vpop.f32.mrf.mxu0 }
 0x8c5   : > { %6157 = vpow2.f32 %v4398_v44  ;;  %v4395_v37 = vsub.f32 0.0, %v4372_v17  ;;  %v4415_v55 = vmul.f32 %v6687_v27, %v4372_v17  ;;  %v4374_v60 = vadd.f32 %v4373_v15, %v4250_v34 }
 0x8c6   : > { %v4377_v43 = vpop.f32.mrf.mxu0 }
 0x8c7   : > { %v4400_v41 = vmul.f32 1.442695, %v4395_v37  ;;  %v4378_v36 = vadd.f32 %v4377_v43, %v4246_v16  ;;  %v4418_v54 = vadd.f32 %v4415_v55, %v4414_v40  ;;  %v4391_v56 = vsub.f32 %v4387_v53, %v4374_v60 }
 0x8c8   : > { %v4379_v45 = vpop.f32.mrf.mxu0 }
 0x8c9   : > { %6159 = vpow2.f32 %v4400_v41  ;;  %v4396_v39 = vsub.f32 0.0, %v4378_v36  ;;  %v4416_v35 = vmul.f32 %v6690_v28, %v4378_v36  ;;  %v4380_v30 = vadd.f32 %v4379_v45, %v4250_v34 }
 0x8ca   : > { %v4381_v46 = vpop.f32.mrf.mxu0 }
 0x8cb   : > { %v4402_v48 = vmul.f32 1.442695, %v4396_v39  ;;  %v4382_v50 = vadd.f32 %v4381_v46, %v4246_v16  ;;  %v4419_v9 = vadd.f32 %v4418_v54, %v4416_v35  ;;  %v4392_v63 = vsub.f32 %v4388_v59, %v4380_v30 }
 0x8cc   : > { %v4383_v42 = vpop.f32.mrf.mxu0 }
 0x8cd   : > { %6161 = vpow2.f32 %v4402_v48  ;;  %v4397_v27 = vsub.f32 0.0, %v4382_v50  ;;  %v4417_v21 = vmul.f32 %v6693_v29, %v4382_v50  ;;  %v4384_v58 = vadd.f32 %v4383_v42, %v4250_v34 }
 0x8cf   : > { %v4404_v32 = vmul.f32 1.442695, %v4397_v27  ;;  %v4420_v26 = vadd.f32 %v4419_v9, %v4417_v21  ;;  %v4393_v62 = vsub.f32 %v4389_v0, %v4384_v58 }
 0x8d1   : > { %6163 = vpow2.f32 %v4404_v32  ;;  %4421 = vadd.xlane.f32.xlu0 %v4420_v26 }
 0x8d2   : > { %v6158_v28 = vpop.eup %6157 }
 0x8d3   : > { %v4406_v11 = vmul.f32 %v6158_v28, %v4390_v52 }
 0x8d5   : > { %4410 = vst [vmem:[%s6651_s9] sm:$0xff] %v4406_v11 }
 0x8d6   : > { %v6160_v29 = vpop.eup %6159 }
 0x8d7   : > { %v4407_v61 = vmul.f32 %v6160_v29, %v4391_v56 }
 0x8d9   : > { %4411 = vst [vmem:[%s6651_s9 + $0x8] sm:$0xff] %v4407_v61 }
 0x8da   : > { %v6162_v10 = vpop.eup %6161 }
 0x8db   : > { %v4408_v1 = vmul.f32 %v6162_v10, %v4392_v63 }
 0x8dd   : > { %4412 = vst [vmem:[%s6651_s9 + $0x10] sm:$0xff] %v4408_v1 }
 0x8de   : > { %v6164_v8 = vpop.eup %6163 }
 0x8df   : > { %v4409_v13 = vmul.f32 %v6164_v8, %v4393_v62 }
 0x8e1   : > { %4413 = vst [vmem:[%s6651_s9 + $0x18] sm:$0xff] %v4409_v13 }
 0x95a   : > { %v4422_v47 = vpop.xlane.xlu0 %4421 }
 0x95b   : > { %v4423_v24 = vrot.slane %v4422_v47, 4 }
 0x95d   : > { %v4424_v25 = vadd.f32 %v4423_v24, %v4422_v47 }
 0x95f   : > { %v4425_v14 = vrot.slane %v4424_v25, 2 }
 0x961   : > { %v4426_v49 = vadd.f32 %v4425_v14, %v4424_v25 }
 0x963   : > { %v4427_v2 = vrot.slane %v4426_v49, 1 }
 0x965   : > { %v4428_v12 = vadd.f32 %v4427_v2, %v4426_v49 }
 0x967   : > { %5445 = vpush %v4428_v12 }
 0x998   : > { %s5446_s30 = spop %5445 }
 0x999   : > { %s4430_s24 = ssub.f32 0.0, %s5446_s30 }
 0x99b   : > { %v4431_v5 = vstv %s4430_s24 }
 0x99c   : > { %4433 = vst.msk [vmem:[%s571_s17] sm:$0x1] %vm4432_vm3, %v4431_v5 }
 0x99d PF: > { %s7535_s8 = sld [smem:[#allocation27_spill]]  ;;  %s7536_s29 = smov %s6397_s15 }
 0x99e   : > { %s7537_s30 = smov %s6401_s16  ;;  %s7538_s15 = smov %s7541_s20 }
 0x99f   : > { %s7539_s16 = smov %s7545_s23 }
 0x9a3   : > { %s29_s17 = sadd.s32 1, %s7535_s8  }
 0x9a4   : > { %p26_p1 = scmp.ge.s32.totalorder %s29_s17, 6  }
 0x9a6   :  { %28 = sbr.rel (!%p26_p1) target bundleno = 14 (0xe), region = 240 }
 0x9ab   :  { %4484 = vsyncpa [#allocation9], 1 }
 0x9ac   :  { %4486 = vsyncpa [#allocation9 + $0x1], 1 }
 0x9ad   :  { %4487 = vsyncpa [#allocation11], 1 }
 0x9ae   :  { %4488 = vsyncpa [#allocation14], 1 }
 0x9af   :  { %4489 = vsyncpa [#allocation17], 1 }
 0x9b0   :  { %4490 = vsyncmov [#allocation4] }
 0x9b3   :  { %s4491_s7 = vpop.sfrf %4490 }
 0x9b4   :  { %p5268_p7 = scmp.ne.s32.totalorder %s4491_s7, 0 }
 0x9b6   :  { %4495 = shalt.err (%p5268_p7)  }
 0x9b7   :  { %4497 = vsyncmov [#allocation4 + $0x1] }
 0x9ba   :  { %s4498_s9 = vpop.sfrf %4497 }
 0x9bb   :  { %p5269_p4 = scmp.ne.s32.totalorder %s4498_s9, 0 }
 0x9bd   :  { %4502 = shalt.err (%p5269_p4)  }

</bundles_post_ra>
